<compile_context>
chip_gen: v7x
topology: tpu7x:2x2x1
jax: 0.10.0
libtpu: 0.0.40
codegen_flags: <defaults>
</compile_context>

<pallas_src>
import functools

import jax
import jax.numpy as jnp
import numpy as np
from jax.experimental import pallas as pl
from jax.experimental.pallas import tpu as pltpu


def _cbam_kernel(x_ref, fcw_ref, fcb_ref, wmm_ref, wmx_ref, out_ref, *, W, KS):
    """One (B, C, HW) block of images per grid step.

    x_ref:   (B, C, HW)    input block (channels on sublanes, flat spatial on lanes)
    fcw_ref: (C, C)        1x1-conv (fc) weight [out_ch, in_ch]
    fcb_ref: (C, 1)        fc bias
    wmm_ref: (KS*KS, HW)   per-tap 7x7 weight (mean channel) * "same"-padding validity mask
    wmx_ref: (KS*KS, HW)   per-tap 7x7 weight (max  channel) * validity mask
    out_ref: (B, C, HW)
    """
    B, _, HW = x_ref.shape
    P = KS // 2

    # Inputs here are f32; for bf16 activations (v6e/v7x) the two gating multiplies could
    # stay in bf16 and only the pooled fc path / conv accumulators kept in f32.
    x = x_ref[...].astype(jnp.float32)                                   # (B, C, HW)

    # ---- Channel attention: ca = sigmoid(fc_w @ mean_hw(x) + fc_b) ----
    # Pool first (linearity: fc_w @ mean(x) == mean(fc_w @ x)); the remaining per-image
    # matvec is (C,C)x(C,1) -- negligible, and the MXU is otherwise idle in this kernel.
    pooled = jnp.mean(x, axis=2, keepdims=True)                          # (B, C, 1)
    logits = [
        jnp.dot(fcw_ref[...], pooled[b], preferred_element_type=jnp.float32)
        + fcb_ref[...]
        for b in range(B)                                                # B is small & static
    ]
    ca = jax.nn.sigmoid(jnp.stack(logits, axis=0))                       # (B, C, 1)
    y = x * ca                                                           # (B, C, HW)

    # ---- Spatial attention: sa = sigmoid(conv7x7(cat[mean_c(y), max_c(y)])) ----
    mean_map = jnp.mean(y, axis=1, keepdims=True)                        # (B, 1, HW)
    max_map = jnp.max(y, axis=1, keepdims=True)                          # (B, 1, HW)

    # "Same" conv on the flat HW axis: each tap is a static lane roll (XLU) of the unpadded
    # map; the precomputed masks (already scaled by the tap weight) zero every position
    # whose source pixel is out of bounds -- including roll wrap-around -- so no halo buffer
    # is needed.  Four independent accumulators keep the 49-tap chain off the VALU latency.
    acc0 = jnp.zeros((B, 1, HW), jnp.float32)
    acc1 = jnp.zeros((B, 1, HW), jnp.float32)
    acc2 = jnp.zeros((B, 1, HW), jnp.float32)
    acc3 = jnp.zeros((B, 1, HW), jnp.float32)
    for kh in range(KS):
        dh = kh - P
        for kw in range(KS):
            dw = kw - P
            t = kh * KS + kw
            s = dh * W + dw                                              # flat source offset
            if s == 0:
                rm, rx = mean_map, max_map
            else:
                shift = (-s) % HW                                        # static, >= 0
                rm = pltpu.roll(mean_map, shift=shift, axis=2)
                rx = pltpu.roll(max_map, shift=shift, axis=2)
            cm = wmm_ref[t:t + 1, :] * rm                                # (B, 1, HW)
            cx = wmx_ref[t:t + 1, :] * rx
            if t % 2 == 0:
                acc0 = acc0 + cm
                acc1 = acc1 + cx
            else:
                acc2 = acc2 + cm
                acc3 = acc3 + cx
    conv = (acc0 + acc2) + (acc1 + acc3)                                 # (B, 1, HW)
    sa = jax.nn.sigmoid(conv)

    out_ref[...] = (y * sa).astype(out_ref.dtype)


def _images_per_step(N, C, HW, itemsize):
    """Images per grid step: large enough to amortize the fixed per-step cost and fill
    sublanes at small C, but (a) keep >= 2 grid steps so the "parallel" axis can use both
    v7x TensorCores and (b) bound the static unroll of the per-image fc matvec."""
    bytes_per_img = max(1, C * HW * itemsize)
    target = max(1, (1 << 20) // bytes_per_img)            # ~1 MiB input block
    cap = N if N < 2 else max(1, N // 2)                   # keep >= 2 grid steps
    b = max(1, min(target, cap, 8))
    while N % b:                                           # must tile N exactly
        b -= 1
    return b


def cbam_forward(x_nchw, fc_w, fc_b, sa_w):
    """x_nchw: (N, C, H, W); fc_w: (C, C); fc_b: (C,); sa_w: (1, 2, KS, KS)."""
    N, C, H, W = x_nchw.shape
    HW = H * W
    KS = sa_w.shape[-1]
    P = KS // 2

    B = _images_per_step(N, C, HW, jnp.dtype(x_nchw.dtype).itemsize)

    x_flat = x_nchw.reshape(N, C, HW)                      # free, contiguous reshape
    fc_w32 = fc_w.astype(jnp.float32)
    fc_b32 = fc_b.reshape(C, 1).astype(jnp.float32)

    # Host-precomputed per-tap "same"-padding validity masks (1 where the shifted source
    # pixel is inside the image, 0 where it is out of bounds / would wrap), with the 7x7
    # tap weights folded in so the kernel does a single multiply per tap and channel.
    row = np.arange(HW, dtype=np.int64) // W
    col = np.arange(HW, dtype=np.int64) % W
    masks = np.zeros((KS * KS, HW), np.float32)
    for kh in range(KS):
        for kw in range(KS):
            dh, dw = kh - P, kw - P
            valid = ((row + dh >= 0) & (row + dh < H) &
                     (col + dw >= 0) & (col + dw < W))
            masks[kh * KS + kw] = valid.astype(np.float32)
    w_flat = sa_w.reshape(2, KS * KS).astype(jnp.float32)
    wmask_mean = jnp.asarray(masks) * w_flat[0][:, None]   # (KS*KS, HW)
    wmask_max = jnp.asarray(masks) * w_flat[1][:, None]

    out_flat = pl.pallas_call(
        functools.partial(_cbam_kernel, W=W, KS=KS),
        out_shape=jax.ShapeDtypeStruct((N, C, HW), x_nchw.dtype),
        grid=(N // B,),
        in_specs=[
            pl.BlockSpec((B, C, HW), lambda n: (n, 0, 0)),
            # Grid-invariant weights / masks: constant index_map.  (At large C these could
            # additionally be single-buffered and vmem_limit_bytes re-derived per chip.)
            pl.BlockSpec((C, C), lambda n: (0, 0)),
            pl.BlockSpec((C, 1), lambda n: (0, 0)),
            pl.BlockSpec((KS * KS, HW), lambda n: (0, 0)),
            pl.BlockSpec((KS * KS, HW), lambda n: (0, 0)),
        ],
        out_specs=pl.BlockSpec((B, C, HW), lambda n: (n, 0, 0)),
        compiler_params=pltpu.CompilerParams(
            dimension_semantics=("parallel",),
            vmem_limit_bytes=32 * 1024 * 1024,
        ),
    )(x_flat, fc_w32, fc_b32, wmask_mean, wmask_max)

    return out_flat.reshape(N, C, H, W)


class CBAMPallas:
    """Pallas implementation of CBAM(c1, kernel_size=7) forward."""

    def __init__(self, channels, kernel_size=7, key=None):
        assert kernel_size in (3, 7), "kernel size must be 3 or 7"
        assert key is not None
        self.channels = channels
        self.kernel_size = kernel_size
        k1, k2, k3 = jax.random.split(key, 3)
        # ChannelAttention.fc = Conv2d(C, C, 1, bias=True): bound = 1/sqrt(fan_in)
        bound_fc = 1.0 / np.sqrt(channels)
        self.fc_w = jax.random.uniform(k1, (channels, channels), jnp.float32,
                                       -bound_fc, bound_fc)
        self.fc_b = jax.random.uniform(k2, (channels,), jnp.float32,
                                       -bound_fc, bound_fc)
        # SpatialAttention.cv1 = Conv2d(2, 1, ks, padding=ks//2, bias=False)
        bound_sa = 1.0 / np.sqrt(2 * kernel_size * kernel_size)
        self.sa_w = jax.random.uniform(k3, (1, 2, kernel_size, kernel_size),
                                       jnp.float32, -bound_sa, bound_sa)

    def __call__(self, x_nchw):
        return cbam_forward(x_nchw, self.fc_w, self.fc_b, self.sa_w)


def _reference(x, module):
    """Pure-JAX CBAM reference for the correctness check."""
    fc_w, fc_b, sa_w = module.fc_w, module.fc_b, module.sa_w
    # Channel attention
    pooled = jnp.mean(x, axis=(2, 3), keepdims=True)                      # (N,C,1,1)
    logits = jnp.einsum("oc,ncij->noij", fc_w, pooled) + fc_b.reshape(1, -1, 1, 1)
    y = x * jax.nn.sigmoid(logits)
    # Spatial attention
    maps = jnp.concatenate([jnp.mean(y, axis=1, keepdims=True),
                            jnp.max(y, axis=1, keepdims=True)], axis=1)   # (N,2,H,W)
    p = module.kernel_size // 2
    conv = jax.lax.conv_general_dilated(
        maps, sa_w, window_strides=(1, 1), padding=((p, p), (p, p)),
        dimension_numbers=("NCHW", "OIHW", "NCHW"))                       # (N,1,H,W)
    return y * jax.nn.sigmoid(conv)


if __name__ == "__main__":
    key = jax.random.PRNGKey(0)
    key, xk, mk = jax.random.split(key, 3)

    N, C, H, W = 2, 4, 16, 16
    x = jax.random.normal(xk, (N, C, H, W), jnp.float32)   # NCHW, like PyTorch

    module = CBAMPallas(C, kernel_size=7, key=mk)

    out = jax.block_until_ready(module(x))
    assert out.shape == (N, C, H, W), out.shape

    ref = jax.block_until_ready(_reference(x, module))
    np.testing.assert_allclose(np.asarray(out), np.asarray(ref), rtol=1e-4, atol=1e-4)

    print("KERNEL_OK")
</pallas_src>

<mosaic_0001>
module attributes {stable_mosaic.version = 11 : i64} {
  func.func @_cbam_kernel(%arg0: i32, %arg1: memref<1x4x256xf32, #tpu.memory_space<vmem>>, %arg2: memref<4x4xf32, #tpu.memory_space<vmem>>, %arg3: memref<4x1xf32, #tpu.memory_space<vmem>>, %arg4: memref<49x256xf32, #tpu.memory_space<vmem>>, %arg5: memref<49x256xf32, #tpu.memory_space<vmem>>, %arg6: memref<1x4x256xf32, #tpu.memory_space<vmem>>) attributes {dimension_semantics = [#tpu.dimension_semantics<parallel>], iteration_bounds = array<i64: 2>, scalar_prefetch = 0 : i64, scratch_operands = 0 : i64, tpu.core_type = #tpu.core_type<tc>, window_params = [{transform_indices = @transform_0, window_bounds = array<i64: 1, 4, 256>}, {pipeline_mode = #tpu.pipeline_mode<synchronous>, transform_indices = @transform_1, window_bounds = array<i64: 4, 4>}, {pipeline_mode = #tpu.pipeline_mode<synchronous>, transform_indices = @transform_2, window_bounds = array<i64: 4, 1>}, {pipeline_mode = #tpu.pipeline_mode<synchronous>, transform_indices = @transform_3, window_bounds = array<i64: 49, 256>}, {pipeline_mode = #tpu.pipeline_mode<synchronous>, transform_indices = @transform_4, window_bounds = array<i64: 49, 256>}, {transform_indices = @transform_5, window_bounds = array<i64: 1, 4, 256>}]} {
    %c0 = arith.constant 0 : index
    %c0_0 = arith.constant 0 : index
    %c0_1 = arith.constant 0 : index
    %0 = vector.load %arg1[%c0, %c0_0, %c0_1] : memref<1x4x256xf32, #tpu.memory_space<vmem>>, vector<1x4x256xf32>
    %cst = arith.constant dense<0.000000e+00> : vector<1x4xf32>
    %1 = vector.multi_reduction <add>, %0, %cst [2] : vector<1x4x256xf32> to vector<1x4xf32>
    %2 = vector.shape_cast %1 : vector<1x4xf32> to vector<1x4x1xf32>
    %cst_2 = arith.constant 2.560000e+02 : f32
    %3 = vector.broadcast %cst_2 : f32 to vector<1x4x1xf32>
    %4 = arith.divf %2, %3 : vector<1x4x1xf32>
    %c0_3 = arith.constant 0 : index
    %c0_4 = arith.constant 0 : index
    %5 = vector.load %arg2[%c0_3, %c0_4] : memref<4x4xf32, #tpu.memory_space<vmem>>, vector<4x4xf32>
    %6 = vector.shape_cast %4 : vector<1x4x1xf32> to vector<4x1xf32>
    %cst_5 = arith.constant dense<0.000000e+00> : vector<4x1xf32>
    %7 = tpu.matmul %5, %6, %cst_5 {dimension_numbers = #tpu.dot_dimension_numbers<[1], [0], [0], [1], [0, 0, 1, 1], [], []>} : vector<4x4xf32>, vector<4x1xf32>, vector<4x1xf32> -> vector<4x1xf32>
    %c0_6 = arith.constant 0 : index
    %c0_7 = arith.constant 0 : index
    %8 = vector.load %arg3[%c0_6, %c0_7] : memref<4x1xf32, #tpu.memory_space<vmem>>, vector<4x1xf32>
    %9 = arith.addf %7, %8 : vector<4x1xf32>
    %10 = vector.shape_cast %9 : vector<4x1xf32> to vector<1x4x1xf32>
    %11 = arith.negf %10 : vector<1x4x1xf32>
    %12 = math.exp %11 : vector<1x4x1xf32>
    %cst_8 = arith.constant 1.000000e+00 : f32
    %13 = vector.broadcast %cst_8 : f32 to vector<1x4x1xf32>
    %14 = arith.addf %13, %12 : vector<1x4x1xf32>
    %15 = arith.divf %13, %14 : vector<1x4x1xf32>
    %16 = vector.broadcast %15 : vector<1x4x1xf32> to vector<1x4x256xf32>
    %17 = arith.mulf %0, %16 : vector<1x4x256xf32>
    %cst_9 = arith.constant dense<0.000000e+00> : vector<1x256xf32>
    %18 = vector.multi_reduction <add>, %17, %cst_9 [1] : vector<1x4x256xf32> to vector<1x256xf32>
    %19 = vector.shape_cast %18 : vector<1x256xf32> to vector<1x1x256xf32>
    %cst_10 = arith.constant 4.000000e+00 : f32
    %20 = vector.broadcast %cst_10 : f32 to vector<1x1x256xf32>
    %21 = arith.divf %19, %20 : vector<1x1x256xf32>
    %cst_11 = arith.constant dense<0xFF800000> : vector<1x256xf32>
    %22 = vector.multi_reduction <maximumf>, %17, %cst_11 [1] : vector<1x4x256xf32> to vector<1x256xf32>
    %23 = vector.shape_cast %22 : vector<1x256xf32> to vector<1x1x256xf32>
    %cst_12 = arith.constant 0.000000e+00 : f32
    %24 = vector.broadcast %cst_12 : f32 to vector<1x1x256xf32>
    %cst_13 = arith.constant 0.000000e+00 : f32
    %25 = vector.broadcast %cst_13 : f32 to vector<1x1x256xf32>
    %cst_14 = arith.constant 0.000000e+00 : f32
    %26 = vector.broadcast %cst_14 : f32 to vector<1x1x256xf32>
    %cst_15 = arith.constant 0.000000e+00 : f32
    %27 = vector.broadcast %cst_15 : f32 to vector<1x1x256xf32>
    %c51_i32 = arith.constant 51 : i32
    %28 = tpu.dynamic_rotate %21 by %c51_i32 dim 2 : vector<1x1x256xf32>, i32 -> vector<1x1x256xf32>
    %c51_i32_16 = arith.constant 51 : i32
    %29 = tpu.dynamic_rotate %23 by %c51_i32_16 dim 2 : vector<1x1x256xf32>, i32 -> vector<1x1x256xf32>
    %c0_17 = arith.constant 0 : index
    %c0_18 = arith.constant 0 : index
    %30 = vector.load %arg4[%c0_17, %c0_18] : memref<49x256xf32, #tpu.memory_space<vmem>>, vector<1x256xf32>
    %31 = vector.shape_cast %30 : vector<1x256xf32> to vector<1x1x256xf32>
    %32 = arith.mulf %31, %28 : vector<1x1x256xf32>
    %c0_19 = arith.constant 0 : index
    %c0_20 = arith.constant 0 : index
    %33 = vector.load %arg5[%c0_19, %c0_20] : memref<49x256xf32, #tpu.memory_space<vmem>>, vector<1x256xf32>
    %34 = vector.shape_cast %33 : vector<1x256xf32> to vector<1x1x256xf32>
    %35 = arith.mulf %34, %29 : vector<1x1x256xf32>
    %36 = arith.addf %24, %32 : vector<1x1x256xf32>
    %37 = arith.addf %25, %35 : vector<1x1x256xf32>
    %c50_i32 = arith.constant 50 : i32
    %38 = tpu.dynamic_rotate %21 by %c50_i32 dim 2 : vector<1x1x256xf32>, i32 -> vector<1x1x256xf32>
    %c50_i32_21 = arith.constant 50 : i32
    %39 = tpu.dynamic_rotate %23 by %c50_i32_21 dim 2 : vector<1x1x256xf32>, i32 -> vector<1x1x256xf32>
    %c1 = arith.constant 1 : index
    %c0_22 = arith.constant 0 : index
    %40 = vector.load %arg4[%c1, %c0_22] : memref<49x256xf32, #tpu.memory_space<vmem>>, vector<1x256xf32>
    %41 = vector.shape_cast %40 : vector<1x256xf32> to vector<1x1x256xf32>
    %42 = arith.mulf %41, %38 : vector<1x1x256xf32>
    %c1_23 = arith.constant 1 : index
    %c0_24 = arith.constant 0 : index
    %43 = vector.load %arg5[%c1_23, %c0_24] : memref<49x256xf32, #tpu.memory_space<vmem>>, vector<1x256xf32>
    %44 = vector.shape_cast %43 : vector<1x256xf32> to vector<1x1x256xf32>
    %45 = arith.mulf %44, %39 : vector<1x1x256xf32>
    %46 = arith.addf %26, %42 : vector<1x1x256xf32>
    %47 = arith.addf %27, %45 : vector<1x1x256xf32>
    %c49_i32 = arith.constant 49 : i32
    %48 = tpu.dynamic_rotate %21 by %c49_i32 dim 2 : vector<1x1x256xf32>, i32 -> vector<1x1x256xf32>
    %c49_i32_25 = arith.constant 49 : i32
    %49 = tpu.dynamic_rotate %23 by %c49_i32_25 dim 2 : vector<1x1x256xf32>, i32 -> vector<1x1x256xf32>
    %c2 = arith.constant 2 : index
    %c0_26 = arith.constant 0 : index
    %50 = vector.load %arg4[%c2, %c0_26] : memref<49x256xf32, #tpu.memory_space<vmem>>, vector<1x256xf32>
    %51 = vector.shape_cast %50 : vector<1x256xf32> to vector<1x1x256xf32>
    %52 = arith.mulf %51, %48 : vector<1x1x256xf32>
    %c2_27 = arith.constant 2 : index
    %c0_28 = arith.constant 0 : index
    %53 = vector.load %arg5[%c2_27, %c0_28] : memref<49x256xf32, #tpu.memory_space<vmem>>, vector<1x256xf32>
    %54 = vector.shape_cast %53 : vector<1x256xf32> to vector<1x1x256xf32>
    %55 = arith.mulf %54, %49 : vector<1x1x256xf32>
    %56 = arith.addf %36, %52 : vector<1x1x256xf32>
    %57 = arith.addf %37, %55 : vector<1x1x256xf32>
    %c48_i32 = arith.constant 48 : i32
    %58 = tpu.dynamic_rotate %21 by %c48_i32 dim 2 : vector<1x1x256xf32>, i32 -> vector<1x1x256xf32>
    %c48_i32_29 = arith.constant 48 : i32
    %59 = tpu.dynamic_rotate %23 by %c48_i32_29 dim 2 : vector<1x1x256xf32>, i32 -> vector<1x1x256xf32>
    %c3 = arith.constant 3 : index
    %c0_30 = arith.constant 0 : index
    %60 = vector.load %arg4[%c3, %c0_30] : memref<49x256xf32, #tpu.memory_space<vmem>>, vector<1x256xf32>
    %61 = vector.shape_cast %60 : vector<1x256xf32> to vector<1x1x256xf32>
    %62 = arith.mulf %61, %58 : vector<1x1x256xf32>
    %c3_31 = arith.constant 3 : index
    %c0_32 = arith.constant 0 : index
    %63 = vector.load %arg5[%c3_31, %c0_32] : memref<49x256xf32, #tpu.memory_space<vmem>>, vector<1x256xf32>
    %64 = vector.shape_cast %63 : vector<1x256xf32> to vector<1x1x256xf32>
    %65 = arith.mulf %64, %59 : vector<1x1x256xf32>
    %66 = arith.addf %46, %62 : vector<1x1x256xf32>
    %67 = arith.addf %47, %65 : vector<1x1x256xf32>
    %c47_i32 = arith.constant 47 : i32
    %68 = tpu.dynamic_rotate %21 by %c47_i32 dim 2 : vector<1x1x256xf32>, i32 -> vector<1x1x256xf32>
    %c47_i32_33 = arith.constant 47 : i32
    %69 = tpu.dynamic_rotate %23 by %c47_i32_33 dim 2 : vector<1x1x256xf32>, i32 -> vector<1x1x256xf32>
    %c4 = arith.constant 4 : index
    %c0_34 = arith.constant 0 : index
    %70 = vector.load %arg4[%c4, %c0_34] : memref<49x256xf32, #tpu.memory_space<vmem>>, vector<1x256xf32>
    %71 = vector.shape_cast %70 : vector<1x256xf32> to vector<1x1x256xf32>
    %72 = arith.mulf %71, %68 : vector<1x1x256xf32>
    %c4_35 = arith.constant 4 : index
    %c0_36 = arith.constant 0 : index
    %73 = vector.load %arg5[%c4_35, %c0_36] : memref<49x256xf32, #tpu.memory_space<vmem>>, vector<1x256xf32>
    %74 = vector.shape_cast %73 : vector<1x256xf32> to vector<1x1x256xf32>
    %75 = arith.mulf %74, %69 : vector<1x1x256xf32>
    %76 = arith.addf %56, %72 : vector<1x1x256xf32>
    %77 = arith.addf %57, %75 : vector<1x1x256xf32>
    %c46_i32 = arith.constant 46 : i32
    %78 = tpu.dynamic_rotate %21 by %c46_i32 dim 2 : vector<1x1x256xf32>, i32 -> vector<1x1x256xf32>
    %c46_i32_37 = arith.constant 46 : i32
    %79 = tpu.dynamic_rotate %23 by %c46_i32_37 dim 2 : vector<1x1x256xf32>, i32 -> vector<1x1x256xf32>
    %c5 = arith.constant 5 : index
    %c0_38 = arith.constant 0 : index
    %80 = vector.load %arg4[%c5, %c0_38] : memref<49x256xf32, #tpu.memory_space<vmem>>, vector<1x256xf32>
    %81 = vector.shape_cast %80 : vector<1x256xf32> to vector<1x1x256xf32>
    %82 = arith.mulf %81, %78 : vector<1x1x256xf32>
    %c5_39 = arith.constant 5 : index
    %c0_40 = arith.constant 0 : index
    %83 = vector.load %arg5[%c5_39, %c0_40] : memref<49x256xf32, #tpu.memory_space<vmem>>, vector<1x256xf32>
    %84 = vector.shape_cast %83 : vector<1x256xf32> to vector<1x1x256xf32>
    %85 = arith.mulf %84, %79 : vector<1x1x256xf32>
    %86 = arith.addf %66, %82 : vector<1x1x256xf32>
    %87 = arith.addf %67, %85 : vector<1x1x256xf32>
    %c45_i32 = arith.constant 45 : i32
    %88 = tpu.dynamic_rotate %21 by %c45_i32 dim 2 : vector<1x1x256xf32>, i32 -> vector<1x1x256xf32>
    %c45_i32_41 = arith.constant 45 : i32
    %89 = tpu.dynamic_rotate %23 by %c45_i32_41 dim 2 : vector<1x1x256xf32>, i32 -> vector<1x1x256xf32>
    %c6 = arith.constant 6 : index
    %c0_42 = arith.constant 0 : index
    %90 = vector.load %arg4[%c6, %c0_42] : memref<49x256xf32, #tpu.memory_space<vmem>>, vector<1x256xf32>
    %91 = vector.shape_cast %90 : vector<1x256xf32> to vector<1x1x256xf32>
    %92 = arith.mulf %91, %88 : vector<1x1x256xf32>
    %c6_43 = arith.constant 6 : index
    %c0_44 = arith.constant 0 : index
    %93 = vector.load %arg5[%c6_43, %c0_44] : memref<49x256xf32, #tpu.memory_space<vmem>>, vector<1x256xf32>
    %94 = vector.shape_cast %93 : vector<1x256xf32> to vector<1x1x256xf32>
    %95 = arith.mulf %94, %89 : vector<1x1x256xf32>
    %96 = arith.addf %76, %92 : vector<1x1x256xf32>
    %97 = arith.addf %77, %95 : vector<1x1x256xf32>
    %c35_i32 = arith.constant 35 : i32
    %98 = tpu.dynamic_rotate %21 by %c35_i32 dim 2 : vector<1x1x256xf32>, i32 -> vector<1x1x256xf32>
    %c35_i32_45 = arith.constant 35 : i32
    %99 = tpu.dynamic_rotate %23 by %c35_i32_45 dim 2 : vector<1x1x256xf32>, i32 -> vector<1x1x256xf32>
    %c7 = arith.constant 7 : index
    %c0_46 = arith.constant 0 : index
    %100 = vector.load %arg4[%c7, %c0_46] : memref<49x256xf32, #tpu.memory_space<vmem>>, vector<1x256xf32>
    %101 = vector.shape_cast %100 : vector<1x256xf32> to vector<1x1x256xf32>
    %102 = arith.mulf %101, %98 : vector<1x1x256xf32>
    %c7_47 = arith.constant 7 : index
    %c0_48 = arith.constant 0 : index
    %103 = vector.load %arg5[%c7_47, %c0_48] : memref<49x256xf32, #tpu.memory_space<vmem>>, vector<1x256xf32>
    %104 = vector.shape_cast %103 : vector<1x256xf32> to vector<1x1x256xf32>
    %105 = arith.mulf %104, %99 : vector<1x1x256xf32>
    %106 = arith.addf %86, %102 : vector<1x1x256xf32>
    %107 = arith.addf %87, %105 : vector<1x1x256xf32>
    %c34_i32 = arith.constant 34 : i32
    %108 = tpu.dynamic_rotate %21 by %c34_i32 dim 2 : vector<1x1x256xf32>, i32 -> vector<1x1x256xf32>
    %c34_i32_49 = arith.constant 34 : i32
    %109 = tpu.dynamic_rotate %23 by %c34_i32_49 dim 2 : vector<1x1x256xf32>, i32 -> vector<1x1x256xf32>
    %c8 = arith.constant 8 : index
    %c0_50 = arith.constant 0 : index
    %110 = vector.load %arg4[%c8, %c0_50] : memref<49x256xf32, #tpu.memory_space<vmem>>, vector<1x256xf32>
    %111 = vector.shape_cast %110 : vector<1x256xf32> to vector<1x1x256xf32>
    %112 = arith.mulf %111, %108 : vector<1x1x256xf32>
    %c8_51 = arith.constant 8 : index
    %c0_52 = arith.constant 0 : index
    %113 = vector.load %arg5[%c8_51, %c0_52] : memref<49x256xf32, #tpu.memory_space<vmem>>, vector<1x256xf32>
    %114 = vector.shape_cast %113 : vector<1x256xf32> to vector<1x1x256xf32>
    %115 = arith.mulf %114, %109 : vector<1x1x256xf32>
    %116 = arith.addf %96, %112 : vector<1x1x256xf32>
    %117 = arith.addf %97, %115 : vector<1x1x256xf32>
    %c33_i32 = arith.constant 33 : i32
    %118 = tpu.dynamic_rotate %21 by %c33_i32 dim 2 : vector<1x1x256xf32>, i32 -> vector<1x1x256xf32>
    %c33_i32_53 = arith.constant 33 : i32
    %119 = tpu.dynamic_rotate %23 by %c33_i32_53 dim 2 : vector<1x1x256xf32>, i32 -> vector<1x1x256xf32>
    %c9 = arith.constant 9 : index
    %c0_54 = arith.constant 0 : index
    %120 = vector.load %arg4[%c9, %c0_54] : memref<49x256xf32, #tpu.memory_space<vmem>>, vector<1x256xf32>
    %121 = vector.shape_cast %120 : vector<1x256xf32> to vector<1x1x256xf32>
    %122 = arith.mulf %121, %118 : vector<1x1x256xf32>
    %c9_55 = arith.constant 9 : index
    %c0_56 = arith.constant 0 : index
    %123 = vector.load %arg5[%c9_55, %c0_56] : memref<49x256xf32, #tpu.memory_space<vmem>>, vector<1x256xf32>
    %124 = vector.shape_cast %123 : vector<1x256xf32> to vector<1x1x256xf32>
    %125 = arith.mulf %124, %119 : vector<1x1x256xf32>
    %126 = arith.addf %106, %122 : vector<1x1x256xf32>
    %127 = arith.addf %107, %125 : vector<1x1x256xf32>
    %c32_i32 = arith.constant 32 : i32
    %128 = tpu.dynamic_rotate %21 by %c32_i32 dim 2 : vector<1x1x256xf32>, i32 -> vector<1x1x256xf32>
    %c32_i32_57 = arith.constant 32 : i32
    %129 = tpu.dynamic_rotate %23 by %c32_i32_57 dim 2 : vector<1x1x256xf32>, i32 -> vector<1x1x256xf32>
    %c10 = arith.constant 10 : index
    %c0_58 = arith.constant 0 : index
    %130 = vector.load %arg4[%c10, %c0_58] : memref<49x256xf32, #tpu.memory_space<vmem>>, vector<1x256xf32>
    %131 = vector.shape_cast %130 : vector<1x256xf32> to vector<1x1x256xf32>
    %132 = arith.mulf %131, %128 : vector<1x1x256xf32>
    %c10_59 = arith.constant 10 : index
    %c0_60 = arith.constant 0 : index
    %133 = vector.load %arg5[%c10_59, %c0_60] : memref<49x256xf32, #tpu.memory_space<vmem>>, vector<1x256xf32>
    %134 = vector.shape_cast %133 : vector<1x256xf32> to vector<1x1x256xf32>
    %135 = arith.mulf %134, %129 : vector<1x1x256xf32>
    %136 = arith.addf %116, %132 : vector<1x1x256xf32>
    %137 = arith.addf %117, %135 : vector<1x1x256xf32>
    %c31_i32 = arith.constant 31 : i32
    %138 = tpu.dynamic_rotate %21 by %c31_i32 dim 2 : vector<1x1x256xf32>, i32 -> vector<1x1x256xf32>
    %c31_i32_61 = arith.constant 31 : i32
    %139 = tpu.dynamic_rotate %23 by %c31_i32_61 dim 2 : vector<1x1x256xf32>, i32 -> vector<1x1x256xf32>
    %c11 = arith.constant 11 : index
    %c0_62 = arith.constant 0 : index
    %140 = vector.load %arg4[%c11, %c0_62] : memref<49x256xf32, #tpu.memory_space<vmem>>, vector<1x256xf32>
    %141 = vector.shape_cast %140 : vector<1x256xf32> to vector<1x1x256xf32>
    %142 = arith.mulf %141, %138 : vector<1x1x256xf32>
    %c11_63 = arith.constant 11 : index
    %c0_64 = arith.constant 0 : index
    %143 = vector.load %arg5[%c11_63, %c0_64] : memref<49x256xf32, #tpu.memory_space<vmem>>, vector<1x256xf32>
    %144 = vector.shape_cast %143 : vector<1x256xf32> to vector<1x1x256xf32>
    %145 = arith.mulf %144, %139 : vector<1x1x256xf32>
    %146 = arith.addf %126, %142 : vector<1x1x256xf32>
    %147 = arith.addf %127, %145 : vector<1x1x256xf32>
    %c30_i32 = arith.constant 30 : i32
    %148 = tpu.dynamic_rotate %21 by %c30_i32 dim 2 : vector<1x1x256xf32>, i32 -> vector<1x1x256xf32>
    %c30_i32_65 = arith.constant 30 : i32
    %149 = tpu.dynamic_rotate %23 by %c30_i32_65 dim 2 : vector<1x1x256xf32>, i32 -> vector<1x1x256xf32>
    %c12 = arith.constant 12 : index
    %c0_66 = arith.constant 0 : index
    %150 = vector.load %arg4[%c12, %c0_66] : memref<49x256xf32, #tpu.memory_space<vmem>>, vector<1x256xf32>
    %151 = vector.shape_cast %150 : vector<1x256xf32> to vector<1x1x256xf32>
    %152 = arith.mulf %151, %148 : vector<1x1x256xf32>
    %c12_67 = arith.constant 12 : index
    %c0_68 = arith.constant 0 : index
    %153 = vector.load %arg5[%c12_67, %c0_68] : memref<49x256xf32, #tpu.memory_space<vmem>>, vector<1x256xf32>
    %154 = vector.shape_cast %153 : vector<1x256xf32> to vector<1x1x256xf32>
    %155 = arith.mulf %154, %149 : vector<1x1x256xf32>
    %156 = arith.addf %136, %152 : vector<1x1x256xf32>
    %157 = arith.addf %137, %155 : vector<1x1x256xf32>
    %c29_i32 = arith.constant 29 : i32
    %158 = tpu.dynamic_rotate %21 by %c29_i32 dim 2 : vector<1x1x256xf32>, i32 -> vector<1x1x256xf32>
    %c29_i32_69 = arith.constant 29 : i32
    %159 = tpu.dynamic_rotate %23 by %c29_i32_69 dim 2 : vector<1x1x256xf32>, i32 -> vector<1x1x256xf32>
    %c13 = arith.constant 13 : index
    %c0_70 = arith.constant 0 : index
    %160 = vector.load %arg4[%c13, %c0_70] : memref<49x256xf32, #tpu.memory_space<vmem>>, vector<1x256xf32>
    %161 = vector.shape_cast %160 : vector<1x256xf32> to vector<1x1x256xf32>
    %162 = arith.mulf %161, %158 : vector<1x1x256xf32>
    %c13_71 = arith.constant 13 : index
    %c0_72 = arith.constant 0 : index
    %163 = vector.load %arg5[%c13_71, %c0_72] : memref<49x256xf32, #tpu.memory_space<vmem>>, vector<1x256xf32>
    %164 = vector.shape_cast %163 : vector<1x256xf32> to vector<1x1x256xf32>
    %165 = arith.mulf %164, %159 : vector<1x1x256xf32>
    %166 = arith.addf %146, %162 : vector<1x1x256xf32>
    %167 = arith.addf %147, %165 : vector<1x1x256xf32>
    %c19_i32 = arith.constant 19 : i32
    %168 = tpu.dynamic_rotate %21 by %c19_i32 dim 2 : vector<1x1x256xf32>, i32 -> vector<1x1x256xf32>
    %c19_i32_73 = arith.constant 19 : i32
    %169 = tpu.dynamic_rotate %23 by %c19_i32_73 dim 2 : vector<1x1x256xf32>, i32 -> vector<1x1x256xf32>
    %c14 = arith.constant 14 : index
    %c0_74 = arith.constant 0 : index
    %170 = vector.load %arg4[%c14, %c0_74] : memref<49x256xf32, #tpu.memory_space<vmem>>, vector<1x256xf32>
    %171 = vector.shape_cast %170 : vector<1x256xf32> to vector<1x1x256xf32>
    %172 = arith.mulf %171, %168 : vector<1x1x256xf32>
    %c14_75 = arith.constant 14 : index
    %c0_76 = arith.constant 0 : index
    %173 = vector.load %arg5[%c14_75, %c0_76] : memref<49x256xf32, #tpu.memory_space<vmem>>, vector<1x256xf32>
    %174 = vector.shape_cast %173 : vector<1x256xf32> to vector<1x1x256xf32>
    %175 = arith.mulf %174, %169 : vector<1x1x256xf32>
    %176 = arith.addf %156, %172 : vector<1x1x256xf32>
    %177 = arith.addf %157, %175 : vector<1x1x256xf32>
    %c18_i32 = arith.constant 18 : i32
    %178 = tpu.dynamic_rotate %21 by %c18_i32 dim 2 : vector<1x1x256xf32>, i32 -> vector<1x1x256xf32>
    %c18_i32_77 = arith.constant 18 : i32
    %179 = tpu.dynamic_rotate %23 by %c18_i32_77 dim 2 : vector<1x1x256xf32>, i32 -> vector<1x1x256xf32>
    %c15 = arith.constant 15 : index
    %c0_78 = arith.constant 0 : index
    %180 = vector.load %arg4[%c15, %c0_78] : memref<49x256xf32, #tpu.memory_space<vmem>>, vector<1x256xf32>
    %181 = vector.shape_cast %180 : vector<1x256xf32> to vector<1x1x256xf32>
    %182 = arith.mulf %181, %178 : vector<1x1x256xf32>
    %c15_79 = arith.constant 15 : index
    %c0_80 = arith.constant 0 : index
    %183 = vector.load %arg5[%c15_79, %c0_80] : memref<49x256xf32, #tpu.memory_space<vmem>>, vector<1x256xf32>
    %184 = vector.shape_cast %183 : vector<1x256xf32> to vector<1x1x256xf32>
    %185 = arith.mulf %184, %179 : vector<1x1x256xf32>
    %186 = arith.addf %166, %182 : vector<1x1x256xf32>
    %187 = arith.addf %167, %185 : vector<1x1x256xf32>
    %c17_i32 = arith.constant 17 : i32
    %188 = tpu.dynamic_rotate %21 by %c17_i32 dim 2 : vector<1x1x256xf32>, i32 -> vector<1x1x256xf32>
    %c17_i32_81 = arith.constant 17 : i32
    %189 = tpu.dynamic_rotate %23 by %c17_i32_81 dim 2 : vector<1x1x256xf32>, i32 -> vector<1x1x256xf32>
    %c16 = arith.constant 16 : index
    %c0_82 = arith.constant 0 : index
    %190 = vector.load %arg4[%c16, %c0_82] : memref<49x256xf32, #tpu.memory_space<vmem>>, vector<1x256xf32>
    %191 = vector.shape_cast %190 : vector<1x256xf32> to vector<1x1x256xf32>
    %192 = arith.mulf %191, %188 : vector<1x1x256xf32>
    %c16_83 = arith.constant 16 : index
    %c0_84 = arith.constant 0 : index
    %193 = vector.load %arg5[%c16_83, %c0_84] : memref<49x256xf32, #tpu.memory_space<vmem>>, vector<1x256xf32>
    %194 = vector.shape_cast %193 : vector<1x256xf32> to vector<1x1x256xf32>
    %195 = arith.mulf %194, %189 : vector<1x1x256xf32>
    %196 = arith.addf %176, %192 : vector<1x1x256xf32>
    %197 = arith.addf %177, %195 : vector<1x1x256xf32>
    %c16_i32 = arith.constant 16 : i32
    %198 = tpu.dynamic_rotate %21 by %c16_i32 dim 2 : vector<1x1x256xf32>, i32 -> vector<1x1x256xf32>
    %c16_i32_85 = arith.constant 16 : i32
    %199 = tpu.dynamic_rotate %23 by %c16_i32_85 dim 2 : vector<1x1x256xf32>, i32 -> vector<1x1x256xf32>
    %c17 = arith.constant 17 : index
    %c0_86 = arith.constant 0 : index
    %200 = vector.load %arg4[%c17, %c0_86] : memref<49x256xf32, #tpu.memory_space<vmem>>, vector<1x256xf32>
    %201 = vector.shape_cast %200 : vector<1x256xf32> to vector<1x1x256xf32>
    %202 = arith.mulf %201, %198 : vector<1x1x256xf32>
    %c17_87 = arith.constant 17 : index
    %c0_88 = arith.constant 0 : index
    %203 = vector.load %arg5[%c17_87, %c0_88] : memref<49x256xf32, #tpu.memory_space<vmem>>, vector<1x256xf32>
    %204 = vector.shape_cast %203 : vector<1x256xf32> to vector<1x1x256xf32>
    %205 = arith.mulf %204, %199 : vector<1x1x256xf32>
    %206 = arith.addf %186, %202 : vector<1x1x256xf32>
    %207 = arith.addf %187, %205 : vector<1x1x256xf32>
    %c15_i32 = arith.constant 15 : i32
    %208 = tpu.dynamic_rotate %21 by %c15_i32 dim 2 : vector<1x1x256xf32>, i32 -> vector<1x1x256xf32>
    %c15_i32_89 = arith.constant 15 : i32
    %209 = tpu.dynamic_rotate %23 by %c15_i32_89 dim 2 : vector<1x1x256xf32>, i32 -> vector<1x1x256xf32>
    %c18 = arith.constant 18 : index
    %c0_90 = arith.constant 0 : index
    %210 = vector.load %arg4[%c18, %c0_90] : memref<49x256xf32, #tpu.memory_space<vmem>>, vector<1x256xf32>
    %211 = vector.shape_cast %210 : vector<1x256xf32> to vector<1x1x256xf32>
    %212 = arith.mulf %211, %208 : vector<1x1x256xf32>
    %c18_91 = arith.constant 18 : index
    %c0_92 = arith.constant 0 : index
    %213 = vector.load %arg5[%c18_91, %c0_92] : memref<49x256xf32, #tpu.memory_space<vmem>>, vector<1x256xf32>
    %214 = vector.shape_cast %213 : vector<1x256xf32> to vector<1x1x256xf32>
    %215 = arith.mulf %214, %209 : vector<1x1x256xf32>
    %216 = arith.addf %196, %212 : vector<1x1x256xf32>
    %217 = arith.addf %197, %215 : vector<1x1x256xf32>
    %c14_i32 = arith.constant 14 : i32
    %218 = tpu.dynamic_rotate %21 by %c14_i32 dim 2 : vector<1x1x256xf32>, i32 -> vector<1x1x256xf32>
    %c14_i32_93 = arith.constant 14 : i32
    %219 = tpu.dynamic_rotate %23 by %c14_i32_93 dim 2 : vector<1x1x256xf32>, i32 -> vector<1x1x256xf32>
    %c19 = arith.constant 19 : index
    %c0_94 = arith.constant 0 : index
    %220 = vector.load %arg4[%c19, %c0_94] : memref<49x256xf32, #tpu.memory_space<vmem>>, vector<1x256xf32>
    %221 = vector.shape_cast %220 : vector<1x256xf32> to vector<1x1x256xf32>
    %222 = arith.mulf %221, %218 : vector<1x1x256xf32>
    %c19_95 = arith.constant 19 : index
    %c0_96 = arith.constant 0 : index
    %223 = vector.load %arg5[%c19_95, %c0_96] : memref<49x256xf32, #tpu.memory_space<vmem>>, vector<1x256xf32>
    %224 = vector.shape_cast %223 : vector<1x256xf32> to vector<1x1x256xf32>
    %225 = arith.mulf %224, %219 : vector<1x1x256xf32>
    %226 = arith.addf %206, %222 : vector<1x1x256xf32>
    %227 = arith.addf %207, %225 : vector<1x1x256xf32>
    %c13_i32 = arith.constant 13 : i32
    %228 = tpu.dynamic_rotate %21 by %c13_i32 dim 2 : vector<1x1x256xf32>, i32 -> vector<1x1x256xf32>
    %c13_i32_97 = arith.constant 13 : i32
    %229 = tpu.dynamic_rotate %23 by %c13_i32_97 dim 2 : vector<1x1x256xf32>, i32 -> vector<1x1x256xf32>
    %c20 = arith.constant 20 : index
    %c0_98 = arith.constant 0 : index
    %230 = vector.load %arg4[%c20, %c0_98] : memref<49x256xf32, #tpu.memory_space<vmem>>, vector<1x256xf32>
    %231 = vector.shape_cast %230 : vector<1x256xf32> to vector<1x1x256xf32>
    %232 = arith.mulf %231, %228 : vector<1x1x256xf32>
    %c20_99 = arith.constant 20 : index
    %c0_100 = arith.constant 0 : index
    %233 = vector.load %arg5[%c20_99, %c0_100] : memref<49x256xf32, #tpu.memory_space<vmem>>, vector<1x256xf32>
    %234 = vector.shape_cast %233 : vector<1x256xf32> to vector<1x1x256xf32>
    %235 = arith.mulf %234, %229 : vector<1x1x256xf32>
    %236 = arith.addf %216, %232 : vector<1x1x256xf32>
    %237 = arith.addf %217, %235 : vector<1x1x256xf32>
    %c3_i32 = arith.constant 3 : i32
    %238 = tpu.dynamic_rotate %21 by %c3_i32 dim 2 : vector<1x1x256xf32>, i32 -> vector<1x1x256xf32>
    %c3_i32_101 = arith.constant 3 : i32
    %239 = tpu.dynamic_rotate %23 by %c3_i32_101 dim 2 : vector<1x1x256xf32>, i32 -> vector<1x1x256xf32>
    %c21 = arith.constant 21 : index
    %c0_102 = arith.constant 0 : index
    %240 = vector.load %arg4[%c21, %c0_102] : memref<49x256xf32, #tpu.memory_space<vmem>>, vector<1x256xf32>
    %241 = vector.shape_cast %240 : vector<1x256xf32> to vector<1x1x256xf32>
    %242 = arith.mulf %241, %238 : vector<1x1x256xf32>
    %c21_103 = arith.constant 21 : index
    %c0_104 = arith.constant 0 : index
    %243 = vector.load %arg5[%c21_103, %c0_104] : memref<49x256xf32, #tpu.memory_space<vmem>>, vector<1x256xf32>
    %244 = vector.shape_cast %243 : vector<1x256xf32> to vector<1x1x256xf32>
    %245 = arith.mulf %244, %239 : vector<1x1x256xf32>
    %246 = arith.addf %226, %242 : vector<1x1x256xf32>
    %247 = arith.addf %227, %245 : vector<1x1x256xf32>
    %c2_i32 = arith.constant 2 : i32
    %248 = tpu.dynamic_rotate %21 by %c2_i32 dim 2 : vector<1x1x256xf32>, i32 -> vector<1x1x256xf32>
    %c2_i32_105 = arith.constant 2 : i32
    %249 = tpu.dynamic_rotate %23 by %c2_i32_105 dim 2 : vector<1x1x256xf32>, i32 -> vector<1x1x256xf32>
    %c22 = arith.constant 22 : index
    %c0_106 = arith.constant 0 : index
    %250 = vector.load %arg4[%c22, %c0_106] : memref<49x256xf32, #tpu.memory_space<vmem>>, vector<1x256xf32>
    %251 = vector.shape_cast %250 : vector<1x256xf32> to vector<1x1x256xf32>
    %252 = arith.mulf %251, %248 : vector<1x1x256xf32>
    %c22_107 = arith.constant 22 : index
    %c0_108 = arith.constant 0 : index
    %253 = vector.load %arg5[%c22_107, %c0_108] : memref<49x256xf32, #tpu.memory_space<vmem>>, vector<1x256xf32>
    %254 = vector.shape_cast %253 : vector<1x256xf32> to vector<1x1x256xf32>
    %255 = arith.mulf %254, %249 : vector<1x1x256xf32>
    %256 = arith.addf %236, %252 : vector<1x1x256xf32>
    %257 = arith.addf %237, %255 : vector<1x1x256xf32>
    %c1_i32 = arith.constant 1 : i32
    %258 = tpu.dynamic_rotate %21 by %c1_i32 dim 2 : vector<1x1x256xf32>, i32 -> vector<1x1x256xf32>
    %c1_i32_109 = arith.constant 1 : i32
    %259 = tpu.dynamic_rotate %23 by %c1_i32_109 dim 2 : vector<1x1x256xf32>, i32 -> vector<1x1x256xf32>
    %c23 = arith.constant 23 : index
    %c0_110 = arith.constant 0 : index
    %260 = vector.load %arg4[%c23, %c0_110] : memref<49x256xf32, #tpu.memory_space<vmem>>, vector<1x256xf32>
    %261 = vector.shape_cast %260 : vector<1x256xf32> to vector<1x1x256xf32>
    %262 = arith.mulf %261, %258 : vector<1x1x256xf32>
    %c23_111 = arith.constant 23 : index
    %c0_112 = arith.constant 0 : index
    %263 = vector.load %arg5[%c23_111, %c0_112] : memref<49x256xf32, #tpu.memory_space<vmem>>, vector<1x256xf32>
    %264 = vector.shape_cast %263 : vector<1x256xf32> to vector<1x1x256xf32>
    %265 = arith.mulf %264, %259 : vector<1x1x256xf32>
    %266 = arith.addf %246, %262 : vector<1x1x256xf32>
    %267 = arith.addf %247, %265 : vector<1x1x256xf32>
    %c24 = arith.constant 24 : index
    %c0_113 = arith.constant 0 : index
    %268 = vector.load %arg4[%c24, %c0_113] : memref<49x256xf32, #tpu.memory_space<vmem>>, vector<1x256xf32>
    %269 = vector.shape_cast %268 : vector<1x256xf32> to vector<1x1x256xf32>
    %270 = arith.mulf %269, %21 : vector<1x1x256xf32>
    %c24_114 = arith.constant 24 : index
    %c0_115 = arith.constant 0 : index
    %271 = vector.load %arg5[%c24_114, %c0_115] : memref<49x256xf32, #tpu.memory_space<vmem>>, vector<1x256xf32>
    %272 = vector.shape_cast %271 : vector<1x256xf32> to vector<1x1x256xf32>
    %273 = arith.mulf %272, %23 : vector<1x1x256xf32>
    %274 = arith.addf %256, %270 : vector<1x1x256xf32>
    %275 = arith.addf %257, %273 : vector<1x1x256xf32>
    %c255_i32 = arith.constant 255 : i32
    %276 = tpu.dynamic_rotate %21 by %c255_i32 dim 2 : vector<1x1x256xf32>, i32 -> vector<1x1x256xf32>
    %c255_i32_116 = arith.constant 255 : i32
    %277 = tpu.dynamic_rotate %23 by %c255_i32_116 dim 2 : vector<1x1x256xf32>, i32 -> vector<1x1x256xf32>
    %c25 = arith.constant 25 : index
    %c0_117 = arith.constant 0 : index
    %278 = vector.load %arg4[%c25, %c0_117] : memref<49x256xf32, #tpu.memory_space<vmem>>, vector<1x256xf32>
    %279 = vector.shape_cast %278 : vector<1x256xf32> to vector<1x1x256xf32>
    %280 = arith.mulf %279, %276 : vector<1x1x256xf32>
    %c25_118 = arith.constant 25 : index
    %c0_119 = arith.constant 0 : index
    %281 = vector.load %arg5[%c25_118, %c0_119] : memref<49x256xf32, #tpu.memory_space<vmem>>, vector<1x256xf32>
    %282 = vector.shape_cast %281 : vector<1x256xf32> to vector<1x1x256xf32>
    %283 = arith.mulf %282, %277 : vector<1x1x256xf32>
    %284 = arith.addf %266, %280 : vector<1x1x256xf32>
    %285 = arith.addf %267, %283 : vector<1x1x256xf32>
    %c254_i32 = arith.constant 254 : i32
    %286 = tpu.dynamic_rotate %21 by %c254_i32 dim 2 : vector<1x1x256xf32>, i32 -> vector<1x1x256xf32>
    %c254_i32_120 = arith.constant 254 : i32
    %287 = tpu.dynamic_rotate %23 by %c254_i32_120 dim 2 : vector<1x1x256xf32>, i32 -> vector<1x1x256xf32>
    %c26 = arith.constant 26 : index
    %c0_121 = arith.constant 0 : index
    %288 = vector.load %arg4[%c26, %c0_121] : memref<49x256xf32, #tpu.memory_space<vmem>>, vector<1x256xf32>
    %289 = vector.shape_cast %288 : vector<1x256xf32> to vector<1x1x256xf32>
    %290 = arith.mulf %289, %286 : vector<1x1x256xf32>
    %c26_122 = arith.constant 26 : index
    %c0_123 = arith.constant 0 : index
    %291 = vector.load %arg5[%c26_122, %c0_123] : memref<49x256xf32, #tpu.memory_space<vmem>>, vector<1x256xf32>
    %292 = vector.shape_cast %291 : vector<1x256xf32> to vector<1x1x256xf32>
    %293 = arith.mulf %292, %287 : vector<1x1x256xf32>
    %294 = arith.addf %274, %290 : vector<1x1x256xf32>
    %295 = arith.addf %275, %293 : vector<1x1x256xf32>
    %c253_i32 = arith.constant 253 : i32
    %296 = tpu.dynamic_rotate %21 by %c253_i32 dim 2 : vector<1x1x256xf32>, i32 -> vector<1x1x256xf32>
    %c253_i32_124 = arith.constant 253 : i32
    %297 = tpu.dynamic_rotate %23 by %c253_i32_124 dim 2 : vector<1x1x256xf32>, i32 -> vector<1x1x256xf32>
    %c27 = arith.constant 27 : index
    %c0_125 = arith.constant 0 : index
    %298 = vector.load %arg4[%c27, %c0_125] : memref<49x256xf32, #tpu.memory_space<vmem>>, vector<1x256xf32>
    %299 = vector.shape_cast %298 : vector<1x256xf32> to vector<1x1x256xf32>
    %300 = arith.mulf %299, %296 : vector<1x1x256xf32>
    %c27_126 = arith.constant 27 : index
    %c0_127 = arith.constant 0 : index
    %301 = vector.load %arg5[%c27_126, %c0_127] : memref<49x256xf32, #tpu.memory_space<vmem>>, vector<1x256xf32>
    %302 = vector.shape_cast %301 : vector<1x256xf32> to vector<1x1x256xf32>
    %303 = arith.mulf %302, %297 : vector<1x1x256xf32>
    %304 = arith.addf %284, %300 : vector<1x1x256xf32>
    %305 = arith.addf %285, %303 : vector<1x1x256xf32>
    %c243_i32 = arith.constant 243 : i32
    %306 = tpu.dynamic_rotate %21 by %c243_i32 dim 2 : vector<1x1x256xf32>, i32 -> vector<1x1x256xf32>
    %c243_i32_128 = arith.constant 243 : i32
    %307 = tpu.dynamic_rotate %23 by %c243_i32_128 dim 2 : vector<1x1x256xf32>, i32 -> vector<1x1x256xf32>
    %c28 = arith.constant 28 : index
    %c0_129 = arith.constant 0 : index
    %308 = vector.load %arg4[%c28, %c0_129] : memref<49x256xf32, #tpu.memory_space<vmem>>, vector<1x256xf32>
    %309 = vector.shape_cast %308 : vector<1x256xf32> to vector<1x1x256xf32>
    %310 = arith.mulf %309, %306 : vector<1x1x256xf32>
    %c28_130 = arith.constant 28 : index
    %c0_131 = arith.constant 0 : index
    %311 = vector.load %arg5[%c28_130, %c0_131] : memref<49x256xf32, #tpu.memory_space<vmem>>, vector<1x256xf32>
    %312 = vector.shape_cast %311 : vector<1x256xf32> to vector<1x1x256xf32>
    %313 = arith.mulf %312, %307 : vector<1x1x256xf32>
    %314 = arith.addf %294, %310 : vector<1x1x256xf32>
    %315 = arith.addf %295, %313 : vector<1x1x256xf32>
    %c242_i32 = arith.constant 242 : i32
    %316 = tpu.dynamic_rotate %21 by %c242_i32 dim 2 : vector<1x1x256xf32>, i32 -> vector<1x1x256xf32>
    %c242_i32_132 = arith.constant 242 : i32
    %317 = tpu.dynamic_rotate %23 by %c242_i32_132 dim 2 : vector<1x1x256xf32>, i32 -> vector<1x1x256xf32>
    %c29 = arith.constant 29 : index
    %c0_133 = arith.constant 0 : index
    %318 = vector.load %arg4[%c29, %c0_133] : memref<49x256xf32, #tpu.memory_space<vmem>>, vector<1x256xf32>
    %319 = vector.shape_cast %318 : vector<1x256xf32> to vector<1x1x256xf32>
    %320 = arith.mulf %319, %316 : vector<1x1x256xf32>
    %c29_134 = arith.constant 29 : index
    %c0_135 = arith.constant 0 : index
    %321 = vector.load %arg5[%c29_134, %c0_135] : memref<49x256xf32, #tpu.memory_space<vmem>>, vector<1x256xf32>
    %322 = vector.shape_cast %321 : vector<1x256xf32> to vector<1x1x256xf32>
    %323 = arith.mulf %322, %317 : vector<1x1x256xf32>
    %324 = arith.addf %304, %320 : vector<1x1x256xf32>
    %325 = arith.addf %305, %323 : vector<1x1x256xf32>
    %c241_i32 = arith.constant 241 : i32
    %326 = tpu.dynamic_rotate %21 by %c241_i32 dim 2 : vector<1x1x256xf32>, i32 -> vector<1x1x256xf32>
    %c241_i32_136 = arith.constant 241 : i32
    %327 = tpu.dynamic_rotate %23 by %c241_i32_136 dim 2 : vector<1x1x256xf32>, i32 -> vector<1x1x256xf32>
    %c30 = arith.constant 30 : index
    %c0_137 = arith.constant 0 : index
    %328 = vector.load %arg4[%c30, %c0_137] : memref<49x256xf32, #tpu.memory_space<vmem>>, vector<1x256xf32>
    %329 = vector.shape_cast %328 : vector<1x256xf32> to vector<1x1x256xf32>
    %330 = arith.mulf %329, %326 : vector<1x1x256xf32>
    %c30_138 = arith.constant 30 : index
    %c0_139 = arith.constant 0 : index
    %331 = vector.load %arg5[%c30_138, %c0_139] : memref<49x256xf32, #tpu.memory_space<vmem>>, vector<1x256xf32>
    %332 = vector.shape_cast %331 : vector<1x256xf32> to vector<1x1x256xf32>
    %333 = arith.mulf %332, %327 : vector<1x1x256xf32>
    %334 = arith.addf %314, %330 : vector<1x1x256xf32>
    %335 = arith.addf %315, %333 : vector<1x1x256xf32>
    %c240_i32 = arith.constant 240 : i32
    %336 = tpu.dynamic_rotate %21 by %c240_i32 dim 2 : vector<1x1x256xf32>, i32 -> vector<1x1x256xf32>
    %c240_i32_140 = arith.constant 240 : i32
    %337 = tpu.dynamic_rotate %23 by %c240_i32_140 dim 2 : vector<1x1x256xf32>, i32 -> vector<1x1x256xf32>
    %c31 = arith.constant 31 : index
    %c0_141 = arith.constant 0 : index
    %338 = vector.load %arg4[%c31, %c0_141] : memref<49x256xf32, #tpu.memory_space<vmem>>, vector<1x256xf32>
    %339 = vector.shape_cast %338 : vector<1x256xf32> to vector<1x1x256xf32>
    %340 = arith.mulf %339, %336 : vector<1x1x256xf32>
    %c31_142 = arith.constant 31 : index
    %c0_143 = arith.constant 0 : index
    %341 = vector.load %arg5[%c31_142, %c0_143] : memref<49x256xf32, #tpu.memory_space<vmem>>, vector<1x256xf32>
    %342 = vector.shape_cast %341 : vector<1x256xf32> to vector<1x1x256xf32>
    %343 = arith.mulf %342, %337 : vector<1x1x256xf32>
    %344 = arith.addf %324, %340 : vector<1x1x256xf32>
    %345 = arith.addf %325, %343 : vector<1x1x256xf32>
    %c239_i32 = arith.constant 239 : i32
    %346 = tpu.dynamic_rotate %21 by %c239_i32 dim 2 : vector<1x1x256xf32>, i32 -> vector<1x1x256xf32>
    %c239_i32_144 = arith.constant 239 : i32
    %347 = tpu.dynamic_rotate %23 by %c239_i32_144 dim 2 : vector<1x1x256xf32>, i32 -> vector<1x1x256xf32>
    %c32 = arith.constant 32 : index
    %c0_145 = arith.constant 0 : index
    %348 = vector.load %arg4[%c32, %c0_145] : memref<49x256xf32, #tpu.memory_space<vmem>>, vector<1x256xf32>
    %349 = vector.shape_cast %348 : vector<1x256xf32> to vector<1x1x256xf32>
    %350 = arith.mulf %349, %346 : vector<1x1x256xf32>
    %c32_146 = arith.constant 32 : index
    %c0_147 = arith.constant 0 : index
    %351 = vector.load %arg5[%c32_146, %c0_147] : memref<49x256xf32, #tpu.memory_space<vmem>>, vector<1x256xf32>
    %352 = vector.shape_cast %351 : vector<1x256xf32> to vector<1x1x256xf32>
    %353 = arith.mulf %352, %347 : vector<1x1x256xf32>
    %354 = arith.addf %334, %350 : vector<1x1x256xf32>
    %355 = arith.addf %335, %353 : vector<1x1x256xf32>
    %c238_i32 = arith.constant 238 : i32
    %356 = tpu.dynamic_rotate %21 by %c238_i32 dim 2 : vector<1x1x256xf32>, i32 -> vector<1x1x256xf32>
    %c238_i32_148 = arith.constant 238 : i32
    %357 = tpu.dynamic_rotate %23 by %c238_i32_148 dim 2 : vector<1x1x256xf32>, i32 -> vector<1x1x256xf32>
    %c33 = arith.constant 33 : index
    %c0_149 = arith.constant 0 : index
    %358 = vector.load %arg4[%c33, %c0_149] : memref<49x256xf32, #tpu.memory_space<vmem>>, vector<1x256xf32>
    %359 = vector.shape_cast %358 : vector<1x256xf32> to vector<1x1x256xf32>
    %360 = arith.mulf %359, %356 : vector<1x1x256xf32>
    %c33_150 = arith.constant 33 : index
    %c0_151 = arith.constant 0 : index
    %361 = vector.load %arg5[%c33_150, %c0_151] : memref<49x256xf32, #tpu.memory_space<vmem>>, vector<1x256xf32>
    %362 = vector.shape_cast %361 : vector<1x256xf32> to vector<1x1x256xf32>
    %363 = arith.mulf %362, %357 : vector<1x1x256xf32>
    %364 = arith.addf %344, %360 : vector<1x1x256xf32>
    %365 = arith.addf %345, %363 : vector<1x1x256xf32>
    %c237_i32 = arith.constant 237 : i32
    %366 = tpu.dynamic_rotate %21 by %c237_i32 dim 2 : vector<1x1x256xf32>, i32 -> vector<1x1x256xf32>
    %c237_i32_152 = arith.constant 237 : i32
    %367 = tpu.dynamic_rotate %23 by %c237_i32_152 dim 2 : vector<1x1x256xf32>, i32 -> vector<1x1x256xf32>
    %c34 = arith.constant 34 : index
    %c0_153 = arith.constant 0 : index
    %368 = vector.load %arg4[%c34, %c0_153] : memref<49x256xf32, #tpu.memory_space<vmem>>, vector<1x256xf32>
    %369 = vector.shape_cast %368 : vector<1x256xf32> to vector<1x1x256xf32>
    %370 = arith.mulf %369, %366 : vector<1x1x256xf32>
    %c34_154 = arith.constant 34 : index
    %c0_155 = arith.constant 0 : index
    %371 = vector.load %arg5[%c34_154, %c0_155] : memref<49x256xf32, #tpu.memory_space<vmem>>, vector<1x256xf32>
    %372 = vector.shape_cast %371 : vector<1x256xf32> to vector<1x1x256xf32>
    %373 = arith.mulf %372, %367 : vector<1x1x256xf32>
    %374 = arith.addf %354, %370 : vector<1x1x256xf32>
    %375 = arith.addf %355, %373 : vector<1x1x256xf32>
    %c227_i32 = arith.constant 227 : i32
    %376 = tpu.dynamic_rotate %21 by %c227_i32 dim 2 : vector<1x1x256xf32>, i32 -> vector<1x1x256xf32>
    %c227_i32_156 = arith.constant 227 : i32
    %377 = tpu.dynamic_rotate %23 by %c227_i32_156 dim 2 : vector<1x1x256xf32>, i32 -> vector<1x1x256xf32>
    %c35 = arith.constant 35 : index
    %c0_157 = arith.constant 0 : index
    %378 = vector.load %arg4[%c35, %c0_157] : memref<49x256xf32, #tpu.memory_space<vmem>>, vector<1x256xf32>
    %379 = vector.shape_cast %378 : vector<1x256xf32> to vector<1x1x256xf32>
    %380 = arith.mulf %379, %376 : vector<1x1x256xf32>
    %c35_158 = arith.constant 35 : index
    %c0_159 = arith.constant 0 : index
    %381 = vector.load %arg5[%c35_158, %c0_159] : memref<49x256xf32, #tpu.memory_space<vmem>>, vector<1x256xf32>
    %382 = vector.shape_cast %381 : vector<1x256xf32> to vector<1x1x256xf32>
    %383 = arith.mulf %382, %377 : vector<1x1x256xf32>
    %384 = arith.addf %364, %380 : vector<1x1x256xf32>
    %385 = arith.addf %365, %383 : vector<1x1x256xf32>
    %c226_i32 = arith.constant 226 : i32
    %386 = tpu.dynamic_rotate %21 by %c226_i32 dim 2 : vector<1x1x256xf32>, i32 -> vector<1x1x256xf32>
    %c226_i32_160 = arith.constant 226 : i32
    %387 = tpu.dynamic_rotate %23 by %c226_i32_160 dim 2 : vector<1x1x256xf32>, i32 -> vector<1x1x256xf32>
    %c36 = arith.constant 36 : index
    %c0_161 = arith.constant 0 : index
    %388 = vector.load %arg4[%c36, %c0_161] : memref<49x256xf32, #tpu.memory_space<vmem>>, vector<1x256xf32>
    %389 = vector.shape_cast %388 : vector<1x256xf32> to vector<1x1x256xf32>
    %390 = arith.mulf %389, %386 : vector<1x1x256xf32>
    %c36_162 = arith.constant 36 : index
    %c0_163 = arith.constant 0 : index
    %391 = vector.load %arg5[%c36_162, %c0_163] : memref<49x256xf32, #tpu.memory_space<vmem>>, vector<1x256xf32>
    %392 = vector.shape_cast %391 : vector<1x256xf32> to vector<1x1x256xf32>
    %393 = arith.mulf %392, %387 : vector<1x1x256xf32>
    %394 = arith.addf %374, %390 : vector<1x1x256xf32>
    %395 = arith.addf %375, %393 : vector<1x1x256xf32>
    %c225_i32 = arith.constant 225 : i32
    %396 = tpu.dynamic_rotate %21 by %c225_i32 dim 2 : vector<1x1x256xf32>, i32 -> vector<1x1x256xf32>
    %c225_i32_164 = arith.constant 225 : i32
    %397 = tpu.dynamic_rotate %23 by %c225_i32_164 dim 2 : vector<1x1x256xf32>, i32 -> vector<1x1x256xf32>
    %c37 = arith.constant 37 : index
    %c0_165 = arith.constant 0 : index
    %398 = vector.load %arg4[%c37, %c0_165] : memref<49x256xf32, #tpu.memory_space<vmem>>, vector<1x256xf32>
    %399 = vector.shape_cast %398 : vector<1x256xf32> to vector<1x1x256xf32>
    %400 = arith.mulf %399, %396 : vector<1x1x256xf32>
    %c37_166 = arith.constant 37 : index
    %c0_167 = arith.constant 0 : index
    %401 = vector.load %arg5[%c37_166, %c0_167] : memref<49x256xf32, #tpu.memory_space<vmem>>, vector<1x256xf32>
    %402 = vector.shape_cast %401 : vector<1x256xf32> to vector<1x1x256xf32>
    %403 = arith.mulf %402, %397 : vector<1x1x256xf32>
    %404 = arith.addf %384, %400 : vector<1x1x256xf32>
    %405 = arith.addf %385, %403 : vector<1x1x256xf32>
    %c224_i32 = arith.constant 224 : i32
    %406 = tpu.dynamic_rotate %21 by %c224_i32 dim 2 : vector<1x1x256xf32>, i32 -> vector<1x1x256xf32>
    %c224_i32_168 = arith.constant 224 : i32
    %407 = tpu.dynamic_rotate %23 by %c224_i32_168 dim 2 : vector<1x1x256xf32>, i32 -> vector<1x1x256xf32>
    %c38 = arith.constant 38 : index
    %c0_169 = arith.constant 0 : index
    %408 = vector.load %arg4[%c38, %c0_169] : memref<49x256xf32, #tpu.memory_space<vmem>>, vector<1x256xf32>
    %409 = vector.shape_cast %408 : vector<1x256xf32> to vector<1x1x256xf32>
    %410 = arith.mulf %409, %406 : vector<1x1x256xf32>
    %c38_170 = arith.constant 38 : index
    %c0_171 = arith.constant 0 : index
    %411 = vector.load %arg5[%c38_170, %c0_171] : memref<49x256xf32, #tpu.memory_space<vmem>>, vector<1x256xf32>
    %412 = vector.shape_cast %411 : vector<1x256xf32> to vector<1x1x256xf32>
    %413 = arith.mulf %412, %407 : vector<1x1x256xf32>
    %414 = arith.addf %394, %410 : vector<1x1x256xf32>
    %415 = arith.addf %395, %413 : vector<1x1x256xf32>
    %c223_i32 = arith.constant 223 : i32
    %416 = tpu.dynamic_rotate %21 by %c223_i32 dim 2 : vector<1x1x256xf32>, i32 -> vector<1x1x256xf32>
    %c223_i32_172 = arith.constant 223 : i32
    %417 = tpu.dynamic_rotate %23 by %c223_i32_172 dim 2 : vector<1x1x256xf32>, i32 -> vector<1x1x256xf32>
    %c39 = arith.constant 39 : index
    %c0_173 = arith.constant 0 : index
    %418 = vector.load %arg4[%c39, %c0_173] : memref<49x256xf32, #tpu.memory_space<vmem>>, vector<1x256xf32>
    %419 = vector.shape_cast %418 : vector<1x256xf32> to vector<1x1x256xf32>
    %420 = arith.mulf %419, %416 : vector<1x1x256xf32>
    %c39_174 = arith.constant 39 : index
    %c0_175 = arith.constant 0 : index
    %421 = vector.load %arg5[%c39_174, %c0_175] : memref<49x256xf32, #tpu.memory_space<vmem>>, vector<1x256xf32>
    %422 = vector.shape_cast %421 : vector<1x256xf32> to vector<1x1x256xf32>
    %423 = arith.mulf %422, %417 : vector<1x1x256xf32>
    %424 = arith.addf %404, %420 : vector<1x1x256xf32>
    %425 = arith.addf %405, %423 : vector<1x1x256xf32>
    %c222_i32 = arith.constant 222 : i32
    %426 = tpu.dynamic_rotate %21 by %c222_i32 dim 2 : vector<1x1x256xf32>, i32 -> vector<1x1x256xf32>
    %c222_i32_176 = arith.constant 222 : i32
    %427 = tpu.dynamic_rotate %23 by %c222_i32_176 dim 2 : vector<1x1x256xf32>, i32 -> vector<1x1x256xf32>
    %c40 = arith.constant 40 : index
    %c0_177 = arith.constant 0 : index
    %428 = vector.load %arg4[%c40, %c0_177] : memref<49x256xf32, #tpu.memory_space<vmem>>, vector<1x256xf32>
    %429 = vector.shape_cast %428 : vector<1x256xf32> to vector<1x1x256xf32>
    %430 = arith.mulf %429, %426 : vector<1x1x256xf32>
    %c40_178 = arith.constant 40 : index
    %c0_179 = arith.constant 0 : index
    %431 = vector.load %arg5[%c40_178, %c0_179] : memref<49x256xf32, #tpu.memory_space<vmem>>, vector<1x256xf32>
    %432 = vector.shape_cast %431 : vector<1x256xf32> to vector<1x1x256xf32>
    %433 = arith.mulf %432, %427 : vector<1x1x256xf32>
    %434 = arith.addf %414, %430 : vector<1x1x256xf32>
    %435 = arith.addf %415, %433 : vector<1x1x256xf32>
    %c221_i32 = arith.constant 221 : i32
    %436 = tpu.dynamic_rotate %21 by %c221_i32 dim 2 : vector<1x1x256xf32>, i32 -> vector<1x1x256xf32>
    %c221_i32_180 = arith.constant 221 : i32
    %437 = tpu.dynamic_rotate %23 by %c221_i32_180 dim 2 : vector<1x1x256xf32>, i32 -> vector<1x1x256xf32>
    %c41 = arith.constant 41 : index
    %c0_181 = arith.constant 0 : index
    %438 = vector.load %arg4[%c41, %c0_181] : memref<49x256xf32, #tpu.memory_space<vmem>>, vector<1x256xf32>
    %439 = vector.shape_cast %438 : vector<1x256xf32> to vector<1x1x256xf32>
    %440 = arith.mulf %439, %436 : vector<1x1x256xf32>
    %c41_182 = arith.constant 41 : index
    %c0_183 = arith.constant 0 : index
    %441 = vector.load %arg5[%c41_182, %c0_183] : memref<49x256xf32, #tpu.memory_space<vmem>>, vector<1x256xf32>
    %442 = vector.shape_cast %441 : vector<1x256xf32> to vector<1x1x256xf32>
    %443 = arith.mulf %442, %437 : vector<1x1x256xf32>
    %444 = arith.addf %424, %440 : vector<1x1x256xf32>
    %445 = arith.addf %425, %443 : vector<1x1x256xf32>
    %c211_i32 = arith.constant 211 : i32
    %446 = tpu.dynamic_rotate %21 by %c211_i32 dim 2 : vector<1x1x256xf32>, i32 -> vector<1x1x256xf32>
    %c211_i32_184 = arith.constant 211 : i32
    %447 = tpu.dynamic_rotate %23 by %c211_i32_184 dim 2 : vector<1x1x256xf32>, i32 -> vector<1x1x256xf32>
    %c42 = arith.constant 42 : index
    %c0_185 = arith.constant 0 : index
    %448 = vector.load %arg4[%c42, %c0_185] : memref<49x256xf32, #tpu.memory_space<vmem>>, vector<1x256xf32>
    %449 = vector.shape_cast %448 : vector<1x256xf32> to vector<1x1x256xf32>
    %450 = arith.mulf %449, %446 : vector<1x1x256xf32>
    %c42_186 = arith.constant 42 : index
    %c0_187 = arith.constant 0 : index
    %451 = vector.load %arg5[%c42_186, %c0_187] : memref<49x256xf32, #tpu.memory_space<vmem>>, vector<1x256xf32>
    %452 = vector.shape_cast %451 : vector<1x256xf32> to vector<1x1x256xf32>
    %453 = arith.mulf %452, %447 : vector<1x1x256xf32>
    %454 = arith.addf %434, %450 : vector<1x1x256xf32>
    %455 = arith.addf %435, %453 : vector<1x1x256xf32>
    %c210_i32 = arith.constant 210 : i32
    %456 = tpu.dynamic_rotate %21 by %c210_i32 dim 2 : vector<1x1x256xf32>, i32 -> vector<1x1x256xf32>
    %c210_i32_188 = arith.constant 210 : i32
    %457 = tpu.dynamic_rotate %23 by %c210_i32_188 dim 2 : vector<1x1x256xf32>, i32 -> vector<1x1x256xf32>
    %c43 = arith.constant 43 : index
    %c0_189 = arith.constant 0 : index
    %458 = vector.load %arg4[%c43, %c0_189] : memref<49x256xf32, #tpu.memory_space<vmem>>, vector<1x256xf32>
    %459 = vector.shape_cast %458 : vector<1x256xf32> to vector<1x1x256xf32>
    %460 = arith.mulf %459, %456 : vector<1x1x256xf32>
    %c43_190 = arith.constant 43 : index
    %c0_191 = arith.constant 0 : index
    %461 = vector.load %arg5[%c43_190, %c0_191] : memref<49x256xf32, #tpu.memory_space<vmem>>, vector<1x256xf32>
    %462 = vector.shape_cast %461 : vector<1x256xf32> to vector<1x1x256xf32>
    %463 = arith.mulf %462, %457 : vector<1x1x256xf32>
    %464 = arith.addf %444, %460 : vector<1x1x256xf32>
    %465 = arith.addf %445, %463 : vector<1x1x256xf32>
    %c209_i32 = arith.constant 209 : i32
    %466 = tpu.dynamic_rotate %21 by %c209_i32 dim 2 : vector<1x1x256xf32>, i32 -> vector<1x1x256xf32>
    %c209_i32_192 = arith.constant 209 : i32
    %467 = tpu.dynamic_rotate %23 by %c209_i32_192 dim 2 : vector<1x1x256xf32>, i32 -> vector<1x1x256xf32>
    %c44 = arith.constant 44 : index
    %c0_193 = arith.constant 0 : index
    %468 = vector.load %arg4[%c44, %c0_193] : memref<49x256xf32, #tpu.memory_space<vmem>>, vector<1x256xf32>
    %469 = vector.shape_cast %468 : vector<1x256xf32> to vector<1x1x256xf32>
    %470 = arith.mulf %469, %466 : vector<1x1x256xf32>
    %c44_194 = arith.constant 44 : index
    %c0_195 = arith.constant 0 : index
    %471 = vector.load %arg5[%c44_194, %c0_195] : memref<49x256xf32, #tpu.memory_space<vmem>>, vector<1x256xf32>
    %472 = vector.shape_cast %471 : vector<1x256xf32> to vector<1x1x256xf32>
    %473 = arith.mulf %472, %467 : vector<1x1x256xf32>
    %474 = arith.addf %454, %470 : vector<1x1x256xf32>
    %475 = arith.addf %455, %473 : vector<1x1x256xf32>
    %c208_i32 = arith.constant 208 : i32
    %476 = tpu.dynamic_rotate %21 by %c208_i32 dim 2 : vector<1x1x256xf32>, i32 -> vector<1x1x256xf32>
    %c208_i32_196 = arith.constant 208 : i32
    %477 = tpu.dynamic_rotate %23 by %c208_i32_196 dim 2 : vector<1x1x256xf32>, i32 -> vector<1x1x256xf32>
    %c45 = arith.constant 45 : index
    %c0_197 = arith.constant 0 : index
    %478 = vector.load %arg4[%c45, %c0_197] : memref<49x256xf32, #tpu.memory_space<vmem>>, vector<1x256xf32>
    %479 = vector.shape_cast %478 : vector<1x256xf32> to vector<1x1x256xf32>
    %480 = arith.mulf %479, %476 : vector<1x1x256xf32>
    %c45_198 = arith.constant 45 : index
    %c0_199 = arith.constant 0 : index
    %481 = vector.load %arg5[%c45_198, %c0_199] : memref<49x256xf32, #tpu.memory_space<vmem>>, vector<1x256xf32>
    %482 = vector.shape_cast %481 : vector<1x256xf32> to vector<1x1x256xf32>
    %483 = arith.mulf %482, %477 : vector<1x1x256xf32>
    %484 = arith.addf %464, %480 : vector<1x1x256xf32>
    %485 = arith.addf %465, %483 : vector<1x1x256xf32>
    %c207_i32 = arith.constant 207 : i32
    %486 = tpu.dynamic_rotate %21 by %c207_i32 dim 2 : vector<1x1x256xf32>, i32 -> vector<1x1x256xf32>
    %c207_i32_200 = arith.constant 207 : i32
    %487 = tpu.dynamic_rotate %23 by %c207_i32_200 dim 2 : vector<1x1x256xf32>, i32 -> vector<1x1x256xf32>
    %c46 = arith.constant 46 : index
    %c0_201 = arith.constant 0 : index
    %488 = vector.load %arg4[%c46, %c0_201] : memref<49x256xf32, #tpu.memory_space<vmem>>, vector<1x256xf32>
    %489 = vector.shape_cast %488 : vector<1x256xf32> to vector<1x1x256xf32>
    %490 = arith.mulf %489, %486 : vector<1x1x256xf32>
    %c46_202 = arith.constant 46 : index
    %c0_203 = arith.constant 0 : index
    %491 = vector.load %arg5[%c46_202, %c0_203] : memref<49x256xf32, #tpu.memory_space<vmem>>, vector<1x256xf32>
    %492 = vector.shape_cast %491 : vector<1x256xf32> to vector<1x1x256xf32>
    %493 = arith.mulf %492, %487 : vector<1x1x256xf32>
    %494 = arith.addf %474, %490 : vector<1x1x256xf32>
    %495 = arith.addf %475, %493 : vector<1x1x256xf32>
    %c206_i32 = arith.constant 206 : i32
    %496 = tpu.dynamic_rotate %21 by %c206_i32 dim 2 : vector<1x1x256xf32>, i32 -> vector<1x1x256xf32>
    %c206_i32_204 = arith.constant 206 : i32
    %497 = tpu.dynamic_rotate %23 by %c206_i32_204 dim 2 : vector<1x1x256xf32>, i32 -> vector<1x1x256xf32>
    %c47 = arith.constant 47 : index
    %c0_205 = arith.constant 0 : index
    %498 = vector.load %arg4[%c47, %c0_205] : memref<49x256xf32, #tpu.memory_space<vmem>>, vector<1x256xf32>
    %499 = vector.shape_cast %498 : vector<1x256xf32> to vector<1x1x256xf32>
    %500 = arith.mulf %499, %496 : vector<1x1x256xf32>
    %c47_206 = arith.constant 47 : index
    %c0_207 = arith.constant 0 : index
    %501 = vector.load %arg5[%c47_206, %c0_207] : memref<49x256xf32, #tpu.memory_space<vmem>>, vector<1x256xf32>
    %502 = vector.shape_cast %501 : vector<1x256xf32> to vector<1x1x256xf32>
    %503 = arith.mulf %502, %497 : vector<1x1x256xf32>
    %504 = arith.addf %484, %500 : vector<1x1x256xf32>
    %505 = arith.addf %485, %503 : vector<1x1x256xf32>
    %c205_i32 = arith.constant 205 : i32
    %506 = tpu.dynamic_rotate %21 by %c205_i32 dim 2 : vector<1x1x256xf32>, i32 -> vector<1x1x256xf32>
    %c205_i32_208 = arith.constant 205 : i32
    %507 = tpu.dynamic_rotate %23 by %c205_i32_208 dim 2 : vector<1x1x256xf32>, i32 -> vector<1x1x256xf32>
    %c48 = arith.constant 48 : index
    %c0_209 = arith.constant 0 : index
    %508 = vector.load %arg4[%c48, %c0_209] : memref<49x256xf32, #tpu.memory_space<vmem>>, vector<1x256xf32>
    %509 = vector.shape_cast %508 : vector<1x256xf32> to vector<1x1x256xf32>
    %510 = arith.mulf %509, %506 : vector<1x1x256xf32>
    %c48_210 = arith.constant 48 : index
    %c0_211 = arith.constant 0 : index
    %511 = vector.load %arg5[%c48_210, %c0_211] : memref<49x256xf32, #tpu.memory_space<vmem>>, vector<1x256xf32>
    %512 = vector.shape_cast %511 : vector<1x256xf32> to vector<1x1x256xf32>
    %513 = arith.mulf %512, %507 : vector<1x1x256xf32>
    %514 = arith.addf %494, %510 : vector<1x1x256xf32>
    %515 = arith.addf %495, %513 : vector<1x1x256xf32>
    %516 = arith.addf %514, %504 : vector<1x1x256xf32>
    %517 = arith.addf %515, %505 : vector<1x1x256xf32>
    %518 = arith.addf %516, %517 : vector<1x1x256xf32>
    %519 = arith.negf %518 : vector<1x1x256xf32>
    %520 = math.exp %519 : vector<1x1x256xf32>
    %cst_212 = arith.constant 1.000000e+00 : f32
    %521 = vector.broadcast %cst_212 : f32 to vector<1x1x256xf32>
    %522 = arith.addf %521, %520 : vector<1x1x256xf32>
    %523 = arith.divf %521, %522 : vector<1x1x256xf32>
    %524 = vector.broadcast %523 : vector<1x1x256xf32> to vector<1x4x256xf32>
    %525 = arith.mulf %17, %524 : vector<1x4x256xf32>
    %c0_213 = arith.constant 0 : index
    %c0_214 = arith.constant 0 : index
    %c0_215 = arith.constant 0 : index
    %526 = vector.load %arg6[%c0_213, %c0_214, %c0_215] : memref<1x4x256xf32, #tpu.memory_space<vmem>>, vector<1x4x256xf32>
    tpu.vector_store %arg6[%c0_213, %c0_214, %c0_215], %525 {strides = array<i32>} : memref<1x4x256xf32, #tpu.memory_space<vmem>>, vector<1x4x256xf32>,
    return
  }
  func.func @transform_0(%arg0: i32) -> (i32, i32, i32) {
    %c0_i32 = arith.constant 0 : i32
    %c0_i32_0 = arith.constant 0 : i32
    %c0_i32_1 = arith.constant 0 : i32
    return %arg0, %c0_i32, %c0_i32_0 : i32, i32, i32
  }
  func.func @transform_1(%arg0: i32) -> (i32, i32) {
    %c0_i32 = arith.constant 0 : i32
    %c0_i32_0 = arith.constant 0 : i32
    %c0_i32_1 = arith.constant 0 : i32
    return %c0_i32, %c0_i32_0 : i32, i32
  }
  func.func @transform_2(%arg0: i32) -> (i32, i32) {
    %c0_i32 = arith.constant 0 : i32
    %c0_i32_0 = arith.constant 0 : i32
    %c0_i32_1 = arith.constant 0 : i32
    return %c0_i32, %c0_i32_0 : i32, i32
  }
  func.func @transform_3(%arg0: i32) -> (i32, i32) {
    %c0_i32 = arith.constant 0 : i32
    %c0_i32_0 = arith.constant 0 : i32
    %c0_i32_1 = arith.constant 0 : i32
    return %c0_i32, %c0_i32_0 : i32, i32
  }
  func.func @transform_4(%arg0: i32) -> (i32, i32) {
    %c0_i32 = arith.constant 0 : i32
    %c0_i32_0 = arith.constant 0 : i32
    %c0_i32_1 = arith.constant 0 : i32
    return %c0_i32, %c0_i32_0 : i32, i32
  }
  func.func @transform_5(%arg0: i32) -> (i32, i32, i32) {
    %c0_i32 = arith.constant 0 : i32
    %c0_i32_0 = arith.constant 0 : i32
    %c0_i32_1 = arith.constant 0 : i32
    return %arg0, %c0_i32, %c0_i32_0 : i32, i32, i32
  }
}

</mosaic_0001>

<bundles_post_ra>
// kernel: tpu_custom_call.1
= control target key start
LH: loop header
LB: loop body
LE: loop exit
PB: predicated region body
PF: predicated region fallthrough
CT: control target
= control target key end

     0   :  { %10 = vsyncpa [#allocation3], 0  ;;  %s5523_s0 = inlined_call_operand.hbm [shape: f32[2,4,256], index: 0, kind: input, shape index: {}]   ;;  %s5524_s1 = inlined_call_operand.vmem [shape: f32[4,4], index: 1, kind: input, shape index: {}]   ;;  %s5525_s2 = inlined_call_operand.vmem [shape: f32[4,1], index: 2, kind: input, shape index: {}]   ;;  %s5526_s3 = inlined_call_operand.hbm [shape: f32[49,256], index: 3, kind: input, shape index: {}]   ;;  %s5527_s4 = inlined_call_operand.hbm [shape: f32[49,256], index: 4, kind: input, shape index: {}]   ;;  %s5528_s5 = inlined_call_operand.hbm [shape: f32[2,4,256], index: 5, kind: output, shape index: {}]  }
   0x1   :  { %12 = vsyncpa [#allocation3 + $0x1], 0 }
   0x2   :  { %13 = vsyncpa [#allocation6], 0 }
   0x3   :  { %14 = vsyncpa [#allocation4], 0 }
   0x4   :  { %16 = vsyncpa [#allocation4 + $0x1], 0  ;;  %s3730_s18 = smov 0   ;;  %s3732_s19 = smov 0  }
   0x5   :  { %s3734_s20 = smov 0   ;;  %s3736_s21 = smov 0  }
   0x6 LB: > { %s3751_s22 = sadd.s32 4294967295, %s3639_s21   ;;  %s3320_s23 = sadd.s32 4294967294, %s3639_s21   ;;  %s3639_s21 = sphi %s3736_s21, %s5825_s21   ;;  %s3635_s20 = sphi %s3734_s20, %s5824_s20   ;;  %s3631_s19 = sphi %s3732_s19, %s5823_s19   ;;  %s3627_s18 = sphi %s3730_s18, %s5822_s18  }
   0x7   : > { %p42_p0 = scmp.ne.s32.totalorder %s3631_s19, %s3627_s18  ;;  %p5529_p1 = scmp.eq.s32.totalorder %s3751_s22, 0 }
   0x8   : > { %p156_p3 = scmp.eq.s32.totalorder %s3320_s23, 1  ;;  %p3321_p5 = scmp.ge.s32.totalorder %s3639_s21, 1 }
   0x9   : > { %p3760_p4 = por %p5529_p1, %p42_p0  ;;  %p163_p7 = scmp.lt.s32.totalorder %s3639_s21, 3 }
   0xa   : > { %p3765_p6 = por %p156_p3, %p42_p0  ;;  %s3641_s27 = smov [#allocation5]  }
   0xb   : > { %s5667_s24 = scalar_select %p3760_p4, 1, 0 }
   0xc   : > { %s5668_s25 = scalar_select %p3765_p6, 1, 0 }
   0xd   : > { %p3770_p8 = pnand %p3321_p5, %p163_p7  ;;  %s181_s28 = sshll.u32 %s3641_s27, 4  ;;  %s3774_s28 = int_to_ptr.vmem [resolvable:$true] %s181_s28 }
   0xe   : > { %s3642_s30 = smov [#allocation7]   ;;  %s3483_s9 = scalar_lea.hbm %s5526_s3, 1792 }
   0xf   : > { %p3363_p9 = pneg %p3770_p8  ;;  %s194_s6 = sshll.u32 %s3642_s30, 4  ;;  %s3785_s6 = int_to_ptr.vmem [resolvable:$true] %s194_s6 }
  0x10   : > { %p3484_p12 = scmp.ne.s32.totalorder %s5526_s3, %s3483_s9  ;;  %p3490_p5 = scmp.lt.u32.totalorder %s3483_s9, %s5526_s3 }
  0x11   : > { %p3781_p11 = pnand %p3363_p9, %p5529_p1 }
  0x13   : > { %p3485_p13 = pneg %p3781_p11 }
  0x15   : > { %p3486_p0 = pnand %p3485_p13, %p3484_p12 }
  0x17   : > { %p3487_p3 = pneg %p3486_p0 }
  0x19   : > { %p3492_p7 = pnand %p3490_p5, %p3487_p3 }
  0x1b   : > { %3495 = shalt.err (!%p3492_p7)
}
  0x1c   : > { %s3496_s14 = scalar_lea.vmem %s3774_s28, 1792  ;;  %p3504_p2 = scmp.lt.s32.totalorder %s3774_s28, %s3774_s28 }
  0x1d   : > { %p3497_p9 = scmp.ne.s32.totalorder %s3774_s28, %s3496_s14  ;;  %p3505_p12 = scmp.lt.s32.totalorder %s3496_s14, %s3496_s14 }
  0x1f   : > { %p3499_p10 = pnand %p3497_p9, %p3485_p13  ;;  %p3506_p0 = por %p3505_p12, %p3504_p2 }
  0x21   : > { %p3500_p1 = pneg %p3499_p10 }
  0x23   : > { %p3507_p6 = pnand %p3506_p0, %p3500_p1 }
  0x25   : > { %3510 = shalt.err (!%p3507_p6)
}
  0x26   : > { %s3643_s15 = smov 256   ;;  %s3644_s16 = smov 16  }
  0x27   : > { %3366 = dma.hbm_to_vmem [thread:$0]  (!%p3781_p11), %s5526_s3, 1792, %s3774_s28, [#allocation6], %s3643_s15, %s3643_s15, %s3644_s16  }
  0x28   : > { %s3511_s7 = scalar_lea.hbm %s5527_s4, 1792 }
  0x29   : > { %p3512_p2 = scmp.ne.s32.totalorder %s5527_s4, %s3511_s7  ;;  %p3518_p10 = scmp.lt.u32.totalorder %s3511_s7, %s5527_s4 }
  0x2b   : > { %p3514_p1 = pnand %p3512_p2, %p3485_p13 }
  0x2d   : > { %p3515_p6 = pneg %p3514_p1 }
  0x2f   : > { %p3520_p3 = pnand %p3518_p10, %p3515_p6 }
  0x31   : > { %3523 = shalt.err (!%p3520_p3)
}
  0x32   : > { %s3524_s28 = scalar_lea.vmem %s3785_s6, 1792  ;;  %p3532_p12 = scmp.lt.s32.totalorder %s3785_s6, %s3785_s6 }
  0x33   : > { %p3525_p5 = scmp.ne.s32.totalorder %s3785_s6, %s3524_s28  ;;  %p3533_p0 = scmp.lt.s32.totalorder %s3524_s28, %s3524_s28 }
  0x35   : > { %p3527_p7 = pnand %p3525_p5, %p3485_p13  ;;  %p3534_p2 = por %p3533_p0, %p3532_p12 }
  0x37   : > { %p3528_p9 = pneg %p3527_p7 }
  0x39   : > { %p3535_p1 = pnand %p3534_p2, %p3528_p9 }
  0x3b   : > { %3538 = shalt.err (!%p3535_p1)
}
  0x3c   : > { %3369 = dma.hbm_to_vmem [thread:$0]  (!%p3781_p11), %s5527_s4, 1792, %s3785_s6, [#allocation6], %s3643_s15, %s3643_s15, %s3644_s16  }
  0x3d   : > { %s3840_s14 = sadd.s32 1, %s3639_s21   ;;  %s29_s29 = sadd.s32 1, %s3635_s20 }
  0x3e   : > { %s26_s17 = ssub.s32 %s3639_s21, %s3840_s14  ;;  %p36_p13 = scmp.ne.s32.totalorder %s3635_s20, %s3631_s19 }
  0x3f   : > { %p27_p6 = scmp.eq.s32.totalorder %s26_s17, 0  ;;  %p37_p10 = scmp.eq.s32.totalorder %s3639_s21, 0 }
  0x40   : > { %p5671_p3 = scmp.eq.s32.totalorder %s3751_s22, 1  ;;  %p3380_p7 = scmp.lt.s32.totalorder %s3639_s21, 2 }
  0x41   : > { %s3856_s27 = scalar_select %p27_p6, %s3635_s20, %s29_s29  }
  0x42   : > { %p3850_p5 = por %p5671_p3, %p36_p13  ;;  %p38_p9 = por %p37_p10, %p36_p13 }
  0x43   : > { %s208_s30 = sand.u32 1, %s3635_s20   ;;  %s3342_s6 = sshll.u32 %s3639_s21, 7 }
  0x44   : > { %s5672_s23 = scalar_select %p3850_p5, 1, 0 }
  0x45   : > { %s3325_s7 = sshll.u32 %s208_s30, 3  ;;  %s3863_s8 = scalar_lea.hbm %s5523_s0, %s3342_s6 }
  0x46   : > { %s212_s9 = scalar_lea.vmem [#allocation2], %s3325_s7  ;;  %p3867_p11 = pnand %p3380_p7, %p38_p9 }
  0x47   : > { %s220_s10 = sshll.u32 %s212_s9, 4  ;;  %s209_s28 = scalar_lea.sflag [#allocation3], %s208_s30  ;;  %s3865_s10 = int_to_ptr.vmem [resolvable:$true] %s220_s10 }
  0x48   : > { %s3539_s12 = scalar_lea.hbm %s3863_s8, 128  ;;  %p3541_p0 = pneg %p3867_p11 }
  0x49   : > { %p3540_p12 = scmp.ne.s32.totalorder %s3863_s8, %s3539_s12  ;;  %s3544_s17 = scalar_lea.hbm %s5523_s0, 256 }
  0x4a   : > { %p3545_p13 = scmp.lt.u32.totalorder %s3863_s8, %s5523_s0  ;;  %p3546_p6 = scmp.lt.u32.totalorder %s3544_s17, %s3539_s12 }
  0x4b   : > { %p3542_p2 = pnand %p3541_p0, %p3540_p12  ;;  %p3548_p3 = scmp.lt.u32.totalorder %s3539_s12, %s3863_s8 }
  0x4c   : > { %p3547_p10 = por %p3546_p6, %p3545_p13 }
  0x4d   : > { %p3543_p1 = pneg %p3542_p2 }
  0x4e   : > { %p3549_p7 = por %p3548_p3, %p3547_p10 }
  0x50   : > { %p3550_p9 = pnand %p3549_p7, %p3543_p1 }
  0x52   : > { %3553 = shalt.err (!%p3550_p9)
}
  0x53   : > { %s3554_s30 = scalar_lea.vmem %s3865_s10, 128  ;;  %s3645_s15 = smov [#allocation2]  }
  0x54   : > { %p3555_p12 = scmp.ne.s32.totalorder %s3865_s10, %s3554_s30  ;;  %s3559_s16 = sshll.u32 %s3645_s15, 4  ;;  %s3560_s16 = int_to_ptr.vmem [resolvable:$false] %s3559_s16 }
  0x55   : > { %s3561_s9 = scalar_lea.vmem %s3560_s16, 256  ;;  %p3562_p4 = scmp.lt.s32.totalorder %s3865_s10, %s3560_s16 }
  0x56   : > { %p3557_p2 = pnand %p3555_p12, %p3541_p0  ;;  %p3563_p13 = scmp.lt.s32.totalorder %s3561_s9, %s3554_s30 }
  0x58   : > { %p3558_p5 = pneg %p3557_p2  ;;  %p3564_p6 = por %p3563_p13, %p3562_p4 }
  0x5a   : > { %p3565_p10 = pnand %p3564_p6, %p3558_p5 }
  0x5c   : > { %3568 = shalt.err (!%p3565_p10)
}
  0x5d   : > { %3373 = dma.hbm_to_vmem [thread:$0]  (!%p3867_p11), %s3863_s8, 128, %s3865_s10, %s209_s28  }
  0x5e   : > { %229 = sbr.rel (%p3770_p8) target bundleno = 1224 (0x4c8), region = 40 }
  0x65   : > { %s3899_s12 = sand.u32 1, %s3631_s19   ;;  %p5674_p4 = scmp.ne.s32.totalorder %s5667_s24, 0 }
  0x66   : > { %s5532_s13 = sshll.u32 %s3899_s12, 3  ;;  %s232_s29 = scalar_lea.sflag [#allocation3], %s3899_s12 }
  0x67   : > { %s235_s17 = scalar_lea.vmem [#allocation2], %s5532_s13 }
  0x68   : > { %3614 = dma.done.wait (%p5674_p4), %s232_s29, 128  }
  0x69   : > { %3616 = vsyncadd (%p5674_p4), %s232_s29, 4294967168  ;;  %p5675_p5 = scmp.eq.s32.totalorder %s3751_s22, 0 }
  0x6b   : > { %3618 = dma.done.wait (%p5675_p5), [#allocation6], 3584   ;;  %p5676_p8 = pmov %p5675_p5 }
  0x6c   : > { %vm274_vm0 = vcmask 1043456   ;;  %v270_v0 = vld [vmem:[%s235_s17] sm:$0xff]  ;;  %v3646_v5 = vmov 0.0   ;;  %vm3647_vm1 = vmmov 0   ;;  %vm284_vm2 = vcmask 31744   ;;  %s3650_s11 = smov 48  }
  0x6d   : > { %3620 = vsyncadd (%p5676_p8), [#allocation6], 4294963712  ;;  %v272_v1 = vcombine.high %v270_v0, %v270_v0  ;;  %v275_v2 = vsel %vm274_vm0, %v270_v0, 0.0  ;;  %3346 = vmatprep.subr.mxu0 %v3646_v5  ;;  %3348 = vmatprep.mubr.msk.f32.mxu0 %vm3647_vm1, %v3646_v5  ;;  %v282_v8 = vld [vmem:[%s5524_s1] sm:$0xf]  ;;  %v3648_v9 = vmov 0   ;;  %v374_v20 = vlaneseq }
  0x6e   : > { %3473 = vset.pattern.permute.xlu0 %v3648_v9  ;;  %v283_v10 = vld [vmem:[%s5525_s2] sm:$0xf]  ;;  %v3649_v18 = vmov 839922192   ;;  %s5535_s28 = smov 51   ;;  %s3652_s7 = smov 47  }
  0x6f   : > { %v276_v3 = vsel %vm274_vm0, %v272_v1, 0.0  ;;  %v372_v19 = vunpack.c.l.s4 %v3649_v18  ;;  %v3923_v22 = vshrl.u32 %v374_v20, 7  ;;  %s5534_s6 = smov 50   ;;  %s5536_s30 = smov 46  }
  0x70   : > { %v277_v4 = vadd.f32 %v276_v3, %v275_v2  ;;  %s5533_s15 = smov 49   ;;  %s5538_s16 = smov 45  }
  0x71   : > { %v373_v21 = vunpack.c.0.s8 %v372_v19  ;;  %5677 = vst [vmem:[#allocation12_spill] sm:$0xff] %v3923_v22  ;;  %s5540_s9 = smov 35   ;;  %s5542_s29 = smov 34  }
  0x72   : > { %278 = vadd.xlane.f32.xlu0 %v277_v4  ;;  %s5544_s17 = smov 33   ;;  %s5546_s24 = smov 32  }
  0x73   : > { %v376_v23 = vsub.s32 %v373_v21, %v3923_v22  ;;  %s5548_s26 = smov 31   ;;  %s5550_s8 = smov 30  }
  0x74   : > { %s5552_s10 = smov 29   ;;  %s5554_s13 = smov 19  }
  0x75   : > { %p5819_p0 = scmp.ne.s32.totalorder %s5672_s23, 0 }
  0xff   : > { %v279_v6 = vpop.xlane.xlu0 %278 }
 0x100   : > { %v281_v7 = vmul.f32 0.00390625, %v279_v6 }
 0x102   : > { %3347 = vmatpush3.msk.msra.mxu0 %vm274_vm0, %v281_v7 }
 0x103   : > { %3349 = vmatmul.mubr.msk.f32.vlgmr.msra.gmra.mrb[0].mxu0 %vm284_vm2, %v282_v8 }
 0x1d6   : > { %v357_v11 = vpop.f32.mrb[0].mxu0 }
 0x1d7   : > { %v358_v12 = vadd.f32 %v357_v11, %v283_v10  ;;  %v3350_v13 = vpop.f32.mrb[1].mxu0 }
 0x1d9   : > { %v3335_v14 = vmul.f32 -1.442695, %v358_v12 }
 0x1db   : > { %3475 = vpow2.f32 %v3335_v14 }
 0x1e5   : > { %v3476_v15 = vpop.eup %3475 }
 0x1e6   : > { %v364_v16 = vadd.f32 1.0, %v3476_v15 }
 0x1e8   : > { %3477 = vrcp.f32 %v364_v16 }
 0x1f2   : > { %v3478_v17 = vpop.eup %3477 }
 0x1f3   : > { %369 = vperm.xlu0 %3473, %v3478_v17  }
 0x272   : > { %v370_v24 = vpop.permute.xlu0 %369 }
 0x273   : > { %v377_v25 = vrot.slane %v370_v24, %v376_v23 }
 0x275   : > { %v3926_v26 = vmul.f32 %v377_v25, %v270_v0 }
 0x277   : > { %5678 = vst [vmem:[#allocation13_spill] sm:$0xff] %v3926_v26  ;;  %v3930_v27 = vcombine.high %v3926_v26, %v3926_v26  ;;  %v383_v28 = vsel %vm274_vm0, %v3926_v26, 0.0  ;;  %v400_v29 = vsel %vm274_vm0, %v3926_v26, -inf }
 0x278   : > { %v384_v30 = vrot.slane %v383_v28, 4  ;;  %v401_v31 = vrot.slane %v400_v29, 4 }
 0x279   : > { %v407_v34 = vsel %vm274_vm0, %v3930_v27, -inf  ;;  %v390_v24 = vsel %vm274_vm0, %v3930_v27, 0.0 }
 0x27a   : > { %v385_v32 = vadd.f32 %v384_v30, %v383_v28  ;;  %v402_v33 = vmax.f32 %v400_v29, %v401_v31  ;;  %v408_v38 = vrot.slane %v407_v34, 4  ;;  %v391_v25 = vrot.slane %v390_v24, 4 }
 0x27c   : > { %v403_v35 = vrot.slane %v402_v33, 2  ;;  %v386_v36 = vrot.slane %v385_v32, 2  ;;  %v409_v42 = vmax.f32 %v407_v34, %v408_v38  ;;  %v392_v30 = vadd.f32 %v391_v25, %v390_v24 }
 0x27e   : > { %v404_v37 = vmax.f32 %v402_v33, %v403_v35  ;;  %v387_v40 = vadd.f32 %v386_v36, %v385_v32  ;;  %v410_v44 = vrot.slane %v409_v42, 2  ;;  %v393_v32 = vrot.slane %v392_v30, 2 }
 0x280   : > { %v405_v39 = vrot.slane %v404_v37, 1  ;;  %v388_v43 = vrot.slane %v387_v40, 1  ;;  %v411_v46 = vmax.f32 %v409_v42, %v410_v44  ;;  %v394_v35 = vadd.f32 %v393_v32, %v392_v30 }
 0x282   : > { %v3938_v41 = vmax.f32 %v404_v37, %v405_v39  ;;  %v389_v45 = vadd.f32 %v388_v43, %v387_v40  ;;  %v412_v48 = vrot.slane %v411_v46, 1  ;;  %v395_v38 = vrot.slane %v394_v35, 1 }
 0x284   : > { %592 = vrot.lane.b32.xlu0 %v3938_v41, %s3650_s11  ;;  %423 = vrot.lane.b32.xlu1 %v3938_v41, %s5535_s28  ;;  %v3952_v47 = vmul.f32 0.25, %v389_v45  ;;  %v3958_v49 = vmax.f32 %v411_v46, %v412_v48  ;;  %v396_v42 = vadd.f32 %v395_v38, %v394_v35  ;;  %v4277_v35 = vand.u32 127, %v374_v20 }
 0x285   : > { %v3697_v38 = vmov 1966171168  }
 0x286   : > { %v4254_v45 = vmul.f32 0.25, %v396_v42  ;;  %v434_v42 = vunpack.c.l.s4 %v3697_v38  ;;  %vm420_vm3 = vcmp.lt.s32.totalorder %v4277_v35, 51  ;;  %vm475_vm4 = vcmp.lt.s32.totalorder %v4277_v35, 50 }
 0x287   : > { %vm532_vm5 = vcmp.lt.s32.totalorder %v4277_v35, 49  ;;  %vm589_vm6 = vcmp.lt.s32.totalorder %v4277_v35, 48  ;;  %vm646_vm7 = vcmp.lt.s32.totalorder %v4277_v35, 47  ;;  %vm703_vm8 = vcmp.lt.s32.totalorder %v4277_v35, 46 }
 0x288   : > { %649 = vrot.lane.b32.xlu0 %v3938_v41, %s3652_s7  ;;  %478 = vrot.lane.b32.xlu1 %v3938_v41, %s5534_s6  ;;  %v435_v20 = vunpack.c.0.s8 %v434_v42  ;;  %vm760_vm9 = vcmp.lt.s32.totalorder %v4277_v35, 45  ;;  %vm817_vm10 = vcmp.lt.s32.totalorder %v4277_v35, 35  ;;  %vm874_vm11 = vcmp.lt.s32.totalorder %v4277_v35, 34 }
 0x289   : > { %vm5659_vm12 = vcmp.lt.s32.totalorder %v4277_v35, 33  ;;  %vm5642_vm13 = vcmp.lt.s32.totalorder %v4277_v35, 32  ;;  %vm5640_vm14 = vcmp.lt.s32.totalorder %v4277_v35, 31  ;;  %vm5638_vm15 = vcmp.lt.s32.totalorder %v4277_v35, 30 }
 0x28a   : > { %vm5636_vm0 = vcmp.lt.s32.totalorder %v4277_v35, 29  ;;  %vm5637_vm1 = vcmp.lt.s32.totalorder %v4277_v35, 19  ;;  %vm5639_vm2 = vcmp.lt.s32.totalorder %v4277_v35, 18 }
 0x28c   : > { %706 = vrot.lane.b32.xlu0 %v3938_v41, %s5536_s30  ;;  %535 = vrot.lane.b32.xlu1 %v3938_v41, %s5533_s15 }
 0x290   : > { %763 = vrot.lane.b32.xlu0 %v3938_v41, %s5538_s16  ;;  %414 = vrot.lane.b32.xlu1 %v3952_v47, %s5535_s28 }
 0x294   : > { %820 = vrot.lane.b32.xlu0 %v3938_v41, %s5540_s9  ;;  %425 = vrot.lane.b32.xlu1 %v3958_v49, %s5535_s28  ;;  %s5560_s28 = smov 16  }
 0x298   : > { %877 = vrot.lane.b32.xlu0 %v3938_v41, %s5542_s29  ;;  %471 = vrot.lane.b32.xlu1 %v3952_v47, %s5534_s6 }
 0x29c   : > { %934 = vrot.lane.b32.xlu0 %v3938_v41, %s5544_s17  ;;  %480 = vrot.lane.b32.xlu1 %v3958_v49, %s5534_s6  ;;  %s5558_s6 = smov 17  }
 0x2a0   : > { %991 = vrot.lane.b32.xlu0 %v3938_v41, %s5546_s24  ;;  %528 = vrot.lane.b32.xlu1 %v3952_v47, %s5533_s15 }
 0x2a4   : > { %1048 = vrot.lane.b32.xlu0 %v3938_v41, %s5548_s26  ;;  %537 = vrot.lane.b32.xlu1 %v3958_v49, %s5533_s15  ;;  %s5556_s15 = smov 18  }
 0x2a8   : > { %1105 = vrot.lane.b32.xlu0 %v3938_v41, %s5550_s8  ;;  %594 = vrot.lane.b32.xlu1 %v3958_v49, %s3650_s11 }
 0x2ac   : > { %1162 = vrot.lane.b32.xlu0 %v3938_v41, %s5552_s10  ;;  %651 = vrot.lane.b32.xlu1 %v3958_v49, %s3652_s7 }
 0x2b0   : > { %1219 = vrot.lane.b32.xlu0 %v3938_v41, %s5554_s13  ;;  %708 = vrot.lane.b32.xlu1 %v3958_v49, %s5536_s30  ;;  %s5562_s30 = smov 15  }
 0x2b4   : > { %1276 = vrot.lane.b32.xlu0 %v3938_v41, %s5556_s15  ;;  %765 = vrot.lane.b32.xlu1 %v3958_v49, %s5538_s16  ;;  %s5564_s16 = smov 14  }
 0x2b8   : > { %1333 = vrot.lane.b32.xlu0 %v3938_v41, %s5558_s6  ;;  %822 = vrot.lane.b32.xlu1 %v3958_v49, %s5540_s9  ;;  %s3670_s9 = smov 13  }
 0x2bc   : > { %1390 = vrot.lane.b32.xlu0 %v3938_v41, %s5560_s28  ;;  %879 = vrot.lane.b32.xlu1 %v3958_v49, %s5542_s29  ;;  %s5566_s29 = smov 3  }
 0x2c0   : > { %1447 = vrot.lane.b32.xlu0 %v3938_v41, %s5562_s30  ;;  %936 = vrot.lane.b32.xlu1 %v3958_v49, %s5544_s17  ;;  %s5568_s17 = smov 2  }
 0x2c4   : > { %1504 = vrot.lane.b32.xlu0 %v3938_v41, %s5564_s16  ;;  %993 = vrot.lane.b32.xlu1 %v3958_v49, %s5546_s24  ;;  %s5570_s24 = smov 1  }
 0x2c8   : > { %1561 = vrot.lane.b32.xlu0 %v3938_v41, %s3670_s9  ;;  %1050 = vrot.lane.b32.xlu1 %v3958_v49, %s5548_s26  ;;  %s5572_s26 = smov 127  }
 0x2cc   : > { %1618 = vrot.lane.b32.xlu0 %v3938_v41, %s5566_s29  ;;  %1107 = vrot.lane.b32.xlu1 %v3958_v49, %s5550_s8  ;;  %s5574_s8 = smov 126  }
 0x2d0   : > { %1675 = vrot.lane.b32.xlu0 %v3938_v41, %s5568_s17  ;;  %1164 = vrot.lane.b32.xlu1 %v3958_v49, %s5552_s10  ;;  %s5576_s10 = smov 125  }
 0x2d4   : > { %1732 = vrot.lane.b32.xlu0 %v3938_v41, %s5570_s24  ;;  %1221 = vrot.lane.b32.xlu1 %v3958_v49, %s5554_s13  ;;  %s5578_s13 = smov 115  }
 0x2d8   : > { %1833 = vrot.lane.b32.xlu0 %v3938_v41, %s5572_s26  ;;  %1278 = vrot.lane.b32.xlu1 %v3958_v49, %s5556_s15  ;;  %s5580_s15 = smov 114  }
 0x2dc   : > { %1890 = vrot.lane.b32.xlu0 %v3938_v41, %s5574_s8  ;;  %1335 = vrot.lane.b32.xlu1 %v3958_v49, %s5558_s6  ;;  %s5582_s6 = smov 113  }
 0x2e0   : > { %1947 = vrot.lane.b32.xlu0 %v3938_v41, %s5576_s10  ;;  %1392 = vrot.lane.b32.xlu1 %v3958_v49, %s5560_s28  ;;  %s5584_s28 = smov 112  }
 0x2e4   : > { %2004 = vrot.lane.b32.xlu0 %v3938_v41, %s5578_s13  ;;  %1449 = vrot.lane.b32.xlu1 %v3958_v49, %s5562_s30  ;;  %s5586_s30 = smov 111  }
 0x2e8   : > { %2061 = vrot.lane.b32.xlu0 %v3938_v41, %s5580_s15  ;;  %1506 = vrot.lane.b32.xlu1 %v3958_v49, %s5564_s16  ;;  %s5588_s16 = smov 110  }
 0x2ec   : > { %2118 = vrot.lane.b32.xlu0 %v3938_v41, %s5582_s6  ;;  %1563 = vrot.lane.b32.xlu1 %v3958_v49, %s3670_s9 }
 0x2f0   : > { %2175 = vrot.lane.b32.xlu0 %v3938_v41, %s5584_s28  ;;  %1620 = vrot.lane.b32.xlu1 %v3958_v49, %s5566_s29  ;;  %s5590_s29 = smov 109  }
 0x2f4   : > { %2232 = vrot.lane.b32.xlu0 %v3938_v41, %s5586_s30  ;;  %1677 = vrot.lane.b32.xlu1 %v3958_v49, %s5568_s17  ;;  %s5592_s17 = smov 99  }
 0x2f6   : > { %v4060_v50 = vpop.permute.xlu0 %592  ;;  %v4062_v51 = vpop.permute.xlu1 %423 }
 0x2f8   : > { %2289 = vrot.lane.b32.xlu0 %v3938_v41, %s5588_s16  ;;  %1734 = vrot.lane.b32.xlu1 %v3958_v49, %s5570_s24  ;;  %s5616_s24 = smov 98  }
 0x2fa   : > { %v4068_v52 = vpop.permute.xlu0 %649  ;;  %v4070_v53 = vpop.permute.xlu1 %478 }
 0x2fc   : > { %2346 = vrot.lane.b32.xlu0 %v3938_v41, %s5590_s29  ;;  %1835 = vrot.lane.b32.xlu1 %v3958_v49, %s5572_s26  ;;  %s5612_s26 = smov 97  }
 0x2fe   : > { %v4076_v54 = vpop.permute.xlu0 %706  ;;  %v4078_v55 = vpop.permute.xlu1 %535 }
 0x300   : > { %2403 = vrot.lane.b32.xlu0 %v3938_v41, %s5592_s17  ;;  %1892 = vrot.lane.b32.xlu1 %v3958_v49, %s5574_s8  ;;  %s5594_s8 = smov 96  }
 0x302   : > { %v4084_v56 = vpop.permute.xlu0 %763  ;;  %v4086_v57 = vpop.permute.xlu1 %414 }
 0x303   : > { %5679 = vst [vmem:[#allocation14_spill] sm:$0xff] %v4086_v57 }
 0x304   : > { %2460 = vrot.lane.b32.xlu0 %v3938_v41, %s5616_s24  ;;  %1949 = vrot.lane.b32.xlu1 %v3958_v49, %s5576_s10  ;;  %s5596_s10 = smov 95  }
 0x306   : > { %v4092_v58 = vpop.permute.xlu0 %820  ;;  %v4094_v59 = vpop.permute.xlu1 %425 }
 0x307   : > { %v427_v38 = vsel %vm420_vm3, %v4062_v51, %v4094_v59 }
 0x308   : > { %2517 = vrot.lane.b32.xlu0 %v3938_v41, %s5612_s26  ;;  %2006 = vrot.lane.b32.xlu1 %v3958_v49, %s5578_s13  ;;  %s5598_s13 = smov 94  }
 0x30a   : > { %v4100_v60 = vpop.permute.xlu0 %877  ;;  %v4102_v61 = vpop.permute.xlu1 %471 }
 0x30b   : > { %5680 = vst [vmem:[#allocation15_spill] sm:$0xff] %v4102_v61  ;;  %v428_v61 = vsel %vm420_vm3, %v4094_v59, %v4062_v51 }
 0x30c   : > { %2574 = vrot.lane.b32.xlu0 %v3938_v41, %s5594_s8  ;;  %2063 = vrot.lane.b32.xlu1 %v3958_v49, %s5580_s15  ;;  %s5600_s15 = smov 93  }
 0x30e   : > { %v4108_v62 = vpop.permute.xlu0 %934  ;;  %v4110_v63 = vpop.permute.xlu1 %480 }
 0x30f   : > { %v482_v57 = vsel %vm475_vm4, %v4070_v53, %v4110_v63  ;;  %v483_v42 = vsel %vm475_vm4, %v4110_v63, %v4070_v53  ;;  %v452_v63 = vcombine.low %v428_v61, %v427_v38 }
 0x310   : > { %2631 = vrot.lane.b32.xlu0 %v3938_v41, %s5596_s10  ;;  %2120 = vrot.lane.b32.xlu1 %v3958_v49, %s5582_s6  ;;  %s5602_s6 = smov 83  }
 0x312   : > { %v4116_v0 = vpop.permute.xlu0 %991  ;;  %v4118_v1 = vpop.permute.xlu1 %528 }
 0x313   : > { %5681 = vst [vmem:[#allocation16_spill] sm:$0xff] %v4118_v1 }
 0x314   : > { %2688 = vrot.lane.b32.xlu0 %v3938_v41, %s5598_s13  ;;  %2177 = vrot.lane.b32.xlu1 %v3958_v49, %s5584_s28  ;;  %s5604_s28 = smov 82  }
 0x316   : > { %v4124_v2 = vpop.permute.xlu0 %1048  ;;  %v4126_v3 = vpop.permute.xlu1 %537 }
 0x317   : > { %v540_v51 = vsel %vm532_vm5, %v4126_v3, %v4078_v55 }
 0x318   : > { %2745 = vrot.lane.b32.xlu0 %v3938_v41, %s5600_s15  ;;  %2234 = vrot.lane.b32.xlu1 %v3958_v49, %s5586_s30  ;;  %s5606_s30 = smov 81  }
 0x31a   : > { %v4132_v4 = vpop.permute.xlu0 %1105  ;;  %v4134_v5 = vpop.permute.xlu1 %594 }
 0x31b   : > { %v596_v59 = vsel %vm589_vm6, %v4060_v50, %v4134_v5  ;;  %v597_v53 = vsel %vm589_vm6, %v4134_v5, %v4060_v50 }
 0x31c   : > { %2802 = vrot.lane.b32.xlu0 %v3938_v41, %s5602_s6  ;;  %2291 = vrot.lane.b32.xlu1 %v3958_v49, %s5588_s16  ;;  %s5608_s16 = smov 80  }
 0x31e   : > { %v4140_v6 = vpop.permute.xlu0 %1162  ;;  %v4142_v7 = vpop.permute.xlu1 %651 }
 0x31f   : > { %v653_v50 = vsel %vm646_vm7, %v4068_v52, %v4142_v7  ;;  %v654_v61 = vsel %vm646_vm7, %v4142_v7, %v4068_v52 }
 0x320   : > { %2859 = vrot.lane.b32.xlu0 %v3938_v41, %s5604_s28  ;;  %2348 = vrot.lane.b32.xlu1 %v3958_v49, %s5590_s29  ;;  %s5610_s29 = smov 79   ;;  %v680_v38 = vcombine.low %v654_v61, %v653_v50  ;;  %v563_v50 = vld [vmem:[#allocation7 + $0x2] ss:$8 sm:$0x3] }
 0x322   : > { %v4148_v8 = vpop.permute.xlu0 %1219  ;;  %v4150_v9 = vpop.permute.xlu1 %708 }
 0x324   : > { %2916 = vrot.lane.b32.xlu0 %v3938_v41, %s5606_s30  ;;  %2405 = vrot.lane.b32.xlu1 %v3958_v49, %s5592_s17  ;;  %s5614_s17 = smov 78  }
 0x326   : > { %v4156_v10 = vpop.permute.xlu0 %1276  ;;  %v4158_v11 = vpop.permute.xlu1 %765 }
 0x328   : > { %2973 = vrot.lane.b32.xlu0 %v3938_v41, %s5608_s16  ;;  %2462 = vrot.lane.b32.xlu1 %v3958_v49, %s5616_s24  ;;  %s5699_s24 = smov 19  }
 0x32a   : > { %v4164_v12 = vpop.permute.xlu0 %1333  ;;  %v4166_v13 = vpop.permute.xlu1 %822 }
 0x32c   : > { %3030 = vrot.lane.b32.xlu0 %v3938_v41, %s5610_s29  ;;  %2519 = vrot.lane.b32.xlu1 %v3958_v49, %s5612_s26  ;;  %s5696_s26 = smov 29  }
 0x32e   : > { %v4172_v14 = vpop.permute.xlu0 %1390  ;;  %v4174_v15 = vpop.permute.xlu1 %879 }
 0x330   : > { %3087 = vrot.lane.b32.xlu0 %v3938_v41, %s5614_s17  ;;  %2576 = vrot.lane.b32.xlu1 %v3958_v49, %s5594_s8  ;;  %s5682_s8 = smov 46  }
 0x332   : > { %v4180_v16 = vpop.permute.xlu0 %1447  ;;  %v4182_v17 = vpop.permute.xlu1 %936 }
 0x334   : > { %585 = vrot.lane.b32.xlu0 %v3952_v47, %s3650_s11  ;;  %2633 = vrot.lane.b32.xlu1 %v3958_v49, %s5596_s10  ;;  %s5683_s10 = smov 45  }
 0x336   : > { %v4188_v18 = vpop.permute.xlu0 %1504  ;;  %v4190_v19 = vpop.permute.xlu1 %993 }
 0x338   : > { %642 = vrot.lane.b32.xlu0 %v3952_v47, %s3652_s7  ;;  %2690 = vrot.lane.b32.xlu1 %v3958_v49, %s5598_s13  ;;  %s5684_s13 = smov 35  }
 0x33a   : > { %v4196_v21 = vpop.permute.xlu0 %1561  ;;  %v4198_v23 = vpop.permute.xlu1 %1050 }
 0x33c   : > { %699 = vrot.lane.b32.xlu0 %v3952_v47, %s5682_s8  ;;  %2747 = vrot.lane.b32.xlu1 %v3958_v49, %s5600_s15  ;;  %s5685_s15 = smov 34  }
 0x33e   : > { %v4206_v28 = vpop.permute.xlu0 %1618  ;;  %v4208_v29 = vpop.permute.xlu1 %1107 }
 0x340   : > { %756 = vrot.lane.b32.xlu0 %v3952_v47, %s5683_s10  ;;  %2804 = vrot.lane.b32.xlu1 %v3958_v49, %s5602_s6  ;;  %s5687_s6 = smov 33  }
 0x342   : > { %v4214_v31 = vpop.permute.xlu0 %1675  ;;  %v4216_v27 = vpop.permute.xlu1 %1164 }
 0x344   : > { %813 = vrot.lane.b32.xlu0 %v3952_v47, %s5684_s13  ;;  %2861 = vrot.lane.b32.xlu1 %v3958_v49, %s5604_s28  ;;  %s5689_s28 = smov 32  }
 0x346   : > { %v4222_v33 = vpop.permute.xlu0 %1732  ;;  %v4224_v34 = vpop.permute.xlu1 %1221 }
 0x348   : > { %870 = vrot.lane.b32.xlu0 %v3952_v47, %s5685_s15  ;;  %2918 = vrot.lane.b32.xlu1 %v3958_v49, %s5606_s30  ;;  %s5691_s30 = smov 31  }
 0x34a   : > { %v4230_v36 = vpop.permute.xlu0 %1833  ;;  %v4232_v37 = vpop.permute.xlu1 %1278 }
 0x34b   : > { %5686 = vst [vmem:[#allocation17_spill] sm:$0xff] %v4230_v36  ;;  %v677_v36 = vld [vmem:[#allocation7 + $0x4] ss:$8 sm:$0x3] }
 0x34c   : > { %927 = vrot.lane.b32.xlu0 %v3952_v47, %s5687_s6  ;;  %2975 = vrot.lane.b32.xlu1 %v3958_v49, %s5608_s16  ;;  %s5693_s16 = smov 30  }
 0x34e   : > { %v4238_v39 = vpop.permute.xlu0 %1890  ;;  %v4240_v40 = vpop.permute.xlu1 %1335 }
 0x34f   : > { %5688 = vst [vmem:[#allocation18_spill] sm:$0xff] %v4238_v39  ;;  %v4341_v39 = vsub.s32 %v435_v20, %v3923_v22 }
 0x350   : > { %984 = vrot.lane.b32.xlu0 %v3952_v47, %s5689_s28  ;;  %3032 = vrot.lane.b32.xlu1 %v3958_v49, %s5610_s29  ;;  %s5694_s29 = smov 51  }
 0x351   : > { %v687_v61 = vrot.slane %v680_v38, %v4341_v39  ;;  %v939_v38 = vsel %vm5659_vm12, %v4182_v17, %v4108_v62 }
 0x352   : > { %v4246_v43 = vpop.permute.xlu0 %1947  ;;  %v4248_v44 = vpop.permute.xlu1 %1392 }
 0x353   : > { %5690 = vst [vmem:[#allocation19_spill] sm:$0xff] %v4246_v43 }
 0x354   : > { %1041 = vrot.lane.b32.xlu0 %v3952_v47, %s5691_s30  ;;  %3089 = vrot.lane.b32.xlu1 %v3958_v49, %s5614_s17  ;;  %s5697_s17 = smov 50  }
 0x356   : > { %v4256_v46 = vpop.permute.xlu0 %2004  ;;  %v4258_v48 = vpop.permute.xlu1 %1449 }
 0x357   : > { %5692 = vst [vmem:[#allocation20_spill] sm:$0xff] %v4256_v46 }
 0x358   : > { %1098 = vrot.lane.b32.xlu0 %v3952_v47, %s5693_s16  ;;  %416 = vrot.lane.b32.xlu1 %v4254_v45, %s5694_s29  ;;  %s5700_s29 = smov 49  }
 0x35a   : > { %v4264_v24 = vpop.permute.xlu0 %2061  ;;  %v4266_v25 = vpop.permute.xlu1 %1506 }
 0x35b   : > { %5695 = vst [vmem:[#allocation21_spill] sm:$0xff] %v4264_v24  ;;  %v539_v24 = vsel %vm532_vm5, %v4078_v55, %v4126_v3  ;;  %v509_v55 = vcombine.low %v483_v42, %v482_v57  ;;  %v459_v57 = vrot.slane %v452_v63, %v4341_v39  ;;  %v710_v42 = vsel %vm703_vm8, %v4076_v54, %v4150_v9 }
 0x35c   : > { %1155 = vrot.lane.b32.xlu0 %v3952_v47, %s5696_s26  ;;  %473 = vrot.lane.b32.xlu1 %v4254_v45, %s5697_s17  ;;  %s5702_s17 = smov 18   ;;  %v566_v3 = vcombine.low %v540_v51, %v539_v24  ;;  %v711_v51 = vsel %vm703_vm8, %v4150_v9, %v4076_v54  ;;  %v825_v54 = vsel %vm817_vm10, %v4166_v13, %v4092_v58  ;;  %v449_v9 = vld [vmem:[#allocation7] ss:$8 sm:$0x3] }
 0x35d   : > { %v516_v5 = vrot.slane %v509_v55, %v4341_v39  ;;  %v737_v22 = vcombine.low %v711_v51, %v710_v42 }
 0x35e   : > { %v4272_v30 = vpop.permute.xlu0 %2118  ;;  %v4274_v32 = vpop.permute.xlu1 %1563  ;;  %v573_v24 = vrot.slane %v566_v3, %v4341_v39  ;;  %v506_v3 = vld [vmem:[#allocation7 + $0x1] ss:$8 sm:$0x3] }
 0x35f   : > { %5698 = vst [vmem:[#allocation22_spill] sm:$0xff] %v4272_v30  ;;  %v523_v63 = vrot.slane %v516_v5, %v4341_v39  ;;  %v881_v5 = vsel %vm874_vm11, %v4100_v60, %v4174_v15 }
 0x360   : > { %1212 = vrot.lane.b32.xlu0 %v3952_v47, %s5699_s24  ;;  %530 = vrot.lane.b32.xlu1 %v4254_v45, %s5700_s29  ;;  %v580_v55 = vrot.slane %v573_v24, %v4341_v39  ;;  %v882_v24 = vsel %vm874_vm11, %v4174_v15, %v4100_v60  ;;  %v694_v60 = vrot.slane %v687_v61, %v4341_v39  ;;  %v848_v61 = vld [vmem:[#allocation7 + $0x7] ss:$8 sm:$0x3]  ;;  %s5726_s29 = smov 113  }
 0x361   : > { %v525_v51 = vmul.f32 %v523_v63, %v506_v3  ;;  %v744_v15 = vrot.slane %v737_v22, %v4341_v39  ;;  %v995_v22 = vsel %vm5642_vm13, %v4116_v0, %v4190_v19 }
 0x362   : > { %v4283_v26 = vpop.permute.xlu0 %2175  ;;  %v4285_v1 = vpop.permute.xlu1 %1620  ;;  %v696_v63 = vmul.f32 %v694_v60, %v677_v36  ;;  %v1224_v60 = vsel %vm5637_vm1, %v4224_v34, %v4148_v8 }
 0x363   : > { %5701 = vst [vmem:[#allocation23_spill] sm:$0xff] %v4283_v26  ;;  %v751_v3 = vrot.slane %v744_v15, %v4341_v39 }
 0x364   : > { %1269 = vrot.lane.b32.xlu0 %v3952_v47, %s5702_s17  ;;  %587 = vrot.lane.b32.xlu1 %v4254_v45, %s3650_s11  ;;  %s5704_s11 = smov 17  }
 0x366   : > { %v4311_v26 = vpop.permute.xlu0 %2232  ;;  %v4313_v30 = vpop.permute.xlu1 %1677 }
 0x367   : > { %5703 = vst [vmem:[#allocation24_spill] sm:$0xff] %v4311_v26  ;;  %v623_v26 = vcombine.low %v597_v53, %v596_v59  ;;  %v768_v59 = vsel %vm760_vm9, %v4158_v11, %v4084_v56  ;;  %v824_v53 = vsel %vm817_vm10, %v4092_v58, %v4166_v13 }
 0x368   : > { %1326 = vrot.lane.b32.xlu0 %v3952_v47, %s5704_s11  ;;  %644 = vrot.lane.b32.xlu1 %v4254_v45, %s3652_s7  ;;  %s5706_s7 = smov 16  }
 0x369   : > { %v630_v52 = vrot.slane %v623_v26, %v4341_v39  ;;  %v767_v26 = vsel %vm760_vm9, %v4084_v56, %v4158_v11  ;;  %v466_v11 = vrot.slane %v459_v57, %v4341_v39  ;;  %v851_v56 = vcombine.low %v825_v54, %v824_v53  ;;  %v620_v57 = vld [vmem:[#allocation7 + $0x3] ss:$8 sm:$0x3] }
 0x36a   : > { %v4336_v46 = vpop.permute.xlu0 %2289  ;;  %v4338_v43 = vpop.permute.xlu1 %1734 }
 0x36b   : > { %5705 = vst [vmem:[#allocation25_spill] sm:$0xff] %v4336_v46  ;;  %v637_v46 = vrot.slane %v630_v52, %v4341_v39  ;;  %v938_v52 = vsel %vm5659_vm12, %v4108_v62, %v4182_v17  ;;  %v468_v42 = vmul.f32 %v466_v11, %v449_v9  ;;  %v908_v62 = vcombine.low %v882_v24, %v881_v5 }
 0x36c   : > { %1383 = vrot.lane.b32.xlu0 %v3952_v47, %s5706_s7  ;;  %701 = vrot.lane.b32.xlu1 %v4254_v45, %s5682_s8  ;;  %s5708_s8 = smov 15   ;;  %v965_v17 = vcombine.low %v939_v38, %v938_v52  ;;  %v1109_v9 = vsel %vm5638_vm15, %v4132_v4, %v4208_v29  ;;  %vm2685_vm12 = vcmp.lt.s32.totalorder %v4277_v35, 94 }
 0x36e   : > { %v4362_v7 = vpop.permute.xlu0 %2346  ;;  %v4364_v20 = vpop.permute.xlu1 %1835  ;;  %v972_v5 = vrot.slane %v965_v17, %v4341_v39 }
 0x36f   : > { %5707 = vst [vmem:[#allocation26_spill] sm:$0xff] %v4362_v7  ;;  %v794_v7 = vcombine.low %v768_v59, %v767_v26  ;;  %v582_v26 = vmul.f32 %v580_v55, %v563_v50  ;;  %v734_v55 = vld [vmem:[#allocation7 + $0x5] ss:$8 sm:$0x3] }
 0x370   : > { %1440 = vrot.lane.b32.xlu0 %v3952_v47, %s5708_s8  ;;  %758 = vrot.lane.b32.xlu1 %v4254_v45, %s5683_s10  ;;  %s5711_s10 = smov 14   ;;  %v791_v50 = vld [vmem:[#allocation7 + $0x6] ss:$8 sm:$0x3]  ;;  %v979_v17 = vrot.slane %v972_v5, %v4341_v39 }
 0x371   : > { %v801_v54 = vrot.slane %v794_v7, %v4341_v39  ;;  %v1052_v7 = vsel %vm5640_vm14, %v4124_v2, %v4198_v23  ;;  %v1019_v5 = vld [vmem:[#allocation7 + $0x12] ss:$8 sm:$0x3] }
 0x372   : > { %v4401_v58 = vpop.permute.xlu0 %2403  ;;  %v4403_v13 = vpop.permute.xlu1 %1892 }
 0x373   : > { %5709 = vst [vmem:[#allocation27_spill] sm:$0xff] %v4401_v58  ;;  %5710 = vst [vmem:[#allocation28_spill] sm:$0xff] %v4403_v13  ;;  %v858_v58 = vrot.slane %v851_v56, %v4341_v39  ;;  %v639_v13 = vmul.f32 %v637_v46, %v620_v57  ;;  %v996_v46 = vsel %vm5642_vm13, %v4190_v19, %v4116_v0  ;;  %vm5645_vm13 = vcmp.lt.s32.totalorder %v4277_v35, 2 }
 0x374   : > { %1497 = vrot.lane.b32.xlu0 %v3952_v47, %s5711_s10  ;;  %815 = vrot.lane.b32.xlu1 %v4254_v45, %s5684_s13  ;;  %v1053_v56 = vsel %vm5640_vm14, %v4198_v23, %v4124_v2  ;;  %v1110_v0 = vsel %vm5638_vm15, %v4208_v29, %v4132_v4  ;;  %v1166_v19 = vsel %vm5636_vm0, %v4140_v6, %v4216_v27  ;;  %s5712_s13 = smov 3   ;;  %vm5656_vm15 = vcmp.lt.s32.totalorder %v4277_v35, 15 }
 0x375   : > { %v1167_v2 = vsel %vm5636_vm0, %v4216_v27, %v4140_v6  ;;  %v808_v4 = vrot.slane %v801_v54, %v4341_v39  ;;  %v865_v29 = vrot.slane %v858_v58, %v4341_v39  ;;  %v915_v57 = vrot.slane %v908_v62, %v4341_v39 }
 0x376   : > { %v4431_v59 = vpop.permute.xlu0 %2460  ;;  %v4433_v53 = vpop.permute.xlu1 %1949  ;;  %v1022_v24 = vcombine.low %v996_v46, %v995_v22  ;;  %v584_v6 = vadd.f32 %v582_v26, %v468_v42  ;;  %v1079_v27 = vcombine.low %v1053_v56, %v1052_v7  ;;  %v1136_v36 = vcombine.low %v1110_v0, %v1109_v9 }
 0x377   : > { %v1193_v52 = vcombine.low %v1167_v2, %v1166_v19  ;;  %v641_v38 = vadd.f32 %v639_v13, %v525_v51  ;;  %v1223_v58 = vsel %vm5637_vm1, %v4148_v8, %v4224_v34  ;;  %vm5641_vm0 = vcmp.lt.s32.totalorder %v4277_v35, 17  ;;  %v905_v8 = vld [vmem:[#allocation7 + $0x10] ss:$8 sm:$0x3] }
 0x378   : > { %1554 = vrot.lane.b32.xlu0 %v3952_v47, %s3670_s9  ;;  %872 = vrot.lane.b32.xlu1 %v4254_v45, %s5685_s15  ;;  %v698_v42 = vadd.f32 %v696_v63, %v584_v6  ;;  %v753_v26 = vmul.f32 %v751_v3, %v734_v55  ;;  %v810_v62 = vmul.f32 %v808_v4, %v791_v50  ;;  %v962_v34 = vld [vmem:[#allocation7 + $0x11] ss:$8 sm:$0x3]  ;;  %vm5657_vm1 = vcmp.lt.s32.totalorder %v4277_v35, 16  ;;  %s5716_s15 = smov 126  }
 0x379   : > { %v867_v13 = vmul.f32 %v865_v29, %v848_v61  ;;  %v922_v51 = vrot.slane %v915_v57, %v4341_v39  ;;  %v1029_v22 = vrot.slane %v1022_v24, %v4341_v39  ;;  %v1086_v46 = vrot.slane %v1079_v27, %v4341_v39  ;;  %v1076_v24 = vld [vmem:[#allocation7 + $0x13] ss:$8 sm:$0x3] }
 0x37a   : > { %v4476_v23 = vpop.permute.xlu0 %2517  ;;  %v4478_v11 = vpop.permute.xlu1 %2006  ;;  %v1143_v7 = vrot.slane %v1136_v36, %v4341_v39  ;;  %v1200_v56 = vrot.slane %v1193_v52, %v4341_v39  ;;  %v1250_v9 = vcombine.low %v1224_v60, %v1223_v58  ;;  %v1280_v0 = vsel %vm5639_vm2, %v4156_v10, %v4232_v37  ;;  %v1133_v58 = vld [vmem:[#allocation7 + $0x14] ss:$8 sm:$0x3]  ;;  %v1190_v60 = vld [vmem:[#allocation7 + $0x15] ss:$8 sm:$0x3] }
 0x37b   : > { %v1281_v19 = vsel %vm5639_vm2, %v4232_v37, %v4156_v10  ;;  %v1337_v2 = vsel %vm5641_vm0, %v4164_v12, %v4240_v40  ;;  %v1338_v63 = vsel %vm5641_vm0, %v4240_v40, %v4164_v12  ;;  %v755_v50 = vadd.f32 %v753_v26, %v641_v38 }
 0x37c   : > { %1611 = vrot.lane.b32.xlu0 %v3952_v47, %s5712_s13  ;;  %929 = vrot.lane.b32.xlu1 %v4254_v45, %s5687_s6  ;;  %s5713_s6 = smov 2   ;;  %vm5643_vm2 = vcmp.lt.s32.totalorder %v4277_v35, 14  ;;  %v812_v10 = vadd.f32 %v810_v62, %v698_v42  ;;  %v924_v37 = vmul.f32 %v922_v51, %v905_v8  ;;  %v981_v4 = vmul.f32 %v979_v17, %v962_v34 }
 0x37d   : > { %vm5647_vm14 = vcmp.lt.s32.totalorder %v4277_v35, 13  ;;  %v1036_v12 = vrot.slane %v1029_v22, %v4341_v39  ;;  %v1093_v40 = vrot.slane %v1086_v46, %v4341_v39  ;;  %v1307_v29 = vcombine.low %v1281_v19, %v1280_v0 }
 0x37e   : > { %v4499_v15 = vpop.permute.xlu0 %2574  ;;  %v4501_v54 = vpop.permute.xlu1 %2063  ;;  %v1364_v61 = vcombine.low %v1338_v63, %v1337_v2  ;;  %v869_v57 = vadd.f32 %v867_v13, %v755_v50  ;;  %v1150_v6 = vrot.slane %v1143_v7, %v4341_v39  ;;  %v1207_v27 = vrot.slane %v1200_v56, %v4341_v39  ;;  %v1247_v63 = vld [vmem:[#allocation7 + $0x16] ss:$8 sm:$0x3] }
 0x37f   : > { %v1257_v36 = vrot.slane %v1250_v9, %v4341_v39  ;;  %v1394_v42 = vsel %vm5657_vm1, %v4172_v14, %v4248_v44  ;;  %v1395_v26 = vsel %vm5657_vm1, %v4248_v44, %v4172_v14  ;;  %v1451_v62 = vsel %vm5656_vm15, %v4180_v16, %v4258_v48 }
 0x380   : > { %1668 = vrot.lane.b32.xlu0 %v3952_v47, %s5713_s6  ;;  %986 = vrot.lane.b32.xlu1 %v4254_v45, %s5689_s28  ;;  %s5714_s28 = smov 1   ;;  %v1452_v13 = vsel %vm5656_vm15, %v4258_v48, %v4180_v16  ;;  %v926_v51 = vadd.f32 %v924_v37, %v812_v10  ;;  %v983_v17 = vadd.f32 %v981_v4, %v869_v57  ;;  %vm5644_vm0 = vcmp.lt.s32.totalorder %v4277_v35, 3  ;;  %v1304_v4 = vld [vmem:[#allocation7 + $0x17] ss:$8 sm:$0x3] }
 0x381   : > { %v1038_v14 = vmul.f32 %v1036_v12, %v1019_v5  ;;  %v1095_v44 = vmul.f32 %v1093_v40, %v1076_v24  ;;  %v1314_v22 = vrot.slane %v1307_v29, %v4341_v39  ;;  %v1371_v8 = vrot.slane %v1364_v61, %v4341_v39  ;;  %v1361_v12 = vld [vmem:[#allocation7 + $0x20] ss:$8 sm:$0x3] }
 0x382   : > { %v4529_v55 = vpop.permute.xlu0 %2631  ;;  %v4531_v3 = vpop.permute.xlu1 %2120  ;;  %v1152_v34 = vmul.f32 %v1150_v6, %v1133_v58  ;;  %v1209_v16 = vmul.f32 %v1207_v27, %v1190_v60  ;;  %v1421_v48 = vcombine.low %v1395_v26, %v1394_v42  ;;  %v1478_v46 = vcombine.low %v1452_v13, %v1451_v62 }
 0x383   : > { %v1264_v9 = vrot.slane %v1257_v36, %v4341_v39  ;;  %v1508_v0 = vsel %vm5643_vm2, %v4188_v18, %v4266_v25  ;;  %v1509_v19 = vsel %vm5643_vm2, %v4266_v25, %v4188_v18  ;;  %v1565_v2 = vsel %vm5647_vm14, %v4196_v21, %v4274_v32 }
 0x384   : > { %1725 = vrot.lane.b32.xlu0 %v3952_v47, %s5714_s28  ;;  %1043 = vrot.lane.b32.xlu1 %v4254_v45, %s5691_s30  ;;  %s5715_s30 = smov 127   ;;  %v1566_v50 = vsel %vm5647_vm14, %v4274_v32, %v4196_v21  ;;  %v1622_v10 = vsel %vm5644_vm0, %v4206_v28, %v4285_v1  ;;  %v1623_v18 = vsel %vm5644_vm0, %v4285_v1, %v4206_v28  ;;  %vm5646_vm2 = vcmp.lt.s32.totalorder %v4277_v35, 1 }
 0x385   : > { %v1321_v21 = vrot.slane %v1314_v22, %v4341_v39  ;;  %v1378_v25 = vrot.slane %v1371_v8, %v4341_v39  ;;  %v1679_v32 = vsel %vm5645_vm13, %v4214_v31, %v4313_v30  ;;  %v1680_v1 = vsel %vm5645_vm13, %v4313_v30, %v4214_v31  ;;  %v1418_v8 = vld [vmem:[#allocation7 + $0x21] ss:$8 sm:$0x3] }
 0x386   : > { %v4546_v52 = vpop.permute.xlu0 %2688  ;;  %v4548_v38 = vpop.permute.xlu1 %2177  ;;  %v1040_v28 = vadd.f32 %v1038_v14, %v926_v51  ;;  %v1097_v37 = vadd.f32 %v1095_v44, %v983_v17  ;;  %v1428_v40 = vrot.slane %v1421_v48, %v4341_v39  ;;  %v1485_v29 = vrot.slane %v1478_v46, %v4341_v39 }
 0x387   : > { %v1266_v5 = vmul.f32 %v1264_v9, %v1247_v63  ;;  %v1535_v24 = vcombine.low %v1509_v19, %v1508_v0  ;;  %v1592_v6 = vcombine.low %v1566_v50, %v1565_v2  ;;  %v1649_v27 = vcombine.low %v1623_v18, %v1622_v10  ;;  %v5719_v0 = vld [vmem:[#allocation17_spill] sm:$0xff]  ;;  %v5721_v18 = vld [vmem:[#allocation28_spill] sm:$0xff] }
 0x388   : > { %1826 = vrot.lane.b32.xlu0 %v3952_v47, %s5715_s30  ;;  %1100 = vrot.lane.b32.xlu1 %v4254_v45, %s5693_s16  ;;  %v1706_v36 = vcombine.low %v1680_v1, %v1679_v32  ;;  %vm5654_vm0 = vcmp.lt.s32.totalorder %v4277_v35, 127  ;;  %vm5649_vm13 = vcmp.lt.s32.totalorder %v4277_v35, 126  ;;  %v5717_v31 = vcombine.low %v3938_v41, %v3958_v49  ;;  %s5718_s16 = smov 125  }
 0x389   : > { %v1154_v58 = vadd.f32 %v1152_v34, %v1040_v28  ;;  %v1211_v60 = vadd.f32 %v1209_v16, %v1097_v37  ;;  %v1323_v42 = vmul.f32 %v1321_v21, %v1304_v4  ;;  %v1380_v26 = vmul.f32 %v1378_v25, %v1361_v12  ;;  %v1475_v34 = vld [vmem:[#allocation7 + $0x22] ss:$8 sm:$0x3]  ;;  %v5722_v21 = vld [vmem:[#allocation18_spill] sm:$0xff] }
 0x38a   : > { %v4574_v7 = vpop.permute.xlu0 %2745  ;;  %v4576_v56 = vpop.permute.xlu1 %2234  ;;  %v4630_v30 = vrot.slane %v5717_v31, %v4341_v39  ;;  %v1435_v62 = vrot.slane %v1428_v40, %v4341_v39  ;;  %v1492_v13 = vrot.slane %v1485_v29, %v4341_v39  ;;  %v1736_v51 = vsel %vm5646_vm2, %v4222_v33, %v4338_v43  ;;  %v1532_v40 = vld [vmem:[#allocation7 + $0x23] ss:$8 sm:$0x3] }
 0x38b   : > { %v1737_v17 = vsel %vm5646_vm2, %v4338_v43, %v4222_v33  ;;  %v1268_v22 = vadd.f32 %v1266_v5, %v1154_v58  ;;  %v1542_v16 = vrot.slane %v1535_v24, %v4341_v39  ;;  %v1599_v48 = vrot.slane %v1592_v6, %v4341_v39  ;;  %v5723_v5 = vld [vmem:[#allocation19_spill] sm:$0xff] }
 0x38c   : > { %1883 = vrot.lane.b32.xlu0 %v3952_v47, %s5716_s15  ;;  %1157 = vrot.lane.b32.xlu1 %v4254_v45, %s5696_s26  ;;  %v1656_v46 = vrot.slane %v1649_v27, %v4341_v39  ;;  %v1713_v9 = vrot.slane %v1706_v36, %v4341_v39  ;;  %v1837_v33 = vsel %vm5654_vm0, %v5719_v0, %v4364_v20  ;;  %vm5648_vm2 = vcmp.lt.s32.totalorder %v4277_v35, 125  ;;  %s5724_s26 = smov 114   ;;  %v1589_v27 = vld [vmem:[#allocation7 + $0x24] ss:$8 sm:$0x3] }
 0x38d   : > { %v1838_v43 = vsel %vm5654_vm0, %v4364_v20, %v5719_v0  ;;  %v1325_v19 = vadd.f32 %v1323_v42, %v1211_v60  ;;  %v1382_v2 = vadd.f32 %v1380_v26, %v1268_v22  ;;  %v1763_v63 = vcombine.low %v1737_v17, %v1736_v51  ;;  %v1646_v36 = vld [vmem:[#allocation7 + $0x25] ss:$8 sm:$0x3]  ;;  %v1703_v26 = vld [vmem:[#allocation7 + $0x26] ss:$8 sm:$0x3] }
 0x38e   : > { %v4620_v61 = vpop.permute.xlu0 %2802  ;;  %v4622_v57 = vpop.permute.xlu1 %2291  ;;  %vm5650_vm14 = vcmp.lt.s32.totalorder %v4277_v35, 115  ;;  %v1437_v50 = vmul.f32 %v1435_v62, %v1418_v8  ;;  %v1494_v10 = vmul.f32 %v1492_v13, %v1475_v34  ;;  %v1894_v20 = vsel %vm5649_vm13, %v5722_v21, %v5721_v18  ;;  %v5725_v60 = vld [vmem:[#allocation20_spill] sm:$0xff]  ;;  %v1804_v0 = vld [vmem:[#allocation7 + $0x30] ss:$8 sm:$0x3] }
 0x38f   : > { %v1895_v25 = vsel %vm5649_vm13, %v5721_v18, %v5722_v21  ;;  %v1549_v28 = vrot.slane %v1542_v16, %v4341_v39  ;;  %v1606_v37 = vrot.slane %v1599_v48, %v4341_v39  ;;  %v1663_v4 = vrot.slane %v1656_v46, %v4341_v39 }
 0x390   : > { %1940 = vrot.lane.b32.xlu0 %v3952_v47, %s5718_s16  ;;  %1214 = vrot.lane.b32.xlu1 %v4254_v45, %s5699_s24  ;;  %s5720_s24 = smov 115   ;;  %v1864_v12 = vcombine.low %v1837_v33, %v1838_v43  ;;  %v1720_v29 = vrot.slane %v1713_v9, %v4341_v39  ;;  %v1951_v24 = vsel %vm5648_vm2, %v5723_v5, %v4433_v53  ;;  %vm5651_vm13 = vcmp.lt.s32.totalorder %v4277_v35, 113  ;;  %v5727_v43 = vld [vmem:[#allocation21_spill] sm:$0xff] }
 0x391   : > { %v1952_v6 = vsel %vm5648_vm2, %v4433_v53, %v5723_v5  ;;  %v1770_v31 = vrot.slane %v1763_v63, %v4341_v39  ;;  %v1921_v58 = vcombine.low %v1894_v20, %v1895_v25  ;;  %v2008_v42 = vsel %vm5650_vm14, %v5725_v60, %v4478_v11  ;;  %v5728_v63 = vld [vmem:[#allocation22_spill] sm:$0xff]  ;;  %v1760_v20 = vld [vmem:[#allocation7 + $0x27] ss:$8 sm:$0x3] }
 0x392   : > { %v4646_v14 = vpop.permute.xlu0 %2859  ;;  %v4648_v44 = vpop.permute.xlu1 %2348  ;;  %v2009_v53 = vsel %vm5650_vm14, %v4478_v11, %v5725_v60  ;;  %v1821_v62 = vrot.slane %v4630_v30, %v4341_v39  ;;  %vm5652_vm2 = vcmp.lt.s32.totalorder %v4277_v35, 114  ;;  %v1439_v17 = vadd.f32 %v1437_v50, %v1325_v19 }
 0x393   : > { %v1496_v22 = vadd.f32 %v1494_v10, %v1382_v2  ;;  %v1871_v8 = vrot.slane %v1864_v12, %v4341_v39  ;;  %v1978_v34 = vcombine.low %v1951_v24, %v1952_v6  ;;  %v1551_v16 = vmul.f32 %v1549_v28, %v1532_v40  ;;  %v1861_v12 = vld [vmem:[#allocation7 + $0x31] ss:$8 sm:$0x3] }
 0x394   : > { %1997 = vrot.lane.b32.xlu0 %v3952_v47, %s5720_s24  ;;  %1271 = vrot.lane.b32.xlu1 %v4254_v45, %s5702_s17  ;;  %v1608_v48 = vmul.f32 %v1606_v37, %v1589_v27  ;;  %v2035_v11 = vcombine.low %v2008_v42, %v2009_v53  ;;  %vm5653_vm14 = vcmp.lt.s32.totalorder %v4277_v35, 112  ;;  %v1665_v30 = vmul.f32 %v1663_v4, %v1646_v36  ;;  %s5730_s17 = smov 112  }
 0x395   : > { %v1722_v46 = vmul.f32 %v1720_v29, %v1703_v26  ;;  %v1777_v9 = vrot.slane %v1770_v31, %v4341_v39  ;;  %v1928_v33 = vrot.slane %v1921_v58, %v4341_v39  ;;  %v2065_v19 = vsel %vm5652_vm2, %v5727_v43, %v4501_v54  ;;  %v1918_v26 = vld [vmem:[#allocation7 + $0x32] ss:$8 sm:$0x3] }
 0x396   : > { %v4676_v32 = vpop.permute.xlu0 %2916  ;;  %v4678_v1 = vpop.permute.xlu1 %2405  ;;  %v2066_v2 = vsel %vm5652_vm2, %v4501_v54, %v5727_v43  ;;  %v2122_v50 = vsel %vm5651_vm13, %v5728_v63, %v4531_v3  ;;  %v2123_v10 = vsel %vm5651_vm13, %v4531_v3, %v5728_v63  ;;  %v1878_v25 = vrot.slane %v1871_v8, %v4341_v39  ;;  %v5729_v54 = vld [vmem:[#allocation23_spill] sm:$0xff]  ;;  %v5731_v8 = vld [vmem:[#allocation24_spill] sm:$0xff] }
 0x397   : > { %v1985_v28 = vrot.slane %v1978_v34, %v4341_v39  ;;  %v2179_v37 = vsel %vm5653_vm14, %v5729_v54, %v4548_v38  ;;  %v2180_v4 = vsel %vm5653_vm14, %v4548_v38, %v5729_v54  ;;  %v1553_v3 = vadd.f32 %v1551_v16, %v1439_v17  ;;  %v1975_v17 = vld [vmem:[#allocation7 + $0x33] ss:$8 sm:$0x3] }
 0x398   : > { %2054 = vrot.lane.b32.xlu0 %v3952_v47, %s5724_s26  ;;  %1328 = vrot.lane.b32.xlu1 %v4254_v45, %s5704_s11  ;;  %v1823_v40 = vmul.f32 %v1821_v62, %v1804_v0  ;;  %v2042_v29 = vrot.slane %v2035_v11, %v4341_v39  ;;  %vm5655_vm13 = vcmp.lt.s32.totalorder %v4277_v35, 111  ;;  %v1610_v5 = vadd.f32 %v1608_v48, %v1496_v22  ;;  %s5732_s11 = smov 111   ;;  %v2032_v0 = vld [vmem:[#allocation7 + $0x34] ss:$8 sm:$0x3] }
 0x399   : > { %v2092_v24 = vcombine.low %v2065_v19, %v2066_v2  ;;  %v2149_v6 = vcombine.low %v2122_v50, %v2123_v10  ;;  %vm5658_vm2 = vcmp.lt.s32.totalorder %v4277_v35, 110  ;;  %v1667_v27 = vadd.f32 %v1665_v30, %v1553_v3  ;;  %v5733_v30 = vld [vmem:[#allocation25_spill] sm:$0xff]  ;;  %v2146_v3 = vld [vmem:[#allocation7 + $0x36] ss:$8 sm:$0x3] }
 0x39a   : > { %v4709_v13 = vpop.permute.xlu0 %2973  ;;  %v4711_v51 = vpop.permute.xlu1 %2462  ;;  %v1935_v38 = vrot.slane %v1928_v33, %v4341_v39  ;;  %v2206_v36 = vcombine.low %v2179_v37, %v2180_v4  ;;  %vm2343_vm14 = vcmp.lt.s32.totalorder %v4277_v35, 109  ;;  %v1724_v60 = vadd.f32 %v1722_v46, %v1610_v5  ;;  %v2089_v4 = vld [vmem:[#allocation7 + $0x35] ss:$8 sm:$0x3] }
 0x39b   : > { %v1779_v42 = vmul.f32 %v1777_v9, %v1760_v20  ;;  %v1880_v53 = vmul.f32 %v1878_v25, %v1861_v12  ;;  %v1992_v62 = vrot.slane %v1985_v28, %v4341_v39  ;;  %v2049_v22 = vrot.slane %v2042_v29, %v4341_v39 }
 0x39c   : > { %2111 = vrot.lane.b32.xlu0 %v3952_v47, %s5726_s29  ;;  %1385 = vrot.lane.b32.xlu1 %v4254_v45, %s5706_s7  ;;  %v2236_v34 = vsel %vm5655_vm13, %v5731_v8, %v4576_v56  ;;  %v2237_v16 = vsel %vm5655_vm13, %v4576_v56, %v5731_v8  ;;  %vm5660_vm0 = vcmp.lt.s32.totalorder %v4277_v35, 99  ;;  %v2099_v48 = vrot.slane %v2092_v24, %v4341_v39  ;;  %s5734_s7 = smov 110  }
 0x39d   : > { %v2156_v11 = vrot.slane %v2149_v6, %v4341_v39  ;;  %v2293_v46 = vsel %vm5658_vm2, %v5733_v30, %v4622_v57  ;;  %v2294_v56 = vsel %vm5658_vm2, %v4622_v57, %v5733_v30  ;;  %v1937_v9 = vmul.f32 %v1935_v38, %v1918_v26  ;;  %v2203_v38 = vld [vmem:[#allocation7 + $0x37] ss:$8 sm:$0x3] }
 0x39e   : > { %v4737_v18 = vpop.permute.xlu0 %3030  ;;  %v4739_v21 = vpop.permute.xlu1 %2519  ;;  %v2213_v33 = vrot.slane %v2206_v36, %v4341_v39  ;;  %vm2457_vm13 = vcmp.lt.s32.totalorder %v4277_v35, 98  ;;  %vm2514_vm15 = vcmp.lt.s32.totalorder %v4277_v35, 97  ;;  %v1781_v2 = vadd.f32 %v1779_v42, %v1667_v27 }
 0x39f   : > { %v1994_v63 = vmul.f32 %v1992_v62, %v1975_v17  ;;  %v2263_v50 = vcombine.low %v2236_v34, %v2237_v16  ;;  %vm2571_vm1 = vcmp.lt.s32.totalorder %v4277_v35, 96  ;;  %v1825_v10 = vadd.f32 %v1823_v40, %v1724_v60  ;;  %v5735_v40 = vld [vmem:[#allocation26_spill] sm:$0xff]  ;;  %v5736_v60 = vld [vmem:[#allocation27_spill] sm:$0xff] }
 0x3a0   : > { %2168 = vrot.lane.b32.xlu0 %v3952_v47, %s5730_s17  ;;  %1442 = vrot.lane.b32.xlu1 %v4254_v45, %s5708_s8  ;;  %v2320_v20 = vcombine.low %v2293_v46, %v2294_v56  ;;  %vm5661_vm2 = vcmp.lt.s32.totalorder %v4277_v35, 95  ;;  %v1882_v57 = vadd.f32 %v1880_v53, %v1781_v2  ;;  %v2051_v25 = vmul.f32 %v2049_v22, %v2032_v0  ;;  %s5738_s8 = smov 99  }
 0x3a1   : > { %v2106_v28 = vrot.slane %v2099_v48, %v4341_v39  ;;  %v2163_v54 = vrot.slane %v2156_v11, %v4341_v39  ;;  %v1939_v37 = vadd.f32 %v1937_v9, %v1825_v10  ;;  %v2220_v12 = vrot.slane %v2213_v33, %v4341_v39 }
 0x3a2   : > { %v4760_v31 = vpop.permute.xlu0 %3087  ;;  %v4762_v58 = vpop.permute.xlu1 %2576  ;;  %v2350_v29 = vsel %vm2343_vm14, %v5735_v40, %v4648_v44  ;;  %v2351_v5 = vsel %vm2343_vm14, %v4648_v44, %v5735_v40  ;;  %v1996_v27 = vadd.f32 %v1994_v63, %v1882_v57  ;;  %v2270_v36 = vrot.slane %v2263_v50, %v4341_v39 }
 0x3a3   : > { %v2407_v42 = vsel %vm5660_vm0, %v5736_v60, %v4678_v1  ;;  %v2408_v53 = vsel %vm5660_vm0, %v4678_v1, %v5736_v60  ;;  %v2327_v26 = vrot.slane %v2320_v20, %v4341_v39  ;;  %v2521_v44 = vsel %vm2514_vm15, %v4476_v23, %v4739_v21 }
 0x3a4   : > { %2225 = vrot.lane.b32.xlu0 %v3952_v47, %s5732_s11  ;;  %1499 = vrot.lane.b32.xlu1 %v4254_v45, %s5711_s10  ;;  %v2522_v62 = vsel %vm2514_vm15, %v4739_v21, %v4476_v23  ;;  %vm5662_vm0 = vcmp.lt.s32.totalorder %v4277_v35, 93  ;;  %v2053_v1 = vadd.f32 %v2051_v25, %v1939_v37  ;;  %v2108_v17 = vmul.f32 %v2106_v28, %v2089_v4  ;;  %s5739_s10 = smov 98  }
 0x3a5   : > { %v2165_v22 = vmul.f32 %v2163_v54, %v2146_v3  ;;  %v2377_v8 = vcombine.low %v2350_v29, %v2351_v5  ;;  %v2222_v34 = vmul.f32 %v2220_v12, %v2203_v38  ;;  %v2434_v16 = vcombine.low %v2407_v42, %v2408_v53  ;;  %v2317_v54 = vld [vmem:[#allocation7 + $0x41] ss:$8 sm:$0x3]  ;;  %v2374_v38 = vld [vmem:[#allocation7 + $0x42] ss:$8 sm:$0x3] }
 0x3a6   : > { %v4792_v43 = vpop.permute.xlu0 %585  ;;  %v2634_v19 = vpop.permute.xlu1 %2633  ;;  %v2464_v48 = vsel %vm2457_vm13, %v4431_v59, %v4711_v51  ;;  %v2465_v23 = vsel %vm2457_vm13, %v4711_v51, %v4431_v59  ;;  %v2277_v30 = vrot.slane %v2270_v36, %v4341_v39  ;;  %v2548_v46 = vcombine.low %v2521_v44, %v2522_v62  ;;  %v2431_v53 = vld [vmem:[#allocation7 + $0x43] ss:$8 sm:$0x3] }
 0x3a7   : > { %v2635_v56 = vsel %vm5661_vm2, %v4529_v55, %v2634_v19  ;;  %v2636_v9 = vsel %vm5661_vm2, %v2634_v19, %v4529_v55  ;;  %v2334_v0 = vrot.slane %v2327_v26, %v4341_v39  ;;  %v2578_v59 = vsel %vm2571_vm1, %v4499_v15, %v4762_v58 }
 0x3a8   : > { %2282 = vrot.lane.b32.xlu0 %v3952_v47, %s5734_s7  ;;  %1556 = vrot.lane.b32.xlu1 %v4254_v45, %s3670_s9  ;;  %s5737_s9 = smov 109   ;;  %v2579_v51 = vsel %vm2571_vm1, %v4762_v58, %v4499_v15  ;;  %vm5663_vm2 = vcmp.lt.s32.totalorder %v4277_v35, 83  ;;  %v2384_v55 = vrot.slane %v2377_v8, %v4341_v39  ;;  %v2491_v33 = vcombine.low %v2464_v48, %v2465_v23  ;;  %v2260_v15 = vld [vmem:[#allocation7 + $0x40] ss:$8 sm:$0x3] }
 0x3a9   : > { %v2441_v58 = vrot.slane %v2434_v16, %v4341_v39  ;;  %v2662_v63 = vcombine.low %v2635_v56, %v2636_v9  ;;  %v2110_v25 = vadd.f32 %v2108_v17, %v1996_v27  ;;  %v2167_v28 = vadd.f32 %v2165_v22, %v2053_v1  ;;  %v2545_v23 = vld [vmem:[#allocation7 + $0x45] ss:$8 sm:$0x3] }
 0x3aa   : > { %v4812_v24 = vpop.permute.xlu0 %642  ;;  %v2691_v6 = vpop.permute.xlu1 %2690  ;;  %v2605_v37 = vcombine.low %v2578_v59, %v2579_v51  ;;  %v2391_v40 = vrot.slane %v2384_v55, %v4341_v39  ;;  %v2498_v29 = vrot.slane %v2491_v33, %v4341_v39  ;;  %v2336_v27 = vmul.f32 %v2334_v0, %v2317_v54  ;;  %v2659_v55 = vld [vmem:[#allocation7 + $0x47] ss:$8 sm:$0x3] }
 0x3ab   : > { %v2692_v50 = vsel %vm2685_vm12, %v4546_v52, %v2691_v6  ;;  %v2693_v10 = vsel %vm2685_vm12, %v2691_v6, %v4546_v52  ;;  %v2279_v52 = vmul.f32 %v2277_v30, %v2260_v15  ;;  %v2224_v6 = vadd.f32 %v2222_v34, %v2110_v25 }
 0x3ac   : > { %2339 = vrot.lane.b32.xlu0 %v3952_v47, %s5737_s9  ;;  %1613 = vrot.lane.b32.xlu1 %v4254_v45, %s5712_s13  ;;  %v2719_v5 = vcombine.low %v2692_v50, %v2693_v10  ;;  %v2448_v36 = vrot.slane %v2441_v58, %v4341_v39  ;;  %v2612_v26 = vrot.slane %v2605_v37, %v4341_v39  ;;  %s5740_s13 = smov 97   ;;  %v2602_v58 = vld [vmem:[#allocation7 + $0x46] ss:$8 sm:$0x3] }
 0x3ad   : > { %v2281_v34 = vadd.f32 %v2279_v52, %v2167_v28  ;;  %v2393_v16 = vmul.f32 %v2391_v40, %v2374_v38  ;;  %v2505_v48 = vrot.slane %v2498_v29, %v4341_v39  ;;  %v2773_v28 = vld [vmem:[#allocation7 + $0x51] ss:$8 sm:$0x3]  ;;  %v2887_v29 = vld [vmem:[#allocation7 + $0x53] ss:$8 sm:$0x3] }
 0x3ae   : > { %v4845_v21 = vpop.permute.xlu0 %699  ;;  %v2748_v11 = vpop.permute.xlu1 %2747  ;;  %v2450_v30 = vmul.f32 %v2448_v36, %v2431_v53  ;;  %v2619_v51 = vrot.slane %v2612_v26, %v4341_v39  ;;  %v2830_v36 = vld [vmem:[#allocation7 + $0x52] ss:$8 sm:$0x3] }
 0x3af   : > { %v2749_v19 = vsel %vm5662_vm0, %v4574_v7, %v2748_v11  ;;  %v2750_v2 = vsel %vm5662_vm0, %v2748_v11, %v4574_v7  ;;  %v2555_v7 = vrot.slane %v2548_v46, %v4341_v39  ;;  %vm5664_vm0 = vcmp.lt.s32.totalorder %v4277_v35, 82  ;;  %v2488_v46 = vld [vmem:[#allocation7 + $0x44] ss:$8 sm:$0x3] }
 0x3b0   : > { %2396 = vrot.lane.b32.xlu0 %v3952_v47, %s5738_s8  ;;  %1670 = vrot.lane.b32.xlu1 %v4254_v45, %s5713_s6  ;;  %v2776_v4 = vcombine.low %v2749_v19, %v2750_v2  ;;  %v2338_v11 = vadd.f32 %v2336_v27, %v2224_v6  ;;  %s5741_s6 = smov 96   ;;  %v2395_v10 = vadd.f32 %v2393_v16, %v2281_v34  ;;  %v2944_v34 = vld [vmem:[#allocation7 + $0x54] ss:$8 sm:$0x3] }
 0x3b1   : > { %v2562_v17 = vrot.slane %v2555_v7, %v4341_v39  ;;  %v2716_v7 = vld [vmem:[#allocation7 + $0x50] ss:$8 sm:$0x3]  ;;  %v2621_v52 = vmul.f32 %v2619_v51, %v2602_v58  ;;  %v3001_v16 = vld [vmem:[#allocation7 + $0x55] ss:$8 sm:$0x3] }
 0x3b2   : > { %v4882_v20 = vpop.permute.xlu0 %756  ;;  %v2805_v57 = vpop.permute.xlu1 %2804  ;;  %v2783_v22 = vrot.slane %v2776_v4, %v4341_v39  ;;  %v2452_v54 = vadd.f32 %v2450_v30, %v2338_v11 }
 0x3b3   : > { %v2806_v3 = vsel %vm5663_vm2, %v4620_v61, %v2805_v57  ;;  %v2807_v12 = vsel %vm5663_vm2, %v2805_v57, %v4620_v61  ;;  %v2669_v61 = vrot.slane %v2662_v63, %v4341_v39  ;;  %vm5665_vm2 = vcmp.lt.s32.totalorder %v4277_v35, 81 }
 0x3b4   : > { %2453 = vrot.lane.b32.xlu0 %v3952_v47, %s5739_s10  ;;  %1727 = vrot.lane.b32.xlu1 %v4254_v45, %s5714_s28  ;;  %v2833_v44 = vcombine.low %v2806_v3, %v2807_v12  ;;  %v2564_v15 = vmul.f32 %v2562_v17, %v2545_v23  ;;  %v2790_v63 = vrot.slane %v2783_v22, %v4341_v39  ;;  %s5742_s28 = smov 95  }
 0x3b5   : > { %v2676_v56 = vrot.slane %v2669_v61, %v4341_v39  ;;  %v2507_v57 = vmul.f32 %v2505_v48, %v2488_v46 }
 0x3b6   : > { %v4900_v60 = vpop.permute.xlu0 %813  ;;  %v2862_v42 = vpop.permute.xlu1 %2861  ;;  %v2840_v33 = vrot.slane %v2833_v44, %v4341_v39  ;;  %v2566_v27 = vadd.f32 %v2564_v15, %v2452_v54  ;;  %v2792_v38 = vmul.f32 %v2790_v63, %v2773_v28 }
 0x3b7   : > { %v2863_v62 = vsel %vm5664_vm0, %v4646_v14, %v2862_v42  ;;  %v2864_v1 = vsel %vm5664_vm0, %v2862_v42, %v4646_v14  ;;  %v2726_v14 = vrot.slane %v2719_v5, %v4341_v39  ;;  %vm5666_vm0 = vcmp.lt.s32.totalorder %v4277_v35, 80 }
 0x3b8   : > { %v2890_v8 = vcombine.low %v2863_v62, %v2864_v1  ;;  %2510 = vrot.lane.b32.xlu0 %v3952_v47, %s5740_s13  ;;  %1828 = vrot.lane.b32.xlu1 %v4254_v45, %s5715_s30  ;;  %v2847_v40 = vrot.slane %v2840_v33, %v4341_v39  ;;  %v2509_v42 = vadd.f32 %v2507_v57, %v2395_v10  ;;  %s5743_s30 = smov 94  }
 0x3b9   : > { %v2733_v25 = vrot.slane %v2726_v14, %v4341_v39 }
 0x3ba   : > { %v2897_v9 = vrot.slane %v2890_v8, %v4341_v39  ;;  %v4920_v0 = vpop.permute.xlu0 %870  ;;  %v2919_v59 = vpop.permute.xlu1 %2918  ;;  %v2623_v22 = vadd.f32 %v2621_v52, %v2509_v42  ;;  %v2849_v8 = vmul.f32 %v2847_v40, %v2830_v36 }
 0x3bb   : > { %v2920_v19 = vsel %vm5665_vm2, %v4676_v32, %v2919_v59  ;;  %v2921_v2 = vsel %vm5665_vm2, %v2919_v59, %v4676_v32  ;;  %v2678_v32 = vmul.f32 %v2676_v56, %v2659_v55  ;;  %vm3027_vm2 = vcmp.lt.s32.totalorder %v4277_v35, 79 }
 0x3bc   : > { %v2947_v50 = vcombine.low %v2920_v19, %v2921_v2  ;;  %2567 = vrot.lane.b32.xlu0 %v3952_v47, %s5741_s6  ;;  %1885 = vrot.lane.b32.xlu1 %v4254_v45, %s5716_s15  ;;  %v2904_v37 = vrot.slane %v2897_v9, %v4341_v39  ;;  %v2735_v53 = vmul.f32 %v2733_v25, %v2716_v7  ;;  %v3058_v19 = vld [vmem:[#allocation7 + $0x56] ss:$8 sm:$0x3]  ;;  %s5744_s15 = smov 93  }
 0x3bd   : > { %v2680_v26 = vadd.f32 %v2678_v32, %v2566_v27  ;;  %v3115_v32 = vld [vmem:[#allocation7 + $0x57] ss:$8 sm:$0x3] }
 0x3be   : > { %v2954_v4 = vrot.slane %v2947_v50, %v4341_v39  ;;  %v4939_v3 = vpop.permute.xlu0 %927  ;;  %v2976_v12 = vpop.permute.xlu1 %2975  ;;  %v2906_v44 = vmul.f32 %v2904_v37, %v2887_v29  ;;  %v2737_v46 = vadd.f32 %v2735_v53, %v2623_v22  ;;  %v5745_v7 = vld [vmem:[#allocation14_spill] sm:$0xff] }
 0x3bf   : > { %v2977_v5 = vsel %vm5666_vm0, %v4709_v13, %v2976_v12  ;;  %v2978_v6 = vsel %vm5666_vm0, %v2976_v12, %v4709_v13  ;;  %v2794_v14 = vadd.f32 %v2792_v38, %v2680_v26  ;;  %vm3084_vm0 = vcmp.lt.s32.totalorder %v4277_v35, 78 }
 0x3c0   : > { %v3004_v61 = vcombine.low %v2977_v5, %v2978_v6  ;;  %2624 = vrot.lane.b32.xlu0 %v3952_v47, %s5742_s28  ;;  %1942 = vrot.lane.b32.xlu1 %v4254_v45, %s5718_s16  ;;  %v2961_v62 = vrot.slane %v2954_v4, %v4341_v39  ;;  %v2851_v33 = vadd.f32 %v2849_v8, %v2737_v46  ;;  %s5746_s16 = smov 83   ;;  %v5747_v6 = vld [vmem:[#allocation15_spill] sm:$0xff] }
 0x3c1   : > { %v2908_v56 = vadd.f32 %v2906_v44, %v2794_v14  ;;  %v5749_v44 = vld [vmem:[#allocation16_spill] sm:$0xff]  ;;  %v542_v14 = vld [vmem:[#allocation5 + $0x2] ss:$8 sm:$0x3] }
 0x3c2   : > { %v3011_v13 = vrot.slane %v3004_v61, %v4341_v39  ;;  %v4955_v1 = vpop.permute.xlu0 %984  ;;  %v3033_v17 = vpop.permute.xlu1 %3032  ;;  %v2963_v9 = vmul.f32 %v2961_v62, %v2944_v34 }
 0x3c3   : > { %v3034_v48 = vsel %vm3027_vm2, %v4737_v18, %v3033_v17  ;;  %v3035_v23 = vsel %vm3027_vm2, %v3033_v17, %v4737_v18 }
 0x3c4   : > { %v3018_v11 = vrot.slane %v3011_v13, %v4341_v39  ;;  %v3061_v30 = vcombine.low %v3034_v48, %v3035_v23  ;;  %2681 = vrot.lane.b32.xlu0 %v3952_v47, %s5743_s30  ;;  %1999 = vrot.lane.b32.xlu1 %v4254_v45, %s5720_s24  ;;  %v2965_v10 = vadd.f32 %v2963_v9, %v2851_v33  ;;  %s5748_s24 = smov 82   ;;  %v429_v23 = vld [vmem:[#allocation5] ss:$8 sm:$0x3] }
 0x3c6   : > { %v3020_v59 = vmul.f32 %v3018_v11, %v3001_v16  ;;  %v3068_v51 = vrot.slane %v3061_v30, %v4341_v39  ;;  %v4970_v55 = vpop.permute.xlu0 %1041  ;;  %v3090_v18 = vpop.permute.xlu1 %3089 }
 0x3c7   : > { %v3091_v2 = vsel %vm3084_vm0, %v4760_v31, %v3090_v18  ;;  %v3092_v15 = vsel %vm3084_vm0, %v3090_v18, %v4760_v31 }
 0x3c8   : > { %v3022_v58 = vadd.f32 %v3020_v59, %v2908_v56  ;;  %v3075_v63 = vrot.slane %v3068_v51, %v4341_v39  ;;  %v3118_v50 = vcombine.low %v3091_v2, %v3092_v15  ;;  %2738 = vrot.lane.b32.xlu0 %v3952_v47, %s5744_s15  ;;  %2056 = vrot.lane.b32.xlu1 %v4254_v45, %s5724_s26  ;;  %s5750_s26 = smov 81   ;;  %v485_v2 = vld [vmem:[#allocation5 + $0x1] ss:$8 sm:$0x3] }
 0x3ca   : > { %v3077_v57 = vmul.f32 %v3075_v63, %v3058_v19  ;;  %v3125_v25 = vrot.slane %v3118_v50, %v4341_v39  ;;  %v4984_v28 = vpop.permute.xlu0 %1098  ;;  %v417_v54 = vpop.permute.xlu1 %416 }
 0x3cb   : > { %v421_v31 = vsel %vm420_vm3, %v5745_v7, %v417_v54  ;;  %v422_v37 = vsel %vm420_vm3, %v417_v54, %v5745_v7  ;;  %vm5754_vm3 = vcmp.lt.s32.totalorder %v4277_v35, 33 }
 0x3cc   : > { %v4992_v4 = vadd.f32 %v3077_v57, %v2965_v10  ;;  %v3132_v12 = vrot.slane %v3125_v25, %v4341_v39  ;;  %v432_v52 = vcombine.low %v422_v37, %v421_v31  ;;  %2795 = vrot.lane.b32.xlu0 %v3952_v47, %s5746_s16  ;;  %2113 = vrot.lane.b32.xlu1 %v4254_v45, %s5726_s29  ;;  %s5751_s29 = smov 80   ;;  %v656_v31 = vld [vmem:[#allocation5 + $0x4] ss:$8 sm:$0x3] }
 0x3ce   : > { %v3134_v40 = vmul.f32 %v3132_v12, %v3115_v32  ;;  %v4999_v29 = vpop.permute.xlu0 %1155  ;;  %v474_v5 = vpop.permute.xlu1 %473  ;;  %v439_v42 = vrot.slane %v432_v52, %v4341_v39 }
 0x3cf   : > { %v476_v27 = vsel %vm475_vm4, %v5747_v6, %v474_v5  ;;  %v477_v38 = vsel %vm475_vm4, %v474_v5, %v5747_v6  ;;  %vm5755_vm4 = vmmov %vm5754_vm3 }
 0x3d0   : > { %v5007_v36 = vadd.f32 %v3134_v40, %v3022_v58  ;;  %v488_v61 = vcombine.low %v477_v38, %v476_v27  ;;  %2852 = vrot.lane.b32.xlu0 %v3952_v47, %s5748_s24  ;;  %2170 = vrot.lane.b32.xlu1 %v4254_v45, %s5730_s17  ;;  %v446_v22 = vrot.slane %v439_v42, %v4341_v39  ;;  %s5752_s17 = smov 79  }
 0x3d2   : > { %v5014_v53 = vpop.permute.xlu0 %1212  ;;  %v531_v26 = vpop.permute.xlu1 %530  ;;  %v495_v8 = vrot.slane %v488_v61, %v4341_v39  ;;  %v448_v9 = vmul.f32 %v446_v22, %v429_v23  ;;  %v713_v61 = vld [vmem:[#allocation5 + $0x5] ss:$8 sm:$0x3] }
 0x3d3   : > { %v533_v62 = vsel %vm532_vm5, %v5749_v44, %v531_v26  ;;  %v534_v13 = vsel %vm532_vm5, %v531_v26, %v5749_v44  ;;  %vm5756_vm5 = vcmp.lt.s32.totalorder %v4277_v35, 32 }
 0x3d4   : > { %v545_v17 = vcombine.low %v534_v13, %v533_v62  ;;  %2909 = vrot.lane.b32.xlu0 %v3952_v47, %s5750_s26  ;;  %2227 = vrot.lane.b32.xlu1 %v4254_v45, %s5732_s11  ;;  %v502_v59 = vrot.slane %v495_v8, %v4341_v39  ;;  %s5753_s11 = smov 78  }
 0x3d6   : > { %v552_v34 = vrot.slane %v545_v17, %v4341_v39  ;;  %v5029_v16 = vpop.permute.xlu0 %1269  ;;  %v588_v48 = vpop.permute.xlu1 %587  ;;  %v504_v57 = vmul.f32 %v502_v59, %v485_v2  ;;  %v827_v59 = vld [vmem:[#allocation5 + $0x7] ss:$8 sm:$0x3] }
 0x3d7   : > { %v590_v11 = vsel %vm589_vm6, %v4792_v43, %v588_v48  ;;  %v591_v30 = vsel %vm589_vm6, %v588_v48, %v4792_v43  ;;  %v599_v43 = vld [vmem:[#allocation5 + $0x3] ss:$8 sm:$0x3]  ;;  %vm5757_vm6 = vmmov %vm5756_vm5 }
 0x3d8   : > { %v559_v46 = vrot.slane %v552_v34, %v4341_v39  ;;  %v602_v56 = vcombine.low %v591_v30, %v590_v11  ;;  %2966 = vrot.lane.b32.xlu0 %v3952_v47, %s5751_s29  ;;  %2284 = vrot.lane.b32.xlu1 %v4254_v45, %s5734_s7  ;;  %s3698_s7 = smov 77   ;;  %v770_v34 = vld [vmem:[#allocation5 + $0x6] ss:$8 sm:$0x3] }
 0x3da   : > { %v561_v51 = vmul.f32 %v559_v46, %v542_v14  ;;  %v609_v18 = vrot.slane %v602_v56, %v4341_v39  ;;  %v5044_v33 = vpop.permute.xlu0 %1326  ;;  %v645_v19 = vpop.permute.xlu1 %644 }
 0x3db   : > { %v647_v15 = vsel %vm646_vm7, %v4812_v24, %v645_v19  ;;  %v648_v58 = vsel %vm646_vm7, %v645_v19, %v4812_v24  ;;  %vm5758_vm7 = vcmp.lt.s32.totalorder %v4277_v35, 31 }
 0x3dc   : > { %v583_v63 = vadd.f32 %v561_v51, %v448_v9  ;;  %v616_v50 = vrot.slane %v609_v18, %v4341_v39  ;;  %v659_v10 = vcombine.low %v648_v58, %v647_v15  ;;  %3023 = vrot.lane.b32.xlu0 %v3952_v47, %s5752_s17  ;;  %2341 = vrot.lane.b32.xlu1 %v4254_v45, %s5737_s9  ;;  %s3343_s9 = sshll.u32 %s3751_s22, 7  ;;  %s3699_s22 = smov [#allocation8]  }
 0x3de   : > { %v618_v25 = vmul.f32 %v616_v50, %v599_v43  ;;  %v666_v54 = vrot.slane %v659_v10, %v4341_v39  ;;  %v5058_v32 = vpop.permute.xlu0 %1383  ;;  %v702_v7 = vpop.permute.xlu1 %701 }
 0x3df   : > { %v704_v24 = vsel %vm703_vm8, %v4845_v21, %v702_v7  ;;  %v705_v37 = vsel %vm703_vm8, %v702_v7, %v4845_v21  ;;  %vm5759_vm8 = vmmov %vm5758_vm7 }
 0x3e0   : > { %v640_v12 = vadd.f32 %v618_v25, %v504_v57  ;;  %v673_v52 = vrot.slane %v666_v54, %v4341_v39  ;;  %v716_v40 = vcombine.low %v705_v37, %v704_v24  ;;  %3080 = vrot.lane.b32.xlu0 %v3952_v47, %s5753_s11  ;;  %2398 = vrot.lane.b32.xlu1 %v4254_v45, %s5738_s8  ;;  %v941_v37 = vld [vmem:[#allocation5 + $0x11] ss:$8 sm:$0x3]  ;;  %s5817_s8 = sshll.u32 %s3899_s12, 3 }
 0x3e2   : > { %v675_v5 = vmul.f32 %v673_v52, %v656_v31  ;;  %v723_v6 = vrot.slane %v716_v40, %v4341_v39  ;;  %v5072_v27 = vpop.permute.xlu0 %1440  ;;  %v759_v38 = vpop.permute.xlu1 %758 }
 0x3e3   : > { %v761_v21 = vsel %vm760_vm9, %v4882_v20, %v759_v38  ;;  %v762_v42 = vsel %vm760_vm9, %v759_v38, %v4882_v20  ;;  %vm5760_vm9 = vcmp.lt.s32.totalorder %v4277_v35, 30 }
 0x3e4   : > { %v697_v26 = vadd.f32 %v675_v5, %v583_v63  ;;  %v730_v44 = vrot.slane %v723_v6, %v4341_v39  ;;  %v773_v62 = vcombine.low %v762_v42, %v761_v21  ;;  %3137 = vrot.lane.b32.xlu0 %v3952_v47, %s3698_s7  ;;  %2455 = vrot.lane.b32.xlu1 %v4254_v45, %s5739_s10  ;;  %v884_v63 = vld [vmem:[#allocation5 + $0x10] ss:$8 sm:$0x3]  ;;  %v998_v42 = vld [vmem:[#allocation5 + $0x12] ss:$8 sm:$0x3] }
 0x3e5   : > { %s269_s10 = scalar_lea.vmem [#allocation8], %s5817_s8 }
 0x3e6   : > { %v732_v13 = vmul.f32 %v730_v44, %v713_v61  ;;  %v780_v17 = vrot.slane %v773_v62, %v4341_v39  ;;  %v5086_v22 = vpop.permute.xlu0 %1497  ;;  %v816_v8 = vpop.permute.xlu1 %815 }
 0x3e7   : > { %v818_v20 = vsel %vm817_vm10, %v4900_v60, %v816_v8  ;;  %v819_v48 = vsel %vm817_vm10, %v816_v8, %v4900_v60  ;;  %vm5761_vm10 = vmmov %vm5760_vm9 }
 0x3e8   : > { %v754_v23 = vadd.f32 %v732_v13, %v640_v12  ;;  %v787_v14 = vrot.slane %v780_v17, %v4341_v39  ;;  %v830_v11 = vcombine.low %v819_v48, %v818_v20  ;;  %3144 = vrot.lane.b32.xlu0 %v3938_v41, %s3698_s7  ;;  %2512 = vrot.lane.b32.xlu1 %v4254_v45, %s5740_s13  ;;  %v1055_v48 = vld [vmem:[#allocation5 + $0x13] ss:$8 sm:$0x3]  ;;  %s3231_s13 = sshll.u32 %s269_s10, 4  ;;  %s5481_s13 = int_to_ptr.vmem [resolvable:$true] %s3231_s13 }
 0x3ea   : > { %v789_v30 = vmul.f32 %v787_v14, %v770_v34  ;;  %v837_v46 = vrot.slane %v830_v11, %v4341_v39  ;;  %v5100_v56 = vpop.permute.xlu0 %1554  ;;  %v873_v9 = vpop.permute.xlu1 %872 }
 0x3eb   : > { %v875_v60 = vsel %vm874_vm11, %v4920_v0, %v873_v9  ;;  %v876_v51 = vsel %vm874_vm11, %v873_v9, %v4920_v0  ;;  %vm5762_vm11 = vcmp.lt.s32.totalorder %v4277_v35, 29 }
 0x3ec   : > { %v811_v18 = vadd.f32 %v789_v30, %v697_v26  ;;  %v844_v41 = vrot.slane %v837_v46, %v4341_v39  ;;  %v887_v19 = vcombine.low %v876_v51, %v875_v60  ;;  %2569 = vrot.lane.b32.xlu1 %v4254_v45, %s5741_s6  ;;  %v1112_v60 = vld [vmem:[#allocation5 + $0x14] ss:$8 sm:$0x3] }
 0x3ee   : > { %v846_v2 = vmul.f32 %v844_v41, %v827_v59  ;;  %v894_v43 = vrot.slane %v887_v19, %v4341_v39  ;;  %v5112_v15 = vpop.permute.xlu0 %1611  ;;  %v930_v58 = vpop.permute.xlu1 %929 }
 0x3ef   : > { %v932_v50 = vsel %vm5754_vm3, %v4939_v3, %v930_v58  ;;  %v933_v0 = vsel %vm5755_vm4, %v930_v58, %v4939_v3  ;;  %vm5763_vm3 = vmmov %vm5762_vm11  ;;  %vm5764_vm4 = vcmp.lt.s32.totalorder %v4277_v35, 19 }
 0x3f0   : > { %v868_v10 = vadd.f32 %v846_v2, %v754_v23  ;;  %v901_v57 = vrot.slane %v894_v43, %v4341_v39  ;;  %v944_v25 = vcombine.low %v933_v0, %v932_v50  ;;  %2626 = vrot.lane.b32.xlu1 %v4254_v45, %s5742_s28  ;;  %v1169_v50 = vld [vmem:[#allocation5 + $0x15] ss:$8 sm:$0x3] }
 0x3f2   : > { %v903_v54 = vmul.f32 %v901_v57, %v884_v63  ;;  %v951_v7 = vrot.slane %v944_v25, %v4341_v39  ;;  %v5124_v31 = vpop.permute.xlu0 %1668  ;;  %v987_v24 = vpop.permute.xlu1 %986 }
 0x3f3   : > { %v989_v12 = vsel %vm5756_vm5, %v4955_v1, %v987_v24  ;;  %v990_v3 = vsel %vm5757_vm6, %v987_v24, %v4955_v1  ;;  %vm5765_vm5 = vmmov %vm5764_vm4  ;;  %vm5766_vm6 = vcmp.lt.s32.totalorder %v4277_v35, 18 }
 0x3f4   : > { %v925_v52 = vadd.f32 %v903_v54, %v811_v18  ;;  %v958_v40 = vrot.slane %v951_v7, %v4341_v39  ;;  %v1001_v5 = vcombine.low %v990_v3, %v989_v12  ;;  %2683 = vrot.lane.b32.xlu1 %v4254_v45, %s5743_s30  ;;  %v1226_v12 = vld [vmem:[#allocation5 + $0x16] ss:$8 sm:$0x3]  ;;  %s5479_s30 = scalar_lea.hbm %s5528_s5, %s3343_s9 }
 0x3f6   : > { %v960_v6 = vmul.f32 %v958_v40, %v941_v37  ;;  %v1008_v38 = vrot.slane %v1001_v5, %v4341_v39  ;;  %v5136_v61 = vpop.permute.xlu0 %1725  ;;  %v1044_v21 = vpop.permute.xlu1 %1043 }
 0x3f7   : > { %v1046_v26 = vsel %vm5758_vm7, %v4970_v55, %v1044_v21  ;;  %v1047_v1 = vsel %vm5759_vm8, %v1044_v21, %v4970_v55  ;;  %vm5767_vm7 = vmmov %vm5766_vm6  ;;  %vm5768_vm8 = vcmp.lt.s32.totalorder %v4277_v35, 17 }
 0x3f8   : > { %v982_v44 = vadd.f32 %v960_v6, %v868_v10  ;;  %v1015_v62 = vrot.slane %v1008_v38, %v4341_v39  ;;  %v1058_v13 = vcombine.low %v1047_v1, %v1046_v26  ;;  %2740 = vrot.lane.b32.xlu1 %v4254_v45, %s5744_s15  ;;  %s3217_s15 = scalar_lea.sflag [#allocation4], %s3899_s12 }
 0x3fa   : > { %v1017_v17 = vmul.f32 %v1015_v62, %v998_v42  ;;  %v1065_v8 = vrot.slane %v1058_v13, %v4341_v39  ;;  %v5148_v34 = vpop.permute.xlu0 %1826  ;;  %v1101_v20 = vpop.permute.xlu1 %1100  ;;  %v1283_v42 = vld [vmem:[#allocation5 + $0x17] ss:$8 sm:$0x3] }
 0x3fb   : > { %v1103_v23 = vsel %vm5760_vm9, %v4984_v28, %v1101_v20  ;;  %v1104_v55 = vsel %vm5761_vm10, %v1101_v20, %v4984_v28  ;;  %vm5769_vm9 = vmmov %vm5768_vm8  ;;  %vm5770_vm10 = vcmp.lt.s32.totalorder %v4277_v35, 16 }
 0x3fc   : > { %v1039_v14 = vadd.f32 %v1017_v17, %v925_v52  ;;  %v1072_v11 = vrot.slane %v1065_v8, %v4341_v39  ;;  %v1115_v30 = vcombine.low %v1104_v55, %v1103_v23  ;;  %2797 = vrot.lane.b32.xlu1 %v4254_v45, %s5746_s16  ;;  %s3569_s16 = scalar_lea.vmem %s5481_s13, 128 }
 0x3fd   : > { %p3570_p11 = scmp.ne.s32.totalorder %s5481_s13, %s3569_s16 }
 0x3fe   : > { %v1074_v46 = vmul.f32 %v1072_v11, %v1055_v48  ;;  %v1122_v9 = vrot.slane %v1115_v30, %v4341_v39  ;;  %v1158_v59 = vpop.permute.xlu1 %1157  ;;  %v5167_v19 = vpop.permute.xlu0 %1883  ;;  %v1340_v48 = vld [vmem:[#allocation5 + $0x20] ss:$8 sm:$0x3] }
 0x3ff   : > { %v1160_v51 = vsel %vm5762_vm11, %v4999_v29, %v1158_v59  ;;  %v1161_v28 = vsel %vm5763_vm3, %v1158_v59, %v4999_v29  ;;  %vm5771_vm11 = vmmov %vm5770_vm10  ;;  %vm5772_vm3 = vcmp.lt.s32.totalorder %v4277_v35, 15  ;;  %p3571_p1 = pnand %p3570_p11, %p5819_p0 }
 0x400   : > { %v1096_v18 = vadd.f32 %v1074_v46, %v982_v44  ;;  %v1129_v41 = vrot.slane %v1122_v9, %v4341_v39  ;;  %v1172_v2 = vcombine.low %v1161_v28, %v1160_v51  ;;  %2854 = vrot.lane.b32.xlu1 %v4254_v45, %s5748_s24  ;;  %s3573_s24 = sshll.u32 %s3699_s22, 4  ;;  %s3574_s24 = int_to_ptr.vmem [resolvable:$false] %s3573_s24 }
 0x401   : > { %p3572_p3 = pneg %p3571_p1  ;;  %p3576_p7 = scmp.lt.s32.totalorder %s5481_s13, %s3574_s24 }
 0x402   : > { %v1131_v43 = vmul.f32 %v1129_v41, %v1112_v60  ;;  %v1179_v58 = vrot.slane %v1172_v2, %v4341_v39  ;;  %v1215_v63 = vpop.permute.xlu1 %1214  ;;  %v5181_v7 = vpop.permute.xlu0 %1940  ;;  %v1397_v60 = vld [vmem:[#allocation5 + $0x21] ss:$8 sm:$0x3] }
 0x403   : > { %v1217_v0 = vsel %vm5764_vm4, %v5014_v53, %v1215_v63  ;;  %v1218_v29 = vsel %vm5765_vm5, %v1215_v63, %v5014_v53  ;;  %vm5773_vm4 = vmmov %vm5772_vm3  ;;  %v1454_v63 = vld [vmem:[#allocation5 + $0x22] ss:$8 sm:$0x3]  ;;  %vm5774_vm5 = vcmp.lt.s32.totalorder %v4277_v35, 14 }
 0x404   : > { %v1153_v10 = vadd.f32 %v1131_v43, %v1039_v14  ;;  %v1186_v57 = vrot.slane %v1179_v58, %v4341_v39  ;;  %v1229_v25 = vcombine.low %v1218_v29, %v1217_v0  ;;  %2911 = vrot.lane.b32.xlu1 %v4254_v45, %s5750_s26  ;;  %s3575_s26 = scalar_lea.vmem %s3574_s24, 256 }
 0x405   : > { %p3577_p9 = scmp.lt.s32.totalorder %s3575_s26, %s3569_s16 }
 0x406   : > { %v1188_v54 = vmul.f32 %v1186_v57, %v1169_v50  ;;  %v1236_v24 = vrot.slane %v1229_v25, %v4341_v39  ;;  %v1272_v37 = vpop.permute.xlu1 %1271  ;;  %v5200_v44 = vpop.permute.xlu0 %1997 }
 0x407   : > { %v1274_v3 = vsel %vm5766_vm6, %v5029_v16, %v1272_v37  ;;  %v1275_v53 = vsel %vm5767_vm7, %v1272_v37, %v5029_v16  ;;  %vm5775_vm6 = vmmov %vm5774_vm5  ;;  %v1511_v37 = vld [vmem:[#allocation5 + $0x23] ss:$8 sm:$0x3]  ;;  %vm5776_vm7 = vcmp.lt.s32.totalorder %v4277_v35, 13  ;;  %p3578_p12 = por %p3577_p9, %p3576_p7 }
 0x408   : > { %v1210_v52 = vadd.f32 %v1188_v54, %v1096_v18  ;;  %v1243_v40 = vrot.slane %v1236_v24, %v4341_v39  ;;  %v1286_v5 = vcombine.low %v1275_v53, %v1274_v3  ;;  %2968 = vrot.lane.b32.xlu1 %v4254_v45, %s5751_s29 }
 0x409   : > { %p3579_p2 = pnand %p3578_p12, %p3572_p3 }
 0x40a   : > { %v1245_v6 = vmul.f32 %v1243_v40, %v1226_v12  ;;  %v1293_v38 = vrot.slane %v1286_v5, %v4341_v39  ;;  %v1329_v21 = vpop.permute.xlu1 %1328  ;;  %v5215_v30 = vpop.permute.xlu0 %2054 }
 0x40b   : > { %v1331_v26 = vsel %vm5768_vm8, %v5044_v33, %v1329_v21  ;;  %v1332_v16 = vsel %vm5769_vm9, %v1329_v21, %v5044_v33  ;;  %vm5777_vm8 = vmmov %vm5776_vm7  ;;  %vm5778_vm9 = vcmp.lt.s32.totalorder %v4277_v35, 3 }
 0x40c   : > { %v1267_v1 = vadd.f32 %v1245_v6, %v1153_v10  ;;  %v1300_v62 = vrot.slane %v1293_v38, %v4341_v39  ;;  %v1343_v13 = vcombine.low %v1332_v16, %v1331_v26  ;;  %3025 = vrot.lane.b32.xlu1 %v4254_v45, %s5752_s17  ;;  %v1568_v38 = vld [vmem:[#allocation5 + $0x24] ss:$8 sm:$0x3] }
 0x40e   : > { %v1302_v17 = vmul.f32 %v1300_v62, %v1283_v42  ;;  %v1350_v8 = vrot.slane %v1343_v13, %v4341_v39  ;;  %v1386_v20 = vpop.permute.xlu1 %1385  ;;  %v5234_v0 = vpop.permute.xlu0 %2111 }
 0x40f   : > { %v1388_v23 = vsel %vm5770_vm10, %v5058_v32, %v1386_v20  ;;  %v1389_v33 = vsel %vm5771_vm11, %v1386_v20, %v5058_v32  ;;  %vm5779_vm10 = vmmov %vm5778_vm9  ;;  %vm5780_vm11 = vcmp.lt.s32.totalorder %v4277_v35, 2 }
 0x410   : > { %v1324_v55 = vadd.f32 %v1302_v17, %v1210_v52  ;;  %v1357_v14 = vrot.slane %v1350_v8, %v4341_v39  ;;  %v1400_v11 = vcombine.low %v1389_v33, %v1388_v23  ;;  %3082 = vrot.lane.b32.xlu1 %v4254_v45, %s5753_s11  ;;  %v1625_v17 = vld [vmem:[#allocation5 + $0x25] ss:$8 sm:$0x3] }
 0x412   : > { %v1359_v46 = vmul.f32 %v1357_v14, %v1340_v48  ;;  %v1407_v9 = vrot.slane %v1400_v11, %v4341_v39  ;;  %v1443_v59 = vpop.permute.xlu1 %1442  ;;  %v5247_v40 = vpop.permute.xlu0 %2168 }
 0x413   : > { %v1445_v51 = vsel %vm5772_vm3, %v5072_v27, %v1443_v59  ;;  %v1446_v32 = vsel %vm5773_vm4, %v1443_v59, %v5072_v27  ;;  %vm5781_vm3 = vmmov %vm5780_vm11  ;;  %vm5782_vm4 = vcmp.lt.s32.totalorder %v4277_v35, 1 }
 0x414   : > { %v1381_v28 = vadd.f32 %v1359_v46, %v1267_v1  ;;  %v1414_v18 = vrot.slane %v1407_v9, %v4341_v39  ;;  %v1457_v41 = vcombine.low %v1446_v32, %v1445_v51  ;;  %3139 = vrot.lane.b32.xlu1 %v4254_v45, %s3698_s7  ;;  %v1682_v46 = vld [vmem:[#allocation5 + $0x26] ss:$8 sm:$0x3]  ;;  %v1786_v32 = vcombine.low %v3952_v47, %v4254_v45 }
 0x416   : > { %v1416_v2 = vmul.f32 %v1414_v18, %v1397_v60  ;;  %v1464_v43 = vrot.slane %v1457_v41, %v4341_v39  ;;  %v1500_v58 = vpop.permute.xlu1 %1499  ;;  %v5264_v48 = vpop.permute.xlu0 %2225  ;;  %v1793_v47 = vrot.slane %v1786_v32, %v4341_v39 }
 0x417   : > { %v1502_v50 = vsel %vm5774_vm5, %v5086_v22, %v1500_v58  ;;  %v1503_v27 = vsel %vm5775_vm6, %v1500_v58, %v5086_v22  ;;  %vm5783_vm5 = vmmov %vm5782_vm4  ;;  %vm5784_vm6 = vcmp.lt.s32.totalorder %v4277_v35, 127 }
 0x418   : > { %v1438_v29 = vadd.f32 %v1416_v2, %v1324_v55  ;;  %v1471_v10 = vrot.slane %v1464_v43, %v4341_v39  ;;  %v1514_v57 = vcombine.low %v1503_v27, %v1502_v50  ;;  %3146 = vrot.lane.b32.xlu1 %v3958_v49, %s3698_s7  ;;  %v1739_v43 = vld [vmem:[#allocation5 + $0x27] ss:$8 sm:$0x3] }
 0x41a   : > { %v1473_v25 = vmul.f32 %v1471_v10, %v1454_v63  ;;  %v1521_v54 = vrot.slane %v1514_v57, %v4341_v39  ;;  %v1557_v24 = vpop.permute.xlu1 %1556  ;;  %v1840_v57 = vld [vmem:[#allocation5 + $0x31] ss:$8 sm:$0x3] }
 0x41b   : > { %v1559_v12 = vsel %vm5776_vm7, %v5100_v56, %v1557_v24  ;;  %v1560_v22 = vsel %vm5777_vm8, %v1557_v24, %v5100_v56  ;;  %vm5785_vm7 = vmmov %vm5784_vm6  ;;  %vm5786_vm8 = vcmp.lt.s32.totalorder %v4277_v35, 126 }
 0x41c   : > { %v1495_v3 = vadd.f32 %v1473_v25, %v1381_v28  ;;  %v1528_v53 = vrot.slane %v1521_v54, %v4341_v39  ;;  %v1571_v52 = vcombine.low %v1560_v22, %v1559_v12  ;;  %v5277_v28 = vpop.permute.xlu0 %2282  ;;  %v1800_v12 = vrot.slane %v1793_v47, %v4341_v39 }
 0x41e   : > { %v1530_v49 = vmul.f32 %v1528_v53, %v1511_v37  ;;  %v1578_v5 = vrot.slane %v1571_v52, %v4341_v39  ;;  %v1614_v6 = vpop.permute.xlu1 %1613 }
 0x41f   : > { %v1616_v21 = vsel %vm5778_vm9, %v5112_v15, %v1614_v6  ;;  %v1617_v42 = vsel %vm5779_vm10, %v1614_v6, %v5112_v15  ;;  %vm5787_vm9 = vmmov %vm5786_vm8  ;;  %vm5788_vm10 = vcmp.lt.s32.totalorder %v4277_v35, 125 }
 0x420   : > { %v1552_v56 = vadd.f32 %v1530_v49, %v1438_v29  ;;  %v1585_v26 = vrot.slane %v1578_v5, %v4341_v39  ;;  %v1628_v16 = vcombine.low %v1617_v42, %v1616_v21  ;;  %v1897_v5 = vld [vmem:[#allocation5 + $0x32] ss:$8 sm:$0x3] }
 0x422   : > { %v1587_v1 = vmul.f32 %v1585_v26, %v1568_v38  ;;  %v1635_v62 = vrot.slane %v1628_v16, %v4341_v39  ;;  %v1671_v13 = vpop.permute.xlu1 %1670 }
 0x423   : > { %v1673_v8 = vsel %vm5780_vm11, %v5124_v31, %v1671_v13  ;;  %v1674_v20 = vsel %vm5781_vm3, %v1671_v13, %v5124_v31  ;;  %vm5789_vm11 = vmmov %vm5788_vm10  ;;  %vm5790_vm3 = vcmp.lt.s32.totalorder %v4277_v35, 115 }
 0x424   : > { %v1609_v15 = vadd.f32 %v1587_v1, %v1495_v3  ;;  %v1642_v23 = vrot.slane %v1635_v62, %v4341_v39  ;;  %v1685_v33 = vcombine.low %v1674_v20, %v1673_v8  ;;  %v1783_v3 = vld [vmem:[#allocation5 + $0x30] ss:$8 sm:$0x3] }
 0x425   : > { %v1802_v21 = vmul.f32 %v1800_v12, %v1783_v3  ;;  %v2182_v12 = vld [vmem:[#allocation5 + $0x37] ss:$8 sm:$0x3] }
 0x426   : > { %v1644_v55 = vmul.f32 %v1642_v23, %v1625_v17  ;;  %v1692_v14 = vrot.slane %v1685_v33, %v4341_v39  ;;  %v1728_v11 = vpop.permute.xlu1 %1727  ;;  %v1954_v17 = vld [vmem:[#allocation5 + $0x33] ss:$8 sm:$0x3] }
 0x427   : > { %v1730_v9 = vsel %vm5782_vm4, %v5136_v61, %v1728_v11  ;;  %v1731_v59 = vsel %vm5783_vm5, %v1728_v11, %v5136_v61  ;;  %vm5791_vm4 = vmmov %vm5790_vm3  ;;  %v2011_v11 = vld [vmem:[#allocation5 + $0x34] ss:$8 sm:$0x3]  ;;  %vm5792_vm5 = vcmp.lt.s32.totalorder %v4277_v35, 114 }
 0x428   : > { %v1666_v31 = vadd.f32 %v1644_v55, %v1552_v56  ;;  %v1699_v60 = vrot.slane %v1692_v14, %v4341_v39  ;;  %v1742_v51 = vcombine.low %v1731_v59, %v1730_v9 }
 0x42a   : > { %v1701_v18 = vmul.f32 %v1699_v60, %v1682_v46  ;;  %v1749_v41 = vrot.slane %v1742_v51, %v4341_v39  ;;  %v1829_v2 = vpop.permute.xlu1 %1828 }
 0x42b   : > { %v1831_v58 = vsel %vm5784_vm6, %v5148_v34, %v1829_v2  ;;  %v1832_v61 = vsel %vm5785_vm7, %v1829_v2, %v5148_v34  ;;  %v5295_v34 = vpop.permute.xlu0 %2339  ;;  %vm5793_vm6 = vmmov %vm5792_vm5  ;;  %vm5794_vm7 = vcmp.lt.s32.totalorder %v4277_v35, 113 }
 0x42c   : > { %v1723_v63 = vadd.f32 %v1701_v18, %v1609_v15  ;;  %v1756_v50 = vrot.slane %v1749_v41, %v4341_v39  ;;  %v1843_v27 = vcombine.low %v1831_v58, %v1832_v61  ;;  %v2068_v41 = vld [vmem:[#allocation5 + $0x35] ss:$8 sm:$0x3] }
 0x42e   : > { %v1758_v45 = vmul.f32 %v1756_v50, %v1739_v43  ;;  %v1850_v29 = vrot.slane %v1843_v27, %v4341_v39  ;;  %v1886_v10 = vpop.permute.xlu1 %1885  ;;  %v1824_v16 = vadd.f32 %v1802_v21, %v1723_v63 }
 0x42f   : > { %v1888_v25 = vsel %vm5786_vm8, %v5167_v19, %v1886_v10  ;;  %v1889_v54 = vsel %vm5787_vm9, %v1886_v10, %v5167_v19  ;;  %v5307_v26 = vpop.permute.xlu0 %2396  ;;  %vm5795_vm8 = vmmov %vm5794_vm7  ;;  %vm5796_vm9 = vcmp.lt.s32.totalorder %v4277_v35, 112 }
 0x430   : > { %v1780_v24 = vadd.f32 %v1758_v45, %v1666_v31  ;;  %v1857_v37 = vrot.slane %v1850_v29, %v4341_v39  ;;  %v1900_v22 = vcombine.low %v1888_v25, %v1889_v54  ;;  %v2125_v45 = vld [vmem:[#allocation5 + $0x36] ss:$8 sm:$0x3] }
 0x432   : > { %v1859_v53 = vmul.f32 %v1857_v37, %v1840_v57  ;;  %v1907_v52 = vrot.slane %v1900_v22, %v4341_v39  ;;  %v1943_v49 = vpop.permute.xlu1 %1942 }
 0x433   : > { %v1945_v6 = vsel %vm5788_vm10, %v5181_v7, %v1943_v49  ;;  %v1946_v19 = vsel %vm5789_vm11, %v1943_v49, %v5181_v7  ;;  %v5324_v59 = vpop.permute.xlu0 %2453  ;;  %vm5797_vm10 = vmmov %vm5796_vm9  ;;  %vm5798_vm11 = vcmp.lt.s32.totalorder %v4277_v35, 111 }
 0x434   : > { %v1881_v38 = vadd.f32 %v1859_v53, %v1780_v24  ;;  %v1914_v42 = vrot.slane %v1907_v52, %v4341_v39  ;;  %v1957_v56 = vcombine.low %v1945_v6, %v1946_v19 }
 0x436   : > { %v1916_v1 = vmul.f32 %v1914_v42, %v1897_v5  ;;  %v1964_v62 = vrot.slane %v1957_v56, %v4341_v39  ;;  %v2000_v13 = vpop.permute.xlu1 %1999 }
 0x437   : > { %v2002_v8 = vsel %vm5790_vm3, %v5200_v44, %v2000_v13  ;;  %v2003_v7 = vsel %vm5791_vm4, %v2000_v13, %v5200_v44  ;;  %v5335_v63 = vpop.permute.xlu0 %2510  ;;  %vm5799_vm3 = vmmov %vm5798_vm11  ;;  %vm5800_vm4 = vcmp.lt.s32.totalorder %v4277_v35, 110 }
 0x438   : > { %v1938_v20 = vadd.f32 %v1916_v1, %v1824_v16  ;;  %v1971_v15 = vrot.slane %v1964_v62, %v4341_v39  ;;  %v2014_v23 = vcombine.low %v2002_v8, %v2003_v7  ;;  %v2296_v8 = vld [vmem:[#allocation5 + $0x41] ss:$8 sm:$0x3] }
 0x43a   : > { %v1973_v33 = vmul.f32 %v1971_v15, %v1954_v17  ;;  %v2021_v55 = vrot.slane %v2014_v23, %v4341_v39  ;;  %v2057_v14 = vpop.permute.xlu1 %2056 }
 0x43b   : > { %v2059_v46 = vsel %vm5792_vm5, %v5215_v30, %v2057_v14  ;;  %v2060_v9 = vsel %vm5793_vm6, %v2057_v14, %v5215_v30  ;;  %v2568_v53 = vpop.permute.xlu0 %2567  ;;  %vm5801_vm5 = vmmov %vm5800_vm4  ;;  %vm5802_vm6 = vcmp.lt.s32.totalorder %v4277_v35, 99 }
 0x43c   : > { %v1995_v44 = vadd.f32 %v1973_v33, %v1881_v38  ;;  %v2028_v31 = vrot.slane %v2021_v55, %v4341_v39  ;;  %v2071_v60 = vcombine.low %v2059_v46, %v2060_v9  ;;  %v2239_v38 = vld [vmem:[#allocation5 + $0x40] ss:$8 sm:$0x3] }
 0x43e   : > { %v2030_v51 = vmul.f32 %v2028_v31, %v2011_v11  ;;  %v2078_v32 = vrot.slane %v2071_v60, %v4341_v39  ;;  %v2114_v18 = vpop.permute.xlu1 %2113  ;;  %v2353_v11 = vld [vmem:[#allocation5 + $0x42] ss:$8 sm:$0x3] }
 0x43f   : > { %v2116_v2 = vsel %vm5794_vm7, %v5234_v0, %v2114_v18  ;;  %v2117_v43 = vsel %vm5795_vm8, %v2114_v18, %v5234_v0  ;;  %v2625_v1 = vpop.permute.xlu0 %2624  ;;  %vm5803_vm7 = vmmov %vm5802_vm6 }
 0x440   : > { %v2052_v30 = vadd.f32 %v2030_v51, %v1938_v20  ;;  %v2085_v58 = vrot.slane %v2078_v32, %v4341_v39  ;;  %v2128_v61 = vcombine.low %v2116_v2, %v2117_v43 }
 0x442   : > { %v2087_v50 = vmul.f32 %v2085_v58, %v2068_v41  ;;  %v2135_v27 = vrot.slane %v2128_v61, %v4341_v39  ;;  %v2171_v47 = vpop.permute.xlu1 %2170  ;;  %v2410_v41 = vld [vmem:[#allocation5 + $0x43] ss:$8 sm:$0x3] }
 0x443   : > { %v2173_v29 = vsel %vm5796_vm9, %v5247_v40, %v2171_v47  ;;  %v2174_v10 = vsel %vm5797_vm10, %v2171_v47, %v5247_v40  ;;  %vm5810_vm9 = vcmp.lt.s32.totalorder %v4277_v35, 82 }
 0x444   : > { %v2109_v0 = vadd.f32 %v2087_v50, %v1995_v44  ;;  %v2142_v57 = vrot.slane %v2135_v27, %v4341_v39  ;;  %v2185_v25 = vcombine.low %v2173_v29, %v2174_v10  ;;  %v2682_v44 = vpop.permute.xlu0 %2681  ;;  %vm5811_vm10 = vmmov %vm5810_vm9 }
 0x446   : > { %v2144_v54 = vmul.f32 %v2142_v57, %v2125_v45  ;;  %v2192_v24 = vrot.slane %v2185_v25, %v4341_v39  ;;  %v2228_v37 = vpop.permute.xlu1 %2227  ;;  %v2467_v45 = vld [vmem:[#allocation5 + $0x44] ss:$8 sm:$0x3] }
 0x447   : > { %v2230_v22 = vsel %vm5798_vm11, %v5264_v48, %v2228_v37  ;;  %v2231_v3 = vsel %vm5799_vm3, %v2228_v37, %v5264_v48  ;;  %v2524_v37 = vld [vmem:[#allocation5 + $0x45] ss:$8 sm:$0x3]  ;;  %vm5812_vm11 = vcmp.lt.s32.totalorder %v4277_v35, 81 }
 0x448   : > { %v2166_v52 = vadd.f32 %v2144_v54, %v2052_v30  ;;  %v2199_v40 = vrot.slane %v2192_v24, %v4341_v39  ;;  %v2242_v49 = vcombine.low %v2230_v22, %v2231_v3  ;;  %v2739_v61 = vpop.permute.xlu0 %2738  ;;  %vm5813_vm3 = vmmov %vm5812_vm11 }
 0x44a   : > { %v2201_v5 = vmul.f32 %v2199_v40, %v2182_v12  ;;  %v2249_v6 = vrot.slane %v2242_v49, %v4341_v39  ;;  %v2285_v19 = vpop.permute.xlu1 %2284 }
 0x44b   : > { %v2287_v21 = vsel %vm5800_vm4, %v5277_v28, %v2285_v19  ;;  %v2288_v42 = vsel %vm5801_vm5, %v2285_v19, %v5277_v28  ;;  %v2581_v19 = vld [vmem:[#allocation5 + $0x46] ss:$8 sm:$0x3]  ;;  %vm5814_vm4 = vcmp.lt.s32.totalorder %v4277_v35, 80 }
 0x44c   : > { %v2223_v56 = vadd.f32 %v2201_v5, %v2109_v0  ;;  %v2256_v48 = vrot.slane %v2249_v6, %v4341_v39  ;;  %v2299_v16 = vcombine.low %v2287_v21, %v2288_v42  ;;  %v2796_v3 = vpop.permute.xlu0 %2795  ;;  %vm5815_vm5 = vmmov %vm5814_vm4 }
 0x44e   : > { %v2258_v62 = vmul.f32 %v2256_v48, %v2239_v38  ;;  %v2306_v13 = vrot.slane %v2299_v16, %v4341_v39  ;;  %v2342_v17 = vpop.permute.xlu1 %2341 }
 0x44f   : > { %v2344_v7 = vsel %vm2343_vm14, %v5295_v34, %v2342_v17  ;;  %v2345_v20 = vsel %vm2343_vm14, %v2342_v17, %v5295_v34  ;;  %v2638_v17 = vld [vmem:[#allocation5 + $0x47] ss:$8 sm:$0x3] }
 0x450   : > { %v2280_v15 = vadd.f32 %v2258_v62, %v2166_v52  ;;  %v2313_v28 = vrot.slane %v2306_v13, %v4341_v39  ;;  %v2356_v23 = vcombine.low %v2344_v7, %v2345_v20  ;;  %v2853_v48 = vpop.permute.xlu0 %2852 }
 0x452   : > { %v2315_v33 = vmul.f32 %v2313_v28, %v2296_v8  ;;  %v2363_v55 = vrot.slane %v2356_v23, %v4341_v39  ;;  %v2399_v14 = vpop.permute.xlu1 %2398 }
 0x453   : > { %v2401_v46 = vsel %vm5802_vm6, %v5307_v26, %v2399_v14  ;;  %v2402_v9 = vsel %vm5803_vm7, %v2399_v14, %v5307_v26 }
 0x454   : > { %v2337_v31 = vadd.f32 %v2315_v33, %v2223_v56  ;;  %v2370_v34 = vrot.slane %v2363_v55, %v4341_v39  ;;  %v2413_v60 = vcombine.low %v2401_v46, %v2402_v9  ;;  %v2695_v55 = vld [vmem:[#allocation5 + $0x50] ss:$8 sm:$0x3]  ;;  %v2910_v46 = vpop.permute.xlu0 %2909 }
 0x456   : > { %v2372_v51 = vmul.f32 %v2370_v34, %v2353_v11  ;;  %v2420_v32 = vrot.slane %v2413_v60, %v4341_v39  ;;  %v2456_v18 = vpop.permute.xlu1 %2455 }
 0x457   : > { %v2458_v2 = vsel %vm2457_vm13, %v5324_v59, %v2456_v18  ;;  %v2459_v43 = vsel %vm2457_vm13, %v2456_v18, %v5324_v59  ;;  %vm5804_vm13 = vcmp.lt.s32.totalorder %v4277_v35, 95 }
 0x458   : > { %v2394_v30 = vadd.f32 %v2372_v51, %v2280_v15  ;;  %v2427_v26 = vrot.slane %v2420_v32, %v4341_v39  ;;  %v2470_v58 = vcombine.low %v2458_v2, %v2459_v43  ;;  %vm5805_vm14 = vmmov %vm5804_vm13  ;;  %v2752_v32 = vld [vmem:[#allocation5 + $0x51] ss:$8 sm:$0x3] }
 0x45a   : > { %v2429_v50 = vmul.f32 %v2427_v26, %v2410_v41  ;;  %v2477_v27 = vrot.slane %v2470_v58, %v4341_v39  ;;  %v2513_v47 = vpop.permute.xlu1 %2512  ;;  %v2967_v26 = vpop.permute.xlu0 %2966 }
 0x45b   : > { %v2515_v29 = vsel %vm2514_vm15, %v5335_v63, %v2513_v47  ;;  %v2516_v10 = vsel %vm2514_vm15, %v2513_v47, %v5335_v63  ;;  %vm5806_vm15 = vcmp.lt.s32.totalorder %v4277_v35, 93 }
 0x45c   : > { %v2451_v0 = vadd.f32 %v2429_v50, %v2337_v31  ;;  %v2484_v59 = vrot.slane %v2477_v27, %v4341_v39  ;;  %v2527_v57 = vcombine.low %v2515_v29, %v2516_v10  ;;  %v2809_v27 = vld [vmem:[#allocation5 + $0x52] ss:$8 sm:$0x3] }
 0x45e   : > { %v2486_v25 = vmul.f32 %v2484_v59, %v2467_v45  ;;  %v2534_v54 = vrot.slane %v2527_v57, %v4341_v39  ;;  %v2570_v24 = vpop.permute.xlu1 %2569 }
 0x45f   : > { %v2572_v12 = vsel %vm2571_vm1, %v2568_v53, %v2570_v24  ;;  %v2573_v22 = vsel %vm2571_vm1, %v2570_v24, %v2568_v53  ;;  %vm5807_vm1 = vmmov %vm5806_vm15 }
 0x460   : > { %v2508_v52 = vadd.f32 %v2486_v25, %v2394_v30  ;;  %v2541_v40 = vrot.slane %v2534_v54, %v4341_v39  ;;  %v2584_v63 = vcombine.low %v2572_v12, %v2573_v22  ;;  %v2866_v54 = vld [vmem:[#allocation5 + $0x53] ss:$8 sm:$0x3]  ;;  %v3024_v12 = vpop.permute.xlu0 %3023 }
 0x462   : > { %v2543_v49 = vmul.f32 %v2541_v40, %v2524_v37  ;;  %v2591_v5 = vrot.slane %v2584_v63, %v4341_v39  ;;  %v2627_v6 = vpop.permute.xlu1 %2626 }
 0x463   : > { %v2629_v38 = vsel %vm5804_vm13, %v2625_v1, %v2627_v6  ;;  %v2630_v21 = vsel %vm5805_vm14, %v2627_v6, %v2625_v1 }
 0x464   : > { %v2565_v42 = vadd.f32 %v2543_v49, %v2451_v0  ;;  %v2598_v56 = vrot.slane %v2591_v5, %v4341_v39  ;;  %v2641_v53 = vcombine.low %v2629_v38, %v2630_v21  ;;  %v2923_v5 = vld [vmem:[#allocation5 + $0x54] ss:$8 sm:$0x3] }
 0x466   : > { %v2600_v16 = vmul.f32 %v2598_v56, %v2581_v19  ;;  %v2648_v62 = vrot.slane %v2641_v53, %v4341_v39  ;;  %v2684_v13 = vpop.permute.xlu1 %2683  ;;  %v3081_v56 = vpop.permute.xlu0 %3080 }
 0x467   : > { %v2686_v8 = vsel %vm2685_vm12, %v2682_v44, %v2684_v13  ;;  %v2687_v7 = vsel %vm2685_vm12, %v2684_v13, %v2682_v44  ;;  %vm5808_vm12 = vcmp.lt.s32.totalorder %v4277_v35, 83 }
 0x468   : > { %v2622_v20 = vadd.f32 %v2600_v16, %v2508_v52  ;;  %v2655_v15 = vrot.slane %v2648_v62, %v4341_v39  ;;  %v2698_v1 = vcombine.low %v2686_v8, %v2687_v7  ;;  %vm5809_vm8 = vmmov %vm5808_vm12  ;;  %v2980_v62 = vld [vmem:[#allocation5 + $0x55] ss:$8 sm:$0x3] }
 0x46a   : > { %v2657_v28 = vmul.f32 %v2655_v15, %v2638_v17  ;;  %v2705_v23 = vrot.slane %v2698_v1, %v4341_v39  ;;  %v2741_v33 = vpop.permute.xlu1 %2740 }
 0x46b   : > { %v2743_v14 = vsel %vm5806_vm15, %v2739_v61, %v2741_v33  ;;  %v2744_v11 = vsel %vm5807_vm1, %v2741_v33, %v2739_v61 }
 0x46c   : > { %v2679_v9 = vadd.f32 %v2657_v28, %v2565_v42  ;;  %v2712_v31 = vrot.slane %v2705_v23, %v4341_v39  ;;  %v2755_v44 = vcombine.low %v2743_v14, %v2744_v11  ;;  %v3037_v23 = vld [vmem:[#allocation5 + $0x56] ss:$8 sm:$0x3]  ;;  %v3138_v14 = vpop.permute.xlu0 %3137 }
 0x46e   : > { %v2714_v34 = vmul.f32 %v2712_v31, %v2695_v55  ;;  %v2762_v60 = vrot.slane %v2755_v44, %v4341_v39  ;;  %v2798_v51 = vpop.permute.xlu1 %2797 }
 0x46f   : > { %v2800_v18 = vsel %vm5808_vm12, %v2796_v3, %v2798_v51  ;;  %v2801_v41 = vsel %vm5809_vm8, %v2798_v51, %v2796_v3 }
 0x470   : > { %v2736_v2 = vadd.f32 %v2714_v34, %v2622_v20  ;;  %v2769_v43 = vrot.slane %v2762_v60, %v4341_v39  ;;  %v2812_v30 = vcombine.low %v2800_v18, %v2801_v41  ;;  %v3094_v60 = vld [vmem:[#allocation5 + $0x57] ss:$8 sm:$0x3] }
 0x472   : > { %v2771_v58 = vmul.f32 %v2769_v43, %v2752_v32  ;;  %v2819_v61 = vrot.slane %v2812_v30, %v4341_v39  ;;  %v2855_v50 = vpop.permute.xlu1 %2854  ;;  %v3145_v43 = vpop.permute.xlu0 %3144 }
 0x473   : > { %v2857_v47 = vsel %vm5810_vm9, %v2853_v48, %v2855_v50  ;;  %v2858_v45 = vsel %vm5811_vm10, %v2855_v50, %v2853_v48 }
 0x474   : > { %v2793_v29 = vadd.f32 %v2771_v58, %v2679_v9  ;;  %v2826_v10 = vrot.slane %v2819_v61, %v4341_v39  ;;  %v2869_v0 = vcombine.low %v2857_v47, %v2858_v45  ;;  %v3151_v61 = vld [vmem:[#allocation5 + $0x60] ss:$8 sm:$0x3] }
 0x476   : > { %v2828_v59 = vmul.f32 %v2826_v10, %v2809_v27  ;;  %v2876_v57 = vrot.slane %v2869_v0, %v4341_v39  ;;  %v2912_v25 = vpop.permute.xlu1 %2911 }
 0x477   : > { %v2914_v24 = vsel %vm5812_vm11, %v2910_v46, %v2912_v25  ;;  %v2915_v37 = vsel %vm5813_vm3, %v2912_v25, %v2910_v46 }
 0x478   : > { %v2850_v22 = vadd.f32 %v2828_v59, %v2736_v2  ;;  %v2883_v3 = vrot.slane %v2876_v57, %v4341_v39  ;;  %v2926_v52 = vcombine.low %v2914_v24, %v2915_v37  ;;  %v3172_v59 = vld [vmem:[#allocation7 + $0x60] ss:$8 sm:$0x3] }
 0x47a   : > { %v2885_v40 = vmul.f32 %v2883_v3, %v2866_v54  ;;  %v2933_v63 = vrot.slane %v2926_v52, %v4341_v39  ;;  %v2969_v49 = vpop.permute.xlu1 %2968 }
 0x47b   : > { %v2971_v6 = vsel %vm5814_vm4, %v2967_v26, %v2969_v49  ;;  %v2972_v19 = vsel %vm5815_vm5, %v2969_v49, %v2967_v26 }
 0x47c   : > { %v2907_v38 = vadd.f32 %v2885_v40, %v2793_v29  ;;  %v2940_v21 = vrot.slane %v2933_v63, %v4341_v39  ;;  %v2983_v42 = vcombine.low %v2971_v6, %v2972_v19  ;;  %v5816_v40 = vld [vmem:[#allocation12_spill] sm:$0xff] }
 0x47d   : > { %v3206_v63 = vsub.s32 0, %v5816_v40 }
 0x47e   : > { %v2942_v53 = vmul.f32 %v2940_v21, %v2923_v5  ;;  %v2990_v48 = vrot.slane %v2983_v42, %v4341_v39  ;;  %v3026_v16 = vpop.permute.xlu1 %3025 }
 0x47f   : > { %v3028_v13 = vsel %vm3027_vm2, %v3024_v12, %v3026_v16  ;;  %v3029_v17 = vsel %vm3027_vm2, %v3026_v16, %v3024_v12  ;;  %vm3141_vm2 = vcmp.lt.s32.totalorder %v4277_v35, 77 }
 0x480   : > { %v2964_v8 = vadd.f32 %v2942_v53, %v2850_v22  ;;  %v2997_v7 = vrot.slane %v2990_v48, %v4341_v39  ;;  %v3040_v20 = vcombine.low %v3028_v13, %v3029_v17 }
 0x482   : > { %v2999_v15 = vmul.f32 %v2997_v7, %v2980_v62  ;;  %v3047_v1 = vrot.slane %v3040_v20, %v4341_v39  ;;  %v3083_v28 = vpop.permute.xlu1 %3082 }
 0x483   : > { %v3085_v33 = vsel %vm3084_vm0, %v3081_v56, %v3083_v28  ;;  %v3086_v55 = vsel %vm3084_vm0, %v3083_v28, %v3081_v56 }
 0x484   : > { %v3021_v11 = vadd.f32 %v2999_v15, %v2907_v38  ;;  %v3054_v46 = vrot.slane %v3047_v1, %v4341_v39  ;;  %v3097_v9 = vcombine.low %v3085_v33, %v3086_v55 }
 0x486   : > { %v3056_v31 = vmul.f32 %v3054_v46, %v3037_v23  ;;  %v3104_v44 = vrot.slane %v3097_v9, %v4341_v39  ;;  %v3140_v34 = vpop.permute.xlu1 %3139 }
 0x487   : > { %v3142_v51 = vsel %vm3141_vm2, %v3138_v14, %v3140_v34  ;;  %v3143_v32 = vsel %vm3141_vm2, %v3140_v34, %v3138_v14 }
 0x488   : > { %v3078_v18 = vadd.f32 %v3056_v31, %v2964_v8  ;;  %v3111_v41 = vrot.slane %v3104_v44, %v4341_v39  ;;  %v3154_v2 = vcombine.low %v3142_v51, %v3143_v32 }
 0x48a   : > { %v3113_v30 = vmul.f32 %v3111_v41, %v3094_v60  ;;  %v3161_v26 = vrot.slane %v3154_v2, %v4341_v39  ;;  %v3147_v58 = vpop.permute.xlu1 %3146 }
 0x48b   : > { %v3148_v50 = vsel %vm3141_vm2, %v3145_v43, %v3147_v58  ;;  %v3149_v27 = vsel %vm3141_vm2, %v3147_v58, %v3145_v43 }
 0x48c   : > { %v3135_v47 = vadd.f32 %v3113_v30, %v3021_v11  ;;  %v3168_v45 = vrot.slane %v3161_v26, %v4341_v39  ;;  %v3175_v29 = vcombine.low %v3148_v50, %v3149_v27 }
 0x48e   : > { %v3170_v10 = vmul.f32 %v3168_v45, %v3151_v61  ;;  %v3182_v0 = vrot.slane %v3175_v29, %v4341_v39 }
 0x490   : > { %v3192_v57 = vadd.f32 %v3170_v10, %v3078_v18  ;;  %v3189_v25 = vrot.slane %v3182_v0, %v4341_v39  ;;  %v3210_v39 = vsub.s32 1, %v5816_v40 }
 0x492   : > { %v3194_v54 = vadd.f32 %v3192_v57, %v3135_v47  ;;  %v3191_v24 = vmul.f32 %v3189_v25, %v3172_v59 }
 0x494   : > { %v3193_v37 = vadd.f32 %v3191_v24, %v4992_v4 }
 0x496   : > { %v3195_v35 = vadd.f32 %v3193_v37, %v5007_v36  ;;  %v5818_v36 = vld [vmem:[#allocation13_spill] sm:$0xff] }
 0x498   : > { %v3196_v12 = vadd.f32 %v3195_v35, %v3194_v54 }
 0x49a   : > { %v3336_v22 = vmul.f32 -1.442695, %v3196_v12 }
 0x49c   : > { %3479 = vpow2.f32 %v3336_v22 }
 0x4a6   : > { %v3480_v3 = vpop.eup %3479 }
 0x4a7   : > { %v3200_v52 = vadd.f32 1.0, %v3480_v3 }
 0x4a9   : > { %3481 = vrcp.f32 %v3200_v52 }
 0x4b3   : > { %v3482_v49 = vpop.eup %3481 }
 0x4b4   : > { %v3207_v5 = vrot.slane %v3482_v49, %v3206_v63  ;;  %v3211_v6 = vrot.slane %v3482_v49, %v3210_v39 }
 0x4b6   : > { %v3212_v4 = vcombine.low %v3207_v5, %v3211_v6 }
 0x4b8   : > { %v3214_v19 = vmul.f32 %v3212_v4, %v5818_v36 }
 0x4ba   : > { %3215 = vst [vmem:[%s269_s10] sm:$0xff] %v3214_v19 }
 0x4bb   : > { %3582 = shalt.err (!%p3579_p2)
}
 0x4bc   : > { %s3583_s12 = scalar_lea.hbm %s5479_s30, 128  ;;  %s3587_s11 = scalar_lea.hbm %s5528_s5, 256 }
 0x4bd   : > { %p3584_p13 = scmp.ne.s32.totalorder %s5479_s30, %s3583_s12  ;;  %p3588_p4 = scmp.lt.u32.totalorder %s5479_s30, %s5528_s5 }
 0x4be   : > { %p3589_p5 = scmp.lt.u32.totalorder %s3587_s11, %s3583_s12  ;;  %p3591_p11 = scmp.lt.u32.totalorder %s3583_s12, %s5479_s30 }
 0x4bf   : > { %p3585_p6 = pnand %p3584_p13, %p5819_p0 }
 0x4c0   : > { %p3590_p8 = por %p3589_p5, %p3588_p4 }
 0x4c1   : > { %p3586_p10 = pneg %p3585_p6 }
 0x4c2   : > { %p3592_p1 = por %p3591_p11, %p3590_p8 }
 0x4c4   : > { %p3593_p3 = pnand %p3592_p1, %p3586_p10 }
 0x4c6   : > { %3596 = shalt.err (!%p3593_p3)
}
 0x4c7   : > { %3361 = dma.vmem_to_hbm [thread:$0]  (%p5819_p0), %s5481_s13, 128, %s5479_s30, %s3217_s15  }
 0x4c8 PF: > { %s3243_s8 = sand.u32 1, %s3627_s18   ;;  %p5820_p7 = scmp.ne.s32.totalorder %s5668_s25, 0 }
 0x4c9   : > { %p5821_p9 = scmp.ge.s32.totalorder %s3639_s21, 2  ;;  %s3244_s10 = scalar_lea.sflag [#allocation4], %s3243_s8 }
 0x4cb   : > { %p3375_p12 = pnand %p5821_p9, %p5820_p7 }
 0x4cd   : > { %3622 = dma.done.wait (!%p3375_p12), %s3244_s10, 128  }
 0x4ce   : > { %3624 = vsyncadd (!%p3375_p12), %s3244_s10, 4294967168  ;;  %p19_p2 = scmp.ge.s32.totalorder %s3840_s14, 4   ;;  %s5822_s18 = smov %s3631_s19 }
 0x4cf   : > { %s5823_s19 = smov %s3635_s20  ;;  %s5824_s20 = smov %s3856_s27 }
 0x4d0   : > { %s5825_s21 = smov %s3840_s14  ;;  %21 = sbr.rel (!%p19_p2) target bundleno = 6 (0x6), region = 189 }
 0x4d7   :  { %3249 = vsyncpa [#allocation3], 1 }
 0x4d8   :  { %3251 = vsyncpa [#allocation3 + $0x1], 1 }
 0x4d9   :  { %3252 = vsyncpa [#allocation6], 1 }
 0x4da   :  { %3253 = vsyncpa [#allocation4], 1 }
 0x4db   :  { %3255 = vsyncpa [#allocation4 + $0x1], 1 }

</bundles_post_ra>
